<compile_context>
chip_gen: v6e
topology: v6e:2x2x1
jax: 0.10.0
libtpu: 0.0.40
codegen_flags: <defaults>
</compile_context>

<pallas_src>
import jax
import jax.numpy as jnp
from jax.experimental import pallas as pl
from jax.experimental.pallas import tpu as pltpu


# ----------------------------------------------------------------------------
# small helpers
# ----------------------------------------------------------------------------
def _pad_to(a, axis, target):
    pad = [(0, 0)] * a.ndim
    pad[axis] = (0, target - a.shape[axis])
    return jnp.pad(a, pad)


def _full_spec(shape):
    n = len(shape)
    return pl.BlockSpec(shape, lambda i, n=n: (0,) * n)


# ----------------------------------------------------------------------------
# Pallas kernels
# ----------------------------------------------------------------------------
def _conv_relu_pool_kernel(p_ref, w_ref, b_ref, o_ref):
    """Fused conv (as matmul over pre-grouped im2col rows) + bias + ReLU + pool.

    p_ref: (1, 4, R, Kp)  im2col patches for one batch element; dim1 indexes
                          the 2x2 pool phase (hsub*2 + wsub); rows r = hp*Wp+wp.
    w_ref: (Kp, Cp)       zero-padded weight matrix (features x out-channels).
    b_ref: (1, Cp)        zero-padded bias.
    o_ref: (1, R, Cp)     pooled activations (lane-dense; padded lanes are 0).
    """
    w = w_ref[...]
    z = jnp.dot(p_ref[0, 0], w, preferred_element_type=jnp.float32)
    for s in range(1, 4):
        z = jnp.maximum(z, jnp.dot(p_ref[0, s], w,
                                   preferred_element_type=jnp.float32))
    # max over pool phases commutes with the shared bias + monotone ReLU.
    o_ref[0] = jnp.maximum(z + b_ref[...], 0.0).astype(o_ref.dtype)


def _conv_relu_pool(patches, w, b):
    N, G, R, Kp = patches.shape
    Kw, Cp = w.shape
    return pl.pallas_call(
        _conv_relu_pool_kernel,
        out_shape=jax.ShapeDtypeStruct((N, R, Cp), jnp.float32),
        grid=(N,),
        in_specs=[
            pl.BlockSpec((1, G, R, Kp), lambda n: (n, 0, 0, 0)),
            pl.BlockSpec((Kw, Cp), lambda n: (0, 0)),
            pl.BlockSpec((1, Cp), lambda n: (0, 0)),
        ],
        out_specs=pl.BlockSpec((1, R, Cp), lambda n: (n, 0, 0)),
        compiler_params=pltpu.CompilerParams(
            dimension_semantics=("parallel",)),
    )(patches, w, b)


def _mlp_kernel(x_ref, w1_ref, b1_ref, w2_ref, b2_ref, w3_ref, b3_ref, o_ref):
    """fc1 -> ReLU -> fc2 -> ReLU -> fc3, fully resident in VMEM."""
    h = jnp.dot(x_ref[...], w1_ref[...],
                preferred_element_type=jnp.float32) + b1_ref[...]
    h = jnp.maximum(h, 0.0)
    h = jnp.dot(h, w2_ref[...],
                preferred_element_type=jnp.float32) + b2_ref[...]
    h = jnp.maximum(h, 0.0)
    h = jnp.dot(h, w3_ref[...],
                preferred_element_type=jnp.float32) + b3_ref[...]
    o_ref[...] = h.astype(o_ref.dtype)


def _fused_mlp(x, w1, b1, w2, b2, w3, b3):
    N = x.shape[0]
    cout = w3.shape[1]
    return pl.pallas_call(
        _mlp_kernel,
        out_shape=jax.ShapeDtypeStruct((N, cout), jnp.float32),
        grid=(1,),
        in_specs=[_full_spec(x.shape), _full_spec(w1.shape), _full_spec(b1.shape),
                  _full_spec(w2.shape), _full_spec(b2.shape),
                  _full_spec(w3.shape), _full_spec(b3.shape)],
        out_specs=_full_spec((N, cout)),
    )(x, w1, b1, w2, b2, w3, b3)


# ----------------------------------------------------------------------------
# Host-side glue: pool-phase-grouped im2col (pure data rearrangement, tiny)
# ----------------------------------------------------------------------------
def _conv1_patches(x):
    # x: (N, 3, 32, 32) NCHW -> (N, 4, 196, 128);  feature order f=(kh*5+kw)*3+c
    N = x.shape[0]
    cols = [x[:, :, kh:kh + 28, kw:kw + 28] for kh in range(5) for kw in range(5)]
    p = jnp.stack(cols, axis=1)                    # (N, 25, 3, 28, 28)
    p = p.reshape(N, 75, 14, 2, 14, 2)             # (n, f, hp, hs, wp, ws)
    p = p.transpose(0, 3, 5, 2, 4, 1)              # (n, hs, ws, hp, wp, f)
    p = p.reshape(N, 4, 196, 75)
    return _pad_to(p, 3, 128)


def _conv2_patches(m1):
    # m1: (N, 14, 14, 6) NHWC -> (N, 4, 25, 256);  feature order f=(kh*5+kw)*6+c
    N = m1.shape[0]
    cols = [m1[:, kh:kh + 10, kw:kw + 10, :] for kh in range(5) for kw in range(5)]
    p = jnp.stack(cols, axis=3)                    # (N, 10, 10, 25, 6)
    p = p.reshape(N, 5, 2, 5, 2, 150)              # (n, hp, hs, wp, ws, f)
    p = p.transpose(0, 2, 4, 1, 3, 5)              # (n, hs, ws, hp, wp, f)
    p = p.reshape(N, 4, 25, 150)
    return _pad_to(p, 3, 256)


# ----------------------------------------------------------------------------
# One-time host-side weight re-layout (PyTorch layout -> padded kernel layout)
# ----------------------------------------------------------------------------
def prepare_params(params):
    (w1, b1, w2, b2, wf1, bf1, wf2, bf2, wf3, bf3) = params
    out_size = wf3.shape[0]

    # conv1: (6,3,5,5) -> (75,6) with feature order (kh,kw,c), padded (128,128)
    w1m = w1.transpose(2, 3, 1, 0).reshape(75, 6)
    w1m = _pad_to(_pad_to(w1m, 0, 128), 1, 128).astype(jnp.float32)
    b1m = _pad_to(b1.reshape(1, 6), 1, 128).astype(jnp.float32)

    # conv2: (16,6,5,5) -> (150,16), padded (256,128)
    w2m = w2.transpose(2, 3, 1, 0).reshape(150, 16)
    w2m = _pad_to(_pad_to(w2m, 0, 256), 1, 128).astype(jnp.float32)
    b2m = _pad_to(b2.reshape(1, 16), 1, 128).astype(jnp.float32)

    # fc1: fold PyTorch's (C,H,W) flatten permutation into the weight rows.
    # conv2 kernel output layout is (N, 25, 128) with row r = h*5+w, lane = c,
    # so the flattened feature index is q = r*128 + c  and we need
    # wf1m[q, j] = wf1[j, c*25 + r].
    a = wf1.reshape(120, 16, 25).transpose(2, 1, 0)       # (r, c, j)
    a = _pad_to(_pad_to(a, 1, 128), 2, 128)               # (25, 128, 128)
    wf1m = a.reshape(25 * 128, 128).astype(jnp.float32)   # (3200, 128)
    bf1m = _pad_to(bf1.reshape(1, 120), 1, 128).astype(jnp.float32)

    wf2m = _pad_to(_pad_to(wf2.T, 0, 128), 1, 128).astype(jnp.float32)
    bf2m = _pad_to(bf2.reshape(1, 84), 1, 128).astype(jnp.float32)

    wf3m = _pad_to(wf3.T, 0, 128).astype(jnp.float32)     # (128, out_size)
    bf3m = bf3.reshape(1, out_size).astype(jnp.float32)

    return (w1m, b1m, w2m, b2m, wf1m, bf1m, wf2m, bf2m, wf3m, bf3m)


# ----------------------------------------------------------------------------
# LeNet5_cifar forward
# ----------------------------------------------------------------------------
def lenet5_cifar_forward(x, prepped):
    """x: (N, 3, 32, 32) float32 NCHW -> logits (N, out_size)."""
    (w1m, b1m, w2m, b2m, wf1m, bf1m, wf2m, bf2m, wf3m, bf3m) = prepped
    N = x.shape[0]

    # conv1 + relu + 2x2 pool  (fused kernel): (N,3,32,32) -> (N, 196, 128)
    p1 = _conv1_patches(x.astype(jnp.float32))
    o1 = _conv_relu_pool(p1, w1m, b1m)           # rows = 14x14 map, lanes>=6 are 0

    # conv2 + relu + 2x2 pool  (fused kernel): -> (N, 25, 128)
    m1 = o1[:, :, :6].reshape(N, 14, 14, 6)      # (n, hp, wp, c), NHWC
    p2 = _conv2_patches(m1)
    o2 = _conv_relu_pool(p2, w2m, b2m)           # rows = 5x5 map, lanes>=16 are 0

    # fc1 -> relu -> fc2 -> relu -> fc3 (single fused kernel).  The PyTorch
    # (C,H,W) flatten permutation lives in wf1m, so this reshape is free.
    flat = o2.reshape(N, 25 * 128)               # (N, 3200)
    return _fused_mlp(flat, wf1m, bf1m, wf2m, bf2m, wf3m, bf3m)


def init_params(key, out_size=10):
    """Deterministic synthetic params with PyTorch-layout shapes."""
    def uniform(k, shape, fan_in):
        bound = 1.0 / jnp.sqrt(jnp.float32(fan_in))
        return jax.random.uniform(k, shape, jnp.float32, -bound, bound)

    ks = jax.random.split(key, 10)
    w1 = uniform(ks[0], (6, 3, 5, 5), 3 * 5 * 5)
    b1 = uniform(ks[1], (6,), 3 * 5 * 5)
    w2 = uniform(ks[2], (16, 6, 5, 5), 6 * 5 * 5)
    b2 = uniform(ks[3], (16,), 6 * 5 * 5)
    wf1 = uniform(ks[4], (120, 400), 400)
    bf1 = uniform(ks[5], (120,), 400)
    wf2 = uniform(ks[6], (84, 120), 120)
    bf2 = uniform(ks[7], (84,), 120)
    wf3 = uniform(ks[8], (out_size, 84), 84)
    bf3 = uniform(ks[9], (out_size,), 84)
    return (w1, b1, w2, b2, wf1, bf1, wf2, bf2, wf3, bf3)


if __name__ == "__main__":
    key = jax.random.PRNGKey(0)
    k_x, k_p = jax.random.split(key)

    # LeNet5_cifar requires 32x32x3 inputs (fc1 expects 16*5*5); batch = 2.
    x = jax.random.normal(k_x, (2, 3, 32, 32), dtype=jnp.float32)
    params = init_params(k_p, out_size=10)
    prepped = prepare_params(params)          # one-time weight re-layout

    fwd = jax.jit(lenet5_cifar_forward)
    logits = jax.block_until_ready(fwd(x, prepped))

    assert logits.shape == (2, 10), logits.shape
    assert logits.dtype == jnp.float32
    print("KERNEL_OK")
</pallas_src>

<mosaic_0001>
module attributes {stable_mosaic.version = 11 : i64} {
  func.func @_conv_relu_pool_kernel(%arg0: i32, %arg1: memref<1x4x196x128xf32, #tpu.memory_space<vmem>>, %arg2: memref<128x128xf32, #tpu.memory_space<vmem>>, %arg3: memref<1x128xf32, #tpu.memory_space<vmem>>, %arg4: memref<1x196x128xf32, #tpu.memory_space<vmem>>) attributes {dimension_semantics = [#tpu.dimension_semantics<parallel>], iteration_bounds = array<i64: 2>, scalar_prefetch = 0 : i64, scratch_operands = 0 : i64, tpu.core_type = #tpu.core_type<tc>, window_params = [{transform_indices = @transform_0, window_bounds = array<i64: 1, 4, 196, 128>}, {pipeline_mode = #tpu.pipeline_mode<synchronous>, transform_indices = @transform_1, window_bounds = array<i64: 128, 128>}, {pipeline_mode = #tpu.pipeline_mode<synchronous>, transform_indices = @transform_2, window_bounds = array<i64: 1, 128>}, {transform_indices = @transform_3, window_bounds = array<i64: 1, 196, 128>}]} {
    %c0 = arith.constant 0 : index
    %c0_0 = arith.constant 0 : index
    %0 = vector.load %arg2[%c0, %c0_0] : memref<128x128xf32, #tpu.memory_space<vmem>>, vector<128x128xf32>
    %c0_1 = arith.constant 0 : index
    %c0_2 = arith.constant 0 : index
    %c0_3 = arith.constant 0 : index
    %c0_4 = arith.constant 0 : index
    %1 = vector.load %arg1[%c0_1, %c0_2, %c0_3, %c0_4] : memref<1x4x196x128xf32, #tpu.memory_space<vmem>>, vector<1x1x196x128xf32>
    %2 = vector.shape_cast %1 : vector<1x1x196x128xf32> to vector<196x128xf32>
    %cst = arith.constant dense<0.000000e+00> : vector<196x128xf32>
    %3 = tpu.matmul %2, %0, %cst {dimension_numbers = #tpu.dot_dimension_numbers<[1], [0], [0], [1], [0, 0, 1, 1], [], []>} : vector<196x128xf32>, vector<128x128xf32>, vector<196x128xf32> -> vector<196x128xf32>
    %c0_5 = arith.constant 0 : index
    %c1 = arith.constant 1 : index
    %c0_6 = arith.constant 0 : index
    %c0_7 = arith.constant 0 : index
    %4 = vector.load %arg1[%c0_5, %c1, %c0_6, %c0_7] : memref<1x4x196x128xf32, #tpu.memory_space<vmem>>, vector<1x1x196x128xf32>
    %5 = vector.shape_cast %4 : vector<1x1x196x128xf32> to vector<196x128xf32>
    %cst_8 = arith.constant dense<0.000000e+00> : vector<196x128xf32>
    %6 = tpu.matmul %5, %0, %cst_8 {dimension_numbers = #tpu.dot_dimension_numbers<[1], [0], [0], [1], [0, 0, 1, 1], [], []>} : vector<196x128xf32>, vector<128x128xf32>, vector<196x128xf32> -> vector<196x128xf32>
    %7 = arith.maximumf %3, %6 : vector<196x128xf32>
    %c0_9 = arith.constant 0 : index
    %c2 = arith.constant 2 : index
    %c0_10 = arith.constant 0 : index
    %c0_11 = arith.constant 0 : index
    %8 = vector.load %arg1[%c0_9, %c2, %c0_10, %c0_11] : memref<1x4x196x128xf32, #tpu.memory_space<vmem>>, vector<1x1x196x128xf32>
    %9 = vector.shape_cast %8 : vector<1x1x196x128xf32> to vector<196x128xf32>
    %cst_12 = arith.constant dense<0.000000e+00> : vector<196x128xf32>
    %10 = tpu.matmul %9, %0, %cst_12 {dimension_numbers = #tpu.dot_dimension_numbers<[1], [0], [0], [1], [0, 0, 1, 1], [], []>} : vector<196x128xf32>, vector<128x128xf32>, vector<196x128xf32> -> vector<196x128xf32>
    %11 = arith.maximumf %7, %10 : vector<196x128xf32>
    %c0_13 = arith.constant 0 : index
    %c3 = arith.constant 3 : index
    %c0_14 = arith.constant 0 : index
    %c0_15 = arith.constant 0 : index
    %12 = vector.load %arg1[%c0_13, %c3, %c0_14, %c0_15] : memref<1x4x196x128xf32, #tpu.memory_space<vmem>>, vector<1x1x196x128xf32>
    %13 = vector.shape_cast %12 : vector<1x1x196x128xf32> to vector<196x128xf32>
    %cst_16 = arith.constant dense<0.000000e+00> : vector<196x128xf32>
    %14 = tpu.matmul %13, %0, %cst_16 {dimension_numbers = #tpu.dot_dimension_numbers<[1], [0], [0], [1], [0, 0, 1, 1], [], []>} : vector<196x128xf32>, vector<128x128xf32>, vector<196x128xf32> -> vector<196x128xf32>
    %15 = arith.maximumf %11, %14 : vector<196x128xf32>
    %c0_17 = arith.constant 0 : index
    %c0_18 = arith.constant 0 : index
    %16 = vector.load %arg3[%c0_17, %c0_18] : memref<1x128xf32, #tpu.memory_space<vmem>>, vector<1x128xf32>
    %17 = vector.broadcast %16 : vector<1x128xf32> to vector<196x128xf32>
    %18 = arith.addf %15, %17 : vector<196x128xf32>
    %cst_19 = arith.constant 0.000000e+00 : f32
    %19 = vector.broadcast %cst_19 : f32 to vector<196x128xf32>
    %20 = arith.maximumf %18, %19 : vector<196x128xf32>
    %c0_20 = arith.constant 0 : index
    %c0_21 = arith.constant 0 : index
    %c0_22 = arith.constant 0 : index
    %21 = vector.load %arg4[%c0_20, %c0_21, %c0_22] : memref<1x196x128xf32, #tpu.memory_space<vmem>>, vector<1x196x128xf32>
    %22 = vector.shape_cast %21 : vector<1x196x128xf32> to vector<196x128xf32>
    %23 = vector.shape_cast %20 : vector<196x128xf32> to vector<1x196x128xf32>
    tpu.vector_store %arg4[%c0_20, %c0_21, %c0_22], %23 {strides = array<i32>} : memref<1x196x128xf32, #tpu.memory_space<vmem>>, vector<1x196x128xf32>,
    return
  }
  func.func @transform_0(%arg0: i32) -> (i32, i32, i32, i32) {
    %c0_i32 = arith.constant 0 : i32
    %c0_i32_0 = arith.constant 0 : i32
    %c0_i32_1 = arith.constant 0 : i32
    %c0_i32_2 = arith.constant 0 : i32
    return %arg0, %c0_i32, %c0_i32_0, %c0_i32_1 : i32, i32, i32, i32
  }
  func.func @transform_1(%arg0: i32) -> (i32, i32) {
    %c0_i32 = arith.constant 0 : i32
    %c0_i32_0 = arith.constant 0 : i32
    %c0_i32_1 = arith.constant 0 : i32
    return %c0_i32, %c0_i32_0 : i32, i32
  }
  func.func @transform_2(%arg0: i32) -> (i32, i32) {
    %c0_i32 = arith.constant 0 : i32
    %c0_i32_0 = arith.constant 0 : i32
    %c0_i32_1 = arith.constant 0 : i32
    return %c0_i32, %c0_i32_0 : i32, i32
  }
  func.func @transform_3(%arg0: i32) -> (i32, i32, i32) {
    %c0_i32 = arith.constant 0 : i32
    %c0_i32_0 = arith.constant 0 : i32
    %c0_i32_1 = arith.constant 0 : i32
    return %arg0, %c0_i32, %c0_i32_0 : i32, i32, i32
  }
}

module attributes {stable_mosaic.version = 11 : i64} {
  func.func @_conv_relu_pool_kernel(%arg0: i32, %arg1: memref<1x4x25x256xf32, #tpu.memory_space<vmem>>, %arg2: memref<256x128xf32, #tpu.memory_space<vmem>>, %arg3: memref<1x128xf32, #tpu.memory_space<vmem>>, %arg4: memref<1x25x128xf32, #tpu.memory_space<vmem>>) attributes {dimension_semantics = [#tpu.dimension_semantics<parallel>], iteration_bounds = array<i64: 2>, scalar_prefetch = 0 : i64, scratch_operands = 0 : i64, tpu.core_type = #tpu.core_type<tc>, window_params = [{transform_indices = @transform_0, window_bounds = array<i64: 1, 4, 25, 256>}, {pipeline_mode = #tpu.pipeline_mode<synchronous>, transform_indices = @transform_1, window_bounds = array<i64: 256, 128>}, {pipeline_mode = #tpu.pipeline_mode<synchronous>, transform_indices = @transform_2, window_bounds = array<i64: 1, 128>}, {transform_indices = @transform_3, window_bounds = array<i64: 1, 25, 128>}]} {
    %c0 = arith.constant 0 : index
    %c0_0 = arith.constant 0 : index
    %0 = vector.load %arg2[%c0, %c0_0] : memref<256x128xf32, #tpu.memory_space<vmem>>, vector<256x128xf32>
    %c0_1 = arith.constant 0 : index
    %c0_2 = arith.constant 0 : index
    %c0_3 = arith.constant 0 : index
    %c0_4 = arith.constant 0 : index
    %1 = vector.load %arg1[%c0_1, %c0_2, %c0_3, %c0_4] : memref<1x4x25x256xf32, #tpu.memory_space<vmem>>, vector<1x1x25x256xf32>
    %2 = vector.shape_cast %1 : vector<1x1x25x256xf32> to vector<25x256xf32>
    %cst = arith.constant dense<0.000000e+00> : vector<25x128xf32>
    %3 = tpu.matmul %2, %0, %cst {dimension_numbers = #tpu.dot_dimension_numbers<[1], [0], [0], [1], [0, 0, 1, 1], [], []>} : vector<25x256xf32>, vector<256x128xf32>, vector<25x128xf32> -> vector<25x128xf32>
    %c0_5 = arith.constant 0 : index
    %c1 = arith.constant 1 : index
    %c0_6 = arith.constant 0 : index
    %c0_7 = arith.constant 0 : index
    %4 = vector.load %arg1[%c0_5, %c1, %c0_6, %c0_7] : memref<1x4x25x256xf32, #tpu.memory_space<vmem>>, vector<1x1x25x256xf32>
    %5 = vector.shape_cast %4 : vector<1x1x25x256xf32> to vector<25x256xf32>
    %cst_8 = arith.constant dense<0.000000e+00> : vector<25x128xf32>
    %6 = tpu.matmul %5, %0, %cst_8 {dimension_numbers = #tpu.dot_dimension_numbers<[1], [0], [0], [1], [0, 0, 1, 1], [], []>} : vector<25x256xf32>, vector<256x128xf32>, vector<25x128xf32> -> vector<25x128xf32>
    %7 = arith.maximumf %3, %6 : vector<25x128xf32>
    %c0_9 = arith.constant 0 : index
    %c2 = arith.constant 2 : index
    %c0_10 = arith.constant 0 : index
    %c0_11 = arith.constant 0 : index
    %8 = vector.load %arg1[%c0_9, %c2, %c0_10, %c0_11] : memref<1x4x25x256xf32, #tpu.memory_space<vmem>>, vector<1x1x25x256xf32>
    %9 = vector.shape_cast %8 : vector<1x1x25x256xf32> to vector<25x256xf32>
    %cst_12 = arith.constant dense<0.000000e+00> : vector<25x128xf32>
    %10 = tpu.matmul %9, %0, %cst_12 {dimension_numbers = #tpu.dot_dimension_numbers<[1], [0], [0], [1], [0, 0, 1, 1], [], []>} : vector<25x256xf32>, vector<256x128xf32>, vector<25x128xf32> -> vector<25x128xf32>
    %11 = arith.maximumf %7, %10 : vector<25x128xf32>
    %c0_13 = arith.constant 0 : index
    %c3 = arith.constant 3 : index
    %c0_14 = arith.constant 0 : index
    %c0_15 = arith.constant 0 : index
    %12 = vector.load %arg1[%c0_13, %c3, %c0_14, %c0_15] : memref<1x4x25x256xf32, #tpu.memory_space<vmem>>, vector<1x1x25x256xf32>
    %13 = vector.shape_cast %12 : vector<1x1x25x256xf32> to vector<25x256xf32>
    %cst_16 = arith.constant dense<0.000000e+00> : vector<25x128xf32>
    %14 = tpu.matmul %13, %0, %cst_16 {dimension_numbers = #tpu.dot_dimension_numbers<[1], [0], [0], [1], [0, 0, 1, 1], [], []>} : vector<25x256xf32>, vector<256x128xf32>, vector<25x128xf32> -> vector<25x128xf32>
    %15 = arith.maximumf %11, %14 : vector<25x128xf32>
    %c0_17 = arith.constant 0 : index
    %c0_18 = arith.constant 0 : index
    %16 = vector.load %arg3[%c0_17, %c0_18] : memref<1x128xf32, #tpu.memory_space<vmem>>, vector<1x128xf32>
    %17 = vector.broadcast %16 : vector<1x128xf32> to vector<25x128xf32>
    %18 = arith.addf %15, %17 : vector<25x128xf32>
    %cst_19 = arith.constant 0.000000e+00 : f32
    %19 = vector.broadcast %cst_19 : f32 to vector<25x128xf32>
    %20 = arith.maximumf %18, %19 : vector<25x128xf32>
    %c0_20 = arith.constant 0 : index
    %c0_21 = arith.constant 0 : index
    %c0_22 = arith.constant 0 : index
    %21 = vector.load %arg4[%c0_20, %c0_21, %c0_22] : memref<1x25x128xf32, #tpu.memory_space<vmem>>, vector<1x25x128xf32>
    %22 = vector.shape_cast %21 : vector<1x25x128xf32> to vector<25x128xf32>
    %23 = vector.shape_cast %20 : vector<25x128xf32> to vector<1x25x128xf32>
    tpu.vector_store %arg4[%c0_20, %c0_21, %c0_22], %23 {strides = array<i32>} : memref<1x25x128xf32, #tpu.memory_space<vmem>>, vector<1x25x128xf32>,
    return
  }
  func.func @transform_0(%arg0: i32) -> (i32, i32, i32, i32) {
    %c0_i32 = arith.constant 0 : i32
    %c0_i32_0 = arith.constant 0 : i32
    %c0_i32_1 = arith.constant 0 : i32
    %c0_i32_2 = arith.constant 0 : i32
    return %arg0, %c0_i32, %c0_i32_0, %c0_i32_1 : i32, i32, i32, i32
  }
  func.func @transform_1(%arg0: i32) -> (i32, i32) {
    %c0_i32 = arith.constant 0 : i32
    %c0_i32_0 = arith.constant 0 : i32
    %c0_i32_1 = arith.constant 0 : i32
    return %c0_i32, %c0_i32_0 : i32, i32
  }
  func.func @transform_2(%arg0: i32) -> (i32, i32) {
    %c0_i32 = arith.constant 0 : i32
    %c0_i32_0 = arith.constant 0 : i32
    %c0_i32_1 = arith.constant 0 : i32
    return %c0_i32, %c0_i32_0 : i32, i32
  }
  func.func @transform_3(%arg0: i32) -> (i32, i32, i32) {
    %c0_i32 = arith.constant 0 : i32
    %c0_i32_0 = arith.constant 0 : i32
    %c0_i32_1 = arith.constant 0 : i32
    return %arg0, %c0_i32, %c0_i32_0 : i32, i32, i32
  }
}

module attributes {stable_mosaic.version = 11 : i64} {
  func.func @_mlp_kernel(%arg0: i32, %arg1: memref<2x3200xf32, #tpu.memory_space<vmem>>, %arg2: memref<3200x128xf32, #tpu.memory_space<vmem>>, %arg3: memref<1x128xf32, #tpu.memory_space<vmem>>, %arg4: memref<128x128xf32, #tpu.memory_space<vmem>>, %arg5: memref<1x128xf32, #tpu.memory_space<vmem>>, %arg6: memref<128x10xf32, #tpu.memory_space<vmem>>, %arg7: memref<1x10xf32, #tpu.memory_space<vmem>>, %arg8: memref<2x10xf32, #tpu.memory_space<vmem>>) attributes {dimension_semantics = [#tpu.dimension_semantics<arbitrary>], iteration_bounds = array<i64: 1>, scalar_prefetch = 0 : i64, scratch_operands = 0 : i64, tpu.core_type = #tpu.core_type<tc>, window_params = [{pipeline_mode = #tpu.pipeline_mode<synchronous>, transform_indices = @transform_0, window_bounds = array<i64: 2, 3200>}, {pipeline_mode = #tpu.pipeline_mode<synchronous>, transform_indices = @transform_1, window_bounds = array<i64: 3200, 128>}, {pipeline_mode = #tpu.pipeline_mode<synchronous>, transform_indices = @transform_2, window_bounds = array<i64: 1, 128>}, {pipeline_mode = #tpu.pipeline_mode<synchronous>, transform_indices = @transform_3, window_bounds = array<i64: 128, 128>}, {pipeline_mode = #tpu.pipeline_mode<synchronous>, transform_indices = @transform_4, window_bounds = array<i64: 1, 128>}, {pipeline_mode = #tpu.pipeline_mode<synchronous>, transform_indices = @transform_5, window_bounds = array<i64: 128, 10>}, {pipeline_mode = #tpu.pipeline_mode<synchronous>, transform_indices = @transform_6, window_bounds = array<i64: 1, 10>}, {pipeline_mode = #tpu.pipeline_mode<synchronous>, transform_indices = @transform_7, window_bounds = array<i64: 2, 10>}]} {
    %c0 = arith.constant 0 : index
    %c0_0 = arith.constant 0 : index
    %0 = vector.load %arg1[%c0, %c0_0] : memref<2x3200xf32, #tpu.memory_space<vmem>>, vector<2x3200xf32>
    %c0_1 = arith.constant 0 : index
    %c0_2 = arith.constant 0 : index
    %1 = vector.load %arg2[%c0_1, %c0_2] : memref<3200x128xf32, #tpu.memory_space<vmem>>, vector<3200x128xf32>
    %cst = arith.constant dense<0.000000e+00> : vector<2x128xf32>
    %2 = tpu.matmul %0, %1, %cst {dimension_numbers = #tpu.dot_dimension_numbers<[1], [0], [0], [1], [0, 0, 1, 1], [], []>} : vector<2x3200xf32>, vector<3200x128xf32>, vector<2x128xf32> -> vector<2x128xf32>
    %c0_3 = arith.constant 0 : index
    %c0_4 = arith.constant 0 : index
    %3 = vector.load %arg3[%c0_3, %c0_4] : memref<1x128xf32, #tpu.memory_space<vmem>>, vector<1x128xf32>
    %4 = vector.broadcast %3 : vector<1x128xf32> to vector<2x128xf32>
    %5 = arith.addf %2, %4 : vector<2x128xf32>
    %cst_5 = arith.constant 0.000000e+00 : f32
    %6 = vector.broadcast %cst_5 : f32 to vector<2x128xf32>
    %7 = arith.maximumf %5, %6 : vector<2x128xf32>
    %c0_6 = arith.constant 0 : index
    %c0_7 = arith.constant 0 : index
    %8 = vector.load %arg4[%c0_6, %c0_7] : memref<128x128xf32, #tpu.memory_space<vmem>>, vector<128x128xf32>
    %cst_8 = arith.constant dense<0.000000e+00> : vector<2x128xf32>
    %9 = tpu.matmul %7, %8, %cst_8 {dimension_numbers = #tpu.dot_dimension_numbers<[1], [0], [0], [1], [0, 0, 1, 1], [], []>} : vector<2x128xf32>, vector<128x128xf32>, vector<2x128xf32> -> vector<2x128xf32>
    %c0_9 = arith.constant 0 : index
    %c0_10 = arith.constant 0 : index
    %10 = vector.load %arg5[%c0_9, %c0_10] : memref<1x128xf32, #tpu.memory_space<vmem>>, vector<1x128xf32>
    %11 = vector.broadcast %10 : vector<1x128xf32> to vector<2x128xf32>
    %12 = arith.addf %9, %11 : vector<2x128xf32>
    %cst_11 = arith.constant 0.000000e+00 : f32
    %13 = vector.broadcast %cst_11 : f32 to vector<2x128xf32>
    %14 = arith.maximumf %12, %13 : vector<2x128xf32>
    %c0_12 = arith.constant 0 : index
    %c0_13 = arith.constant 0 : index
    %15 = vector.load %arg6[%c0_12, %c0_13] : memref<128x10xf32, #tpu.memory_space<vmem>>, vector<128x10xf32>
    %cst_14 = arith.constant dense<0.000000e+00> : vector<2x10xf32>
    %16 = tpu.matmul %14, %15, %cst_14 {dimension_numbers = #tpu.dot_dimension_numbers<[1], [0], [0], [1], [0, 0, 1, 1], [], []>} : vector<2x128xf32>, vector<128x10xf32>, vector<2x10xf32> -> vector<2x10xf32>
    %c0_15 = arith.constant 0 : index
    %c0_16 = arith.constant 0 : index
    %17 = vector.load %arg7[%c0_15, %c0_16] : memref<1x10xf32, #tpu.memory_space<vmem>>, vector<1x10xf32>
    %18 = vector.broadcast %17 : vector<1x10xf32> to vector<2x10xf32>
    %19 = arith.addf %16, %18 : vector<2x10xf32>
    %c0_17 = arith.constant 0 : index
    %c0_18 = arith.constant 0 : index
    %20 = vector.load %arg8[%c0_17, %c0_18] : memref<2x10xf32, #tpu.memory_space<vmem>>, vector<2x10xf32>
    tpu.vector_store %arg8[%c0_17, %c0_18], %19 {strides = array<i32>} : memref<2x10xf32, #tpu.memory_space<vmem>>, vector<2x10xf32>,
    return
  }
  func.func @transform_0(%arg0: i32) -> (i32, i32) {
    %c0_i32 = arith.constant 0 : i32
    %c0_i32_0 = arith.constant 0 : i32
    %c0_i32_1 = arith.constant 0 : i32
    return %c0_i32, %c0_i32_0 : i32, i32
  }
  func.func @transform_1(%arg0: i32) -> (i32, i32) {
    %c0_i32 = arith.constant 0 : i32
    %c0_i32_0 = arith.constant 0 : i32
    %c0_i32_1 = arith.constant 0 : i32
    return %c0_i32, %c0_i32_0 : i32, i32
  }
  func.func @transform_2(%arg0: i32) -> (i32, i32) {
    %c0_i32 = arith.constant 0 : i32
    %c0_i32_0 = arith.constant 0 : i32
    %c0_i32_1 = arith.constant 0 : i32
    return %c0_i32, %c0_i32_0 : i32, i32
  }
  func.func @transform_3(%arg0: i32) -> (i32, i32) {
    %c0_i32 = arith.constant 0 : i32
    %c0_i32_0 = arith.constant 0 : i32
    %c0_i32_1 = arith.constant 0 : i32
    return %c0_i32, %c0_i32_0 : i32, i32
  }
  func.func @transform_4(%arg0: i32) -> (i32, i32) {
    %c0_i32 = arith.constant 0 : i32
    %c0_i32_0 = arith.constant 0 : i32
    %c0_i32_1 = arith.constant 0 : i32
    return %c0_i32, %c0_i32_0 : i32, i32
  }
  func.func @transform_5(%arg0: i32) -> (i32, i32) {
    %c0_i32 = arith.constant 0 : i32
    %c0_i32_0 = arith.constant 0 : i32
    %c0_i32_1 = arith.constant 0 : i32
    return %c0_i32, %c0_i32_0 : i32, i32
  }
  func.func @transform_6(%arg0: i32) -> (i32, i32) {
    %c0_i32 = arith.constant 0 : i32
    %c0_i32_0 = arith.constant 0 : i32
    %c0_i32_1 = arith.constant 0 : i32
    return %c0_i32, %c0_i32_0 : i32, i32
  }
  func.func @transform_7(%arg0: i32) -> (i32, i32) {
    %c0_i32 = arith.constant 0 : i32
    %c0_i32_0 = arith.constant 0 : i32
    %c0_i32_1 = arith.constant 0 : i32
    return %c0_i32, %c0_i32_0 : i32, i32
  }
}

</mosaic_0001>

<bundles_post_ra>
// kernel: lenet5_cifar_forward.3
= control target key start
LH: loop header
LB: loop body
LE: loop exit
PB: predicated region body
PF: predicated region fallthrough
CT: control target
= control target key end

     0   :  { %s1981_s12 = smov 0   ;;  %s2798_s0 = inlined_call_operand.vmem [shape: f32[2,4,196,128], index: 0, kind: input, shape index: {}]   ;;  %s2799_s1 = inlined_call_operand.vmem [shape: f32[128,128], index: 1, kind: input, shape index: {}]   ;;  %s2800_s2 = inlined_call_operand.vmem [shape: f32[1,128], index: 2, kind: input, shape index: {}]   ;;  %s2801_s3 = inlined_call_operand.vmem [shape: f32[2,196,128], index: 3, kind: output, shape index: {}]  }
   0x1 LB: > { %s1262_s13 = sadd.s32 4294967295, %s1957_s12   ;;  %p1266_p0 = scmp.ge.s32.totalorder %s1957_s12, 1  ;;  %s1957_s12 = sphi %s1981_s12, %s13_s12  }
   0x2   : > { %p137_p1 = scmp.lt.s32.totalorder %s1957_s12, 3 }
   0x4   : > { %p138_p2 = pnand %p1266_p0, %p137_p1 }
   0x5   : > { %p161_p3 = scmp.lt.s32.totalorder (!%p138_p2), %s1262_s13, 1 }
   0x6   : > { %141 = sbr.rel (%p138_p2) target bundleno = 442 (0x1ba), region = 32 }
   0xb   : > { %v1992_v0 = vld [vmem:[%s2799_s1 + $0x78] sm:$0xff]  ;;  %v1959_v1 = vmov 0.0   ;;  %v1999_v2 = vld [vmem:[%s2799_s1 + $0x70] sm:$0xff]  ;;  %v2008_v3 = vld [vmem:[%s2799_s1 + $0x68] sm:$0xff]  ;;  %s2825_s13 = smov (!%p161_p3, %s1262_s13), 1  ;;  %vm1960_vm0 = vmmov 0  }
   0xc   : > { %1511 = vmatprep.subr.mxu0 %v1959_v1  ;;  %1618 = vmatprep.subr.mxu1 %v1959_v1  ;;  %v2017_v4 = vld [vmem:[%s2799_s1 + $0x60] sm:$0xff]  ;;  %v2026_v5 = vld [vmem:[%s2799_s1 + $0x58] sm:$0xff]  ;;  %v2035_v6 = vld [vmem:[%s2799_s1 + $0x50] sm:$0xff]  ;;  %s1939_s15 = smul.u32 800, %s2825_s13 }
   0xd   : > { %1512 = vmatpush3.msra.mxu0 %v1992_v0  ;;  %1619 = vmatpush3.msra.mxu1 %v1992_v0  ;;  %v2044_v7 = vld [vmem:[%s2799_s1 + $0x48] sm:$0xff]  ;;  %v2053_v8 = vld [vmem:[%s2799_s1 + $0x40] sm:$0xff]  ;;  %v2062_v9 = vld [vmem:[%s2799_s1 + $0x38] sm:$0xff]  ;;  %s1940_s25 = smul.u32 200, %s2825_s13 }
   0xe   : > { %1513 = vmatprep.subr.mxu0 %v1959_v1  ;;  %1620 = vmatprep.subr.mxu1 %v1959_v1  ;;  %v2073_v10 = vld [vmem:[%s2799_s1 + $0x30] sm:$0xff]  ;;  %v2082_v11 = vld [vmem:[%s2799_s1 + $0x28] sm:$0xff]  ;;  %v2095_v12 = vld [vmem:[%s2799_s1 + $0x20] sm:$0xff]  ;;  %s2128_s22 = scalar_lea.vmem %s2798_s0, %s1939_s15 }
   0xf   : > { %1514 = vmatpush3.msra.mxu0 %v1999_v2  ;;  %1621 = vmatpush3.msra.mxu1 %v1999_v2  ;;  %v2104_v13 = vld [vmem:[%s2799_s1 + $0x18] sm:$0xff]  ;;  %v2114_v14 = vld [vmem:[%s2799_s1 + $0x10] sm:$0xff]  ;;  %v2123_v15 = vld [vmem:[%s2799_s1 + $0x8] sm:$0xff]  ;;  %s2675_s13 = scalar_lea.vmem %s2801_s3, %s1940_s25 }
  0x10   : > { %1515 = vmatprep.subr.mxu0 %v1959_v1  ;;  %1622 = vmatprep.subr.mxu1 %v1959_v1  ;;  %v2137_v16 = vld [vmem:[%s2799_s1] sm:$0xff]  ;;  %v1269_v18 = vld [vmem:[%s2128_s22 + $0xc8] sm:$0xff]  ;;  %v1270_v20 = vld [vmem:[%s2128_s22 + $0xd0] sm:$0xff] }
  0x11   : > { %1516 = vmatpush3.msra.mxu0 %v2008_v3  ;;  %1623 = vmatpush3.msra.mxu1 %v2008_v3  ;;  %v187_v17 = vld [vmem:[%s2128_s22] sm:$0xff]  ;;  %v188_v19 = vld [vmem:[%s2128_s22 + $0x8] sm:$0xff]  ;;  %v189_v21 = vld [vmem:[%s2128_s22 + $0x10] sm:$0xff] }
  0x12   : > { %1517 = vmatprep.subr.mxu0 %v1959_v1  ;;  %1624 = vmatprep.subr.mxu1 %v1959_v1  ;;  %v1271_v22 = vld [vmem:[%s2128_s22 + $0xd8] sm:$0xff]  ;;  %v1272_v24 = vld [vmem:[%s2128_s22 + $0xe0] sm:$0xff]  ;;  %v1273_v26 = vld [vmem:[%s2128_s22 + $0xe8] sm:$0xff] }
  0x13   : > { %1518 = vmatpush3.msra.mxu0 %v2017_v4  ;;  %1625 = vmatpush3.msra.mxu1 %v2017_v4  ;;  %v190_v23 = vld [vmem:[%s2128_s22 + $0x18] sm:$0xff]  ;;  %v191_v25 = vld [vmem:[%s2128_s22 + $0x20] sm:$0xff]  ;;  %v192_v27 = vld [vmem:[%s2128_s22 + $0x28] sm:$0xff] }
  0x14   : > { %1519 = vmatprep.subr.mxu0 %v1959_v1  ;;  %1626 = vmatprep.subr.mxu1 %v1959_v1  ;;  %v1274_v28 = vld [vmem:[%s2128_s22 + $0xf0] sm:$0xff]  ;;  %v1275_v30 = vld [vmem:[%s2128_s22 + $0xf8] sm:$0xff]  ;;  %v1276_v32 = vld [vmem:[%s2128_s22 + $0x100] sm:$0xff] }
  0x15   : > { %1520 = vmatpush3.msra.mxu0 %v2026_v5  ;;  %1627 = vmatpush3.msra.mxu1 %v2026_v5  ;;  %v193_v29 = vld [vmem:[%s2128_s22 + $0x30] sm:$0xff]  ;;  %v194_v31 = vld [vmem:[%s2128_s22 + $0x38] sm:$0xff]  ;;  %v195_v33 = vld [vmem:[%s2128_s22 + $0x40] sm:$0xff] }
  0x16   : > { %1521 = vmatprep.subr.mxu0 %v1959_v1  ;;  %1628 = vmatprep.subr.mxu1 %v1959_v1  ;;  %v1277_v34 = vld [vmem:[%s2128_s22 + $0x108] sm:$0xff]  ;;  %v1278_v36 = vld [vmem:[%s2128_s22 + $0x110] sm:$0xff]  ;;  %v1279_v38 = vld [vmem:[%s2128_s22 + $0x118] sm:$0xff] }
  0x17   : > { %1522 = vmatpush3.msra.mxu0 %v2035_v6  ;;  %1629 = vmatpush3.msra.mxu1 %v2035_v6  ;;  %v196_v35 = vld [vmem:[%s2128_s22 + $0x48] sm:$0xff]  ;;  %v197_v37 = vld [vmem:[%s2128_s22 + $0x50] sm:$0xff]  ;;  %v198_v39 = vld [vmem:[%s2128_s22 + $0x58] sm:$0xff] }
  0x18   : > { %1523 = vmatprep.subr.mxu0 %v1959_v1  ;;  %1630 = vmatprep.subr.mxu1 %v1959_v1  ;;  %v1280_v40 = vld [vmem:[%s2128_s22 + $0x120] sm:$0xff]  ;;  %v1281_v42 = vld [vmem:[%s2128_s22 + $0x128] sm:$0xff]  ;;  %v1282_v44 = vld [vmem:[%s2128_s22 + $0x130] sm:$0xff] }
  0x19   : > { %1524 = vmatpush3.msra.mxu0 %v2044_v7  ;;  %1631 = vmatpush3.msra.mxu1 %v2044_v7  ;;  %v199_v41 = vld [vmem:[%s2128_s22 + $0x60] sm:$0xff]  ;;  %v200_v43 = vld [vmem:[%s2128_s22 + $0x68] sm:$0xff]  ;;  %v201_v45 = vld [vmem:[%s2128_s22 + $0x70] sm:$0xff] }
  0x1a   : > { %1525 = vmatprep.subr.mxu0 %v1959_v1  ;;  %1632 = vmatprep.subr.mxu1 %v1959_v1  ;;  %v1283_v46 = vld [vmem:[%s2128_s22 + $0x138] sm:$0xff]  ;;  %v1284_v48 = vld [vmem:[%s2128_s22 + $0x140] sm:$0xff]  ;;  %v1285_v50 = vld [vmem:[%s2128_s22 + $0x148] sm:$0xff] }
  0x1b   : > { %1526 = vmatpush3.msra.mxu0 %v2053_v8  ;;  %1633 = vmatpush3.msra.mxu1 %v2053_v8  ;;  %v202_v47 = vld [vmem:[%s2128_s22 + $0x78] sm:$0xff]  ;;  %v203_v49 = vld [vmem:[%s2128_s22 + $0x80] sm:$0xff]  ;;  %v204_v51 = vld [vmem:[%s2128_s22 + $0x88] sm:$0xff] }
  0x1c   : > { %1527 = vmatprep.subr.mxu0 %v1959_v1  ;;  %1634 = vmatprep.subr.mxu1 %v1959_v1  ;;  %v1286_v52 = vld [vmem:[%s2128_s22 + $0x150] sm:$0xff]  ;;  %v1287_v54 = vld [vmem:[%s2128_s22 + $0x158] sm:$0xff]  ;;  %v1288_v56 = vld [vmem:[%s2128_s22 + $0x160] sm:$0xff] }
  0x1d   : > { %1528 = vmatpush3.msra.mxu0 %v2062_v9  ;;  %1635 = vmatpush3.msra.mxu1 %v2062_v9  ;;  %v205_v53 = vld [vmem:[%s2128_s22 + $0x90] sm:$0xff]  ;;  %v206_v55 = vld [vmem:[%s2128_s22 + $0x98] sm:$0xff]  ;;  %v207_v57 = vld [vmem:[%s2128_s22 + $0xa0] sm:$0xff] }
  0x1e   : > { %1529 = vmatprep.subr.mxu0 %v1959_v1  ;;  %1636 = vmatprep.subr.mxu1 %v1959_v1  ;;  %v1289_v58 = vld [vmem:[%s2128_s22 + $0x168] sm:$0xff]  ;;  %v1290_v60 = vld [vmem:[%s2128_s22 + $0x170] sm:$0xff]  ;;  %v1291_v62 = vld [vmem:[%s2128_s22 + $0x178] sm:$0xff] }
  0x1f   : > { %1530 = vmatpush3.msra.mxu0 %v2073_v10  ;;  %1637 = vmatpush3.msra.mxu1 %v2073_v10  ;;  %v208_v59 = vld [vmem:[%s2128_s22 + $0xa8] sm:$0xff]  ;;  %v209_v61 = vld [vmem:[%s2128_s22 + $0xb0] sm:$0xff]  ;;  %v210_v63 = vld [vmem:[%s2128_s22 + $0xb8] sm:$0xff] }
  0x20   : > { %1531 = vmatprep.subr.mxu0 %v1959_v1  ;;  %1638 = vmatprep.subr.mxu1 %v1959_v1 }
  0x21   : > { %1532 = vmatpush3.msra.mxu0 %v2082_v11  ;;  %1639 = vmatpush3.msra.mxu1 %v2082_v11 }
  0x22   : > { %1533 = vmatprep.subr.mxu0 %v1959_v1  ;;  %1640 = vmatprep.subr.mxu1 %v1959_v1 }
  0x23   : > { %1534 = vmatpush3.msra.mxu0 %v2095_v12  ;;  %1641 = vmatpush3.msra.mxu1 %v2095_v12 }
  0x24   : > { %1535 = vmatprep.subr.mxu0 %v1959_v1  ;;  %1642 = vmatprep.subr.mxu1 %v1959_v1 }
  0x25   : > { %1536 = vmatpush3.msra.mxu0 %v2104_v13  ;;  %1643 = vmatpush3.msra.mxu1 %v2104_v13 }
  0x26   : > { %1537 = vmatprep.subr.mxu0 %v1959_v1  ;;  %1644 = vmatprep.subr.mxu1 %v1959_v1 }
  0x27   : > { %1538 = vmatpush3.msra.mxu0 %v2114_v14  ;;  %1645 = vmatpush3.msra.mxu1 %v2114_v14 }
  0x28   : > { %1539 = vmatprep.subr.mxu0 %v1959_v1  ;;  %1646 = vmatprep.subr.mxu1 %v1959_v1 }
  0x29   : > { %1540 = vmatpush3.msra.mxu0 %v2123_v15  ;;  %1647 = vmatpush3.msra.mxu1 %v2123_v15 }
  0x2a   : > { %1541 = vmatprep.subr.mxu0 %v1959_v1  ;;  %1543 = vmatprep.mubr.msk.f32.mxu0 %vm1960_vm0, %v1959_v1 }
  0x2b   : > { %1542 = vmatpush3.msra.mxu0 %v2137_v16  ;;  %1648 = vmatprep.subr.mxu1 %v1959_v1 }
  0x2c   : > { %1544 = vmatmul.mubr.f32.vlgmr.msra.gmra.mxu0 %v187_v17  ;;  %1649 = vmatpush3.msra.mxu1 %v2137_v16  ;;  %v1325_v17 = vld [vmem:[%s2128_s22 + $0x288] sm:$0xff] }
  0x2d   : > { %1650 = vmatprep.mubr.msk.f32.mxu1 %vm1960_vm0, %v1959_v1  ;;  %1725 = vmatprep.subr.mxu0 %v1959_v1 }
  0x2e   : > { %1651 = vmatmul.mubr.f32.vlgmr.msra.gmra.mxu1 %v1269_v18  ;;  %1726 = vmatpush3.msra.mxu0 %v1992_v0  ;;  %v1301_v18 = vld [vmem:[%s2128_s22 + $0x1c8] sm:$0xff] }
  0x2f   : > { %1832 = vmatprep.subr.mxu1 %v1959_v1  ;;  %1546 = vmatprep.mubr.msk.f32.mxu0 %vm1960_vm0, %v1959_v1 }
  0x30   : > { %1833 = vmatpush3.msra.mxu1 %v1992_v0  ;;  %1547 = vmatmul.mubr.f32.gmra.mxu0 %v188_v19  ;;  %v1292_v0 = vld [vmem:[%s2128_s22 + $0x180] sm:$0xff]  ;;  %v1326_v19 = vld [vmem:[%s2128_s22 + $0x290] sm:$0xff] }
  0x31   : > { %1653 = vmatprep.mubr.msk.f32.mxu1 %vm1960_vm0, %v1959_v1  ;;  %1549 = vmatprep.mubr.msk.f32.mxu0 %vm1960_vm0, %v1959_v1 }
  0x32   : > { %1654 = vmatmul.mubr.f32.gmra.mxu1 %v1270_v20  ;;  %1727 = vmatprep.subr.mxu0 %v1959_v1  ;;  %v1302_v20 = vld [vmem:[%s2128_s22 + $0x1d0] sm:$0xff] }
  0x33   : > { %1656 = vmatprep.mubr.msk.f32.mxu1 %vm1960_vm0, %v1959_v1  ;;  %1728 = vmatpush3.msra.mxu0 %v1999_v2 }
  0x34   : > { %1550 = vmatmul.mubr.f32.gmra.mxu0 %v189_v21  ;;  %1834 = vmatprep.subr.mxu1 %v1959_v1  ;;  %v1327_v21 = vld [vmem:[%s2128_s22 + $0x298] sm:$0xff] }
  0x35   : > { %1835 = vmatpush3.msra.mxu1 %v1999_v2  ;;  %1552 = vmatprep.mubr.msk.f32.mxu0 %vm1960_vm0, %v1959_v1  ;;  %v211_v2 = vld [vmem:[%s2128_s22 + $0xc0] sm:$0xf] }
  0x36   : > { %1657 = vmatmul.mubr.f32.gmra.mxu1 %v1271_v22  ;;  %1729 = vmatprep.subr.mxu0 %v1959_v1  ;;  %v1303_v22 = vld [vmem:[%s2128_s22 + $0x1d8] sm:$0xff] }
  0x37   : > { %1659 = vmatprep.mubr.msk.f32.mxu1 %vm1960_vm0, %v1959_v1  ;;  %1730 = vmatpush3.msra.mxu0 %v2008_v3 }
  0x38   : > { %1553 = vmatmul.mubr.f32.gmra.mxu0 %v190_v23  ;;  %1836 = vmatprep.subr.mxu1 %v1959_v1  ;;  %v1328_v23 = vld [vmem:[%s2128_s22 + $0x2a0] sm:$0xff] }
  0x39   : > { %1555 = vmatprep.mubr.msk.f32.mxu0 %vm1960_vm0, %v1959_v1  ;;  %1837 = vmatpush3.msra.mxu1 %v2008_v3  ;;  %v1293_v3 = vld [vmem:[%s2128_s22 + $0x188] sm:$0xf] }
  0x3a   : > { %1660 = vmatmul.mubr.f32.gmra.mxu1 %v1272_v24  ;;  %1731 = vmatprep.subr.mxu0 %v1959_v1  ;;  %v1304_v24 = vld [vmem:[%s2128_s22 + $0x1e0] sm:$0xff] }
  0x3b   : > { %1662 = vmatprep.mubr.msk.f32.mxu1 %vm1960_vm0, %v1959_v1  ;;  %1732 = vmatpush3.msra.mxu0 %v2017_v4 }
  0x3c   : > { %1556 = vmatmul.mubr.f32.gmra.mxu0 %v191_v25  ;;  %1838 = vmatprep.subr.mxu1 %v1959_v1  ;;  %v1329_v25 = vld [vmem:[%s2128_s22 + $0x2a8] sm:$0xff] }
  0x3d   : > { %1558 = vmatprep.mubr.msk.f32.mxu0 %vm1960_vm0, %v1959_v1  ;;  %1839 = vmatpush3.msra.mxu1 %v2017_v4  ;;  %v1294_v4 = vld [vmem:[%s2128_s22 + $0x190] sm:$0xff] }
  0x3e   : > { %1663 = vmatmul.mubr.f32.gmra.mxu1 %v1273_v26  ;;  %1733 = vmatprep.subr.mxu0 %v1959_v1  ;;  %v1305_v26 = vld [vmem:[%s2128_s22 + $0x1e8] sm:$0xff] }
  0x3f   : > { %1665 = vmatprep.mubr.msk.f32.mxu1 %vm1960_vm0, %v1959_v1  ;;  %1734 = vmatpush3.msra.mxu0 %v2026_v5 }
  0x40   : > { %1559 = vmatmul.mubr.f32.gmra.mxu0 %v192_v27  ;;  %1840 = vmatprep.subr.mxu1 %v1959_v1  ;;  %v1330_v27 = vld [vmem:[%s2128_s22 + $0x2b0] sm:$0xff] }
  0x41   : > { %1561 = vmatprep.mubr.msk.f32.mxu0 %vm1960_vm0, %v1959_v1  ;;  %1841 = vmatpush3.msra.mxu1 %v2026_v5  ;;  %v1319_v5 = vld [vmem:[%s2128_s22 + $0x258] sm:$0xff] }
  0x42   : > { %1666 = vmatmul.mubr.f32.gmra.mxu1 %v1274_v28  ;;  %1735 = vmatprep.subr.mxu0 %v1959_v1  ;;  %v1306_v28 = vld [vmem:[%s2128_s22 + $0x1f0] sm:$0xff] }
  0x43   : > { %1668 = vmatprep.mubr.msk.f32.mxu1 %vm1960_vm0, %v1959_v1  ;;  %1736 = vmatpush3.msra.mxu0 %v2035_v6 }
  0x44   : > { %1562 = vmatmul.mubr.f32.gmra.mxu0 %v193_v29  ;;  %1842 = vmatprep.subr.mxu1 %v1959_v1  ;;  %v1331_v29 = vld [vmem:[%s2128_s22 + $0x2b8] sm:$0xff] }
  0x45   : > { %1564 = vmatprep.mubr.msk.f32.mxu0 %vm1960_vm0, %v1959_v1  ;;  %1843 = vmatpush3.msra.mxu1 %v2035_v6  ;;  %v1295_v6 = vld [vmem:[%s2128_s22 + $0x198] sm:$0xff] }
  0x46   : > { %1669 = vmatmul.mubr.f32.gmra.mxu1 %v1275_v30  ;;  %1737 = vmatprep.subr.mxu0 %v1959_v1  ;;  %v1307_v30 = vld [vmem:[%s2128_s22 + $0x1f8] sm:$0xff] }
  0x47   : > { %1671 = vmatprep.mubr.msk.f32.mxu1 %vm1960_vm0, %v1959_v1  ;;  %1738 = vmatpush3.msra.mxu0 %v2044_v7 }
  0x48   : > { %1565 = vmatmul.mubr.f32.gmra.mxu0 %v194_v31  ;;  %1844 = vmatprep.subr.mxu1 %v1959_v1  ;;  %v1332_v31 = vld [vmem:[%s2128_s22 + $0x2c0] sm:$0xff] }
  0x49   : > { %1567 = vmatprep.mubr.msk.f32.mxu0 %vm1960_vm0, %v1959_v1  ;;  %1845 = vmatpush3.msra.mxu1 %v2044_v7  ;;  %v1320_v7 = vld [vmem:[%s2128_s22 + $0x260] sm:$0xff] }
  0x4a   : > { %1672 = vmatmul.mubr.f32.gmra.mxu1 %v1276_v32  ;;  %1739 = vmatprep.subr.mxu0 %v1959_v1  ;;  %v1308_v32 = vld [vmem:[%s2128_s22 + $0x200] sm:$0xff] }
  0x4b   : > { %1674 = vmatprep.mubr.msk.f32.mxu1 %vm1960_vm0, %v1959_v1  ;;  %1740 = vmatpush3.msra.mxu0 %v2053_v8 }
  0x4c   : > { %1568 = vmatmul.mubr.f32.gmra.mxu0 %v195_v33  ;;  %1846 = vmatprep.subr.mxu1 %v1959_v1  ;;  %v1333_v33 = vld [vmem:[%s2128_s22 + $0x2c8] sm:$0xff] }
  0x4d   : > { %1570 = vmatprep.mubr.msk.f32.mxu0 %vm1960_vm0, %v1959_v1  ;;  %1847 = vmatpush3.msra.mxu1 %v2053_v8  ;;  %v1296_v8 = vld [vmem:[%s2128_s22 + $0x1a0] sm:$0xff] }
  0x4e   : > { %1675 = vmatmul.mubr.f32.gmra.mxu1 %v1277_v34  ;;  %1741 = vmatprep.subr.mxu0 %v1959_v1  ;;  %v1309_v34 = vld [vmem:[%s2128_s22 + $0x208] sm:$0xff] }
  0x4f   : > { %1677 = vmatprep.mubr.msk.f32.mxu1 %vm1960_vm0, %v1959_v1  ;;  %1742 = vmatpush3.msra.mxu0 %v2062_v9 }
  0x50   : > { %1571 = vmatmul.mubr.f32.gmra.mxu0 %v196_v35  ;;  %1848 = vmatprep.subr.mxu1 %v1959_v1  ;;  %v1334_v35 = vld [vmem:[%s2128_s22 + $0x2d0] sm:$0xff] }
  0x51   : > { %1573 = vmatprep.mubr.msk.f32.mxu0 %vm1960_vm0, %v1959_v1  ;;  %1849 = vmatpush3.msra.mxu1 %v2062_v9  ;;  %v1321_v9 = vld [vmem:[%s2128_s22 + $0x268] sm:$0xff] }
  0x52   : > { %1678 = vmatmul.mubr.f32.gmra.mxu1 %v1278_v36  ;;  %1743 = vmatprep.subr.mxu0 %v1959_v1  ;;  %v1310_v36 = vld [vmem:[%s2128_s22 + $0x210] sm:$0xff] }
  0x53   : > { %1680 = vmatprep.mubr.msk.f32.mxu1 %vm1960_vm0, %v1959_v1  ;;  %1744 = vmatpush3.msra.mxu0 %v2073_v10 }
  0x54   : > { %1574 = vmatmul.mubr.f32.gmra.mxu0 %v197_v37  ;;  %1850 = vmatprep.subr.mxu1 %v1959_v1  ;;  %v1335_v37 = vld [vmem:[%s2128_s22 + $0x2d8] sm:$0xff] }
  0x55   : > { %1576 = vmatprep.mubr.msk.f32.mxu0 %vm1960_vm0, %v1959_v1  ;;  %1851 = vmatpush3.msra.mxu1 %v2073_v10  ;;  %v1297_v10 = vld [vmem:[%s2128_s22 + $0x1a8] sm:$0xff] }
  0x56   : > { %1681 = vmatmul.mubr.f32.gmra.mxu1 %v1279_v38  ;;  %1745 = vmatprep.subr.mxu0 %v1959_v1  ;;  %v1311_v38 = vld [vmem:[%s2128_s22 + $0x218] sm:$0xff] }
  0x57   : > { %1683 = vmatprep.mubr.msk.f32.mxu1 %vm1960_vm0, %v1959_v1  ;;  %1746 = vmatpush3.msra.mxu0 %v2082_v11 }
  0x58   : > { %1577 = vmatmul.mubr.f32.gmra.mxu0 %v198_v39  ;;  %1852 = vmatprep.subr.mxu1 %v1959_v1  ;;  %v1336_v39 = vld [vmem:[%s2128_s22 + $0x2e0] sm:$0xff] }
  0x59   : > { %1579 = vmatprep.mubr.msk.f32.mxu0 %vm1960_vm0, %v1959_v1  ;;  %1853 = vmatpush3.msra.mxu1 %v2082_v11  ;;  %v1322_v11 = vld [vmem:[%s2128_s22 + $0x270] sm:$0xff] }
  0x5a   : > { %1684 = vmatmul.mubr.f32.gmra.mxu1 %v1280_v40  ;;  %1747 = vmatprep.subr.mxu0 %v1959_v1  ;;  %v1312_v40 = vld [vmem:[%s2128_s22 + $0x220] sm:$0xff] }
  0x5b   : > { %1686 = vmatprep.mubr.msk.f32.mxu1 %vm1960_vm0, %v1959_v1  ;;  %1748 = vmatpush3.msra.mxu0 %v2095_v12 }
  0x5c   : > { %1580 = vmatmul.mubr.f32.gmra.mxu0 %v199_v41  ;;  %1854 = vmatprep.subr.mxu1 %v1959_v1  ;;  %v1337_v41 = vld [vmem:[%s2128_s22 + $0x2e8] sm:$0xff] }
  0x5d   : > { %1582 = vmatprep.mubr.msk.f32.mxu0 %vm1960_vm0, %v1959_v1  ;;  %1855 = vmatpush3.msra.mxu1 %v2095_v12  ;;  %v1298_v12 = vld [vmem:[%s2128_s22 + $0x1b0] sm:$0xff] }
  0x5e   : > { %1687 = vmatmul.mubr.f32.gmra.mxu1 %v1281_v42  ;;  %1749 = vmatprep.subr.mxu0 %v1959_v1  ;;  %v1313_v42 = vld [vmem:[%s2128_s22 + $0x228] sm:$0xff] }
  0x5f   : > { %1689 = vmatprep.mubr.msk.f32.mxu1 %vm1960_vm0, %v1959_v1  ;;  %1750 = vmatpush3.msra.mxu0 %v2104_v13 }
  0x60   : > { %1583 = vmatmul.mubr.f32.gmra.mxu0 %v200_v43  ;;  %1856 = vmatprep.subr.mxu1 %v1959_v1  ;;  %v1338_v43 = vld [vmem:[%s2128_s22 + $0x2f0] sm:$0xff] }
  0x61   : > { %1585 = vmatprep.mubr.msk.f32.mxu0 %vm1960_vm0, %v1959_v1  ;;  %1857 = vmatpush3.msra.mxu1 %v2104_v13  ;;  %v1323_v13 = vld [vmem:[%s2128_s22 + $0x278] sm:$0xff] }
  0x62   : > { %1690 = vmatmul.mubr.f32.gmra.mxu1 %v1282_v44  ;;  %1751 = vmatprep.subr.mxu0 %v1959_v1  ;;  %v1314_v44 = vld [vmem:[%s2128_s22 + $0x230] sm:$0xff] }
  0x63   : > { %1692 = vmatprep.mubr.msk.f32.mxu1 %vm1960_vm0, %v1959_v1  ;;  %1752 = vmatpush3.msra.mxu0 %v2114_v14 }
  0x64   : > { %1586 = vmatmul.mubr.f32.gmra.mxu0 %v201_v45  ;;  %1858 = vmatprep.subr.mxu1 %v1959_v1  ;;  %v1339_v45 = vld [vmem:[%s2128_s22 + $0x2f8] sm:$0xff] }
  0x65   : > { %1588 = vmatprep.mubr.msk.f32.mxu0 %vm1960_vm0, %v1959_v1  ;;  %1859 = vmatpush3.msra.mxu1 %v2114_v14  ;;  %v1299_v14 = vld [vmem:[%s2128_s22 + $0x1b8] sm:$0xff] }
  0x66   : > { %1693 = vmatmul.mubr.f32.gmra.mxu1 %v1283_v46  ;;  %1753 = vmatprep.subr.mxu0 %v1959_v1  ;;  %v1315_v46 = vld [vmem:[%s2128_s22 + $0x238] sm:$0xff] }
  0x67   : > { %1695 = vmatprep.mubr.msk.f32.mxu1 %vm1960_vm0, %v1959_v1  ;;  %1754 = vmatpush3.msra.mxu0 %v2123_v15 }
  0x68   : > { %1589 = vmatmul.mubr.f32.gmra.mxu0 %v202_v47  ;;  %1860 = vmatprep.subr.mxu1 %v1959_v1  ;;  %v1340_v47 = vld [vmem:[%s2128_s22 + $0x300] sm:$0xff] }
  0x69   : > { %1591 = vmatprep.mubr.msk.f32.mxu0 %vm1960_vm0, %v1959_v1  ;;  %1861 = vmatpush3.msra.mxu1 %v2123_v15  ;;  %v1324_v15 = vld [vmem:[%s2128_s22 + $0x280] sm:$0xff] }
  0x6a   : > { %1696 = vmatmul.mubr.f32.gmra.mxu1 %v1284_v48  ;;  %1755 = vmatprep.subr.mxu0 %v1959_v1  ;;  %v1316_v48 = vld [vmem:[%s2128_s22 + $0x240] sm:$0xff] }
  0x6b   : > { %1698 = vmatprep.mubr.msk.f32.mxu1 %vm1960_vm0, %v1959_v1  ;;  %1756 = vmatpush3.msra.mxu0 %v2137_v16 }
  0x6c   : > { %1592 = vmatmul.mubr.f32.gmra.mxu0 %v203_v49  ;;  %1862 = vmatprep.subr.mxu1 %v1959_v1  ;;  %v1341_v49 = vld [vmem:[%s2128_s22 + $0x308] sm:$0xff] }
  0x6d   : > { %1594 = vmatprep.mubr.msk.f32.mxu0 %vm1960_vm0, %v1959_v1  ;;  %1863 = vmatpush3.msra.mxu1 %v2137_v16  ;;  %v1300_v16 = vld [vmem:[%s2128_s22 + $0x1c0] sm:$0xff] }
  0x6e   : > { %1699 = vmatmul.mubr.f32.gmra.mxu1 %v1285_v50  ;;  %v1317_v50 = vld [vmem:[%s2128_s22 + $0x248] sm:$0xff] }
  0x6f   : > { %1701 = vmatprep.mubr.msk.f32.mxu1 %vm1960_vm0, %v1959_v1 }
  0x70   : > { %1595 = vmatmul.mubr.f32.gmra.mxu0 %v204_v51  ;;  %v1342_v51 = vld [vmem:[%s2128_s22 + $0x310] sm:$0xff] }
  0x71   : > { %1597 = vmatprep.mubr.msk.f32.mxu0 %vm1960_vm0, %v1959_v1 }
  0x72   : > { %1702 = vmatmul.mubr.f32.gmra.mxu1 %v1286_v52 }
  0x73   : > { %1704 = vmatprep.mubr.msk.f32.mxu1 %vm1960_vm0, %v1959_v1 }
  0x74   : > { %1598 = vmatmul.mubr.f32.gmra.mxu0 %v205_v53  ;;  %v1318_v53 = vld [vmem:[%s2128_s22 + $0x250] sm:$0xf] }
  0x75   : > { %1600 = vmatprep.mubr.msk.f32.mxu0 %vm1960_vm0, %v1959_v1 }
  0x76   : > { %1705 = vmatmul.mubr.f32.gmra.mxu1 %v1287_v54 }
  0x77   : > { %1707 = vmatprep.mubr.msk.f32.mxu1 %vm1960_vm0, %v1959_v1 }
  0x78   : > { %1601 = vmatmul.mubr.f32.gmra.mxu0 %v206_v55 }
  0x79   : > { %1603 = vmatprep.mubr.msk.f32.mxu0 %vm1960_vm0, %v1959_v1 }
  0x7a   : > { %1708 = vmatmul.mubr.f32.gmra.mxu1 %v1288_v56 }
  0x7b   : > { %1710 = vmatprep.mubr.msk.f32.mxu1 %vm1960_vm0, %v1959_v1 }
  0x7c   : > { %1604 = vmatmul.mubr.f32.gmra.mxu0 %v207_v57  ;;  %v1343_v57 = vld [vmem:[%s2128_s22 + $0x318] sm:$0xf] }
  0x7d   : > { %1606 = vmatprep.mubr.msk.f32.mxu0 %vm1960_vm0, %v1959_v1 }
  0x7e   : > { %1711 = vmatmul.mubr.f32.gmra.mxu1 %v1289_v58 }
  0x7f   : > { %1713 = vmatprep.mubr.msk.f32.mxu1 %vm1960_vm0, %v1959_v1 }
  0x80   : > { %1607 = vmatmul.mubr.f32.gmra.mxu0 %v208_v59 }
  0x81   : > { %1609 = vmatprep.mubr.msk.f32.mxu0 %vm1960_vm0, %v1959_v1 }
  0x82   : > { %1714 = vmatmul.mubr.f32.gmra.mxu1 %v1290_v60 }
  0x83   : > { %1716 = vmatprep.mubr.msk.f32.mxu1 %vm1960_vm0, %v1959_v1 }
  0x84   : > { %1610 = vmatmul.mubr.f32.gmra.mxu0 %v209_v61 }
  0x85   : > { %1612 = vmatprep.mubr.msk.f32.mxu0 %vm1960_vm0, %v1959_v1 }
  0x86   : > { %1717 = vmatmul.mubr.f32.gmra.mxu1 %v1291_v62 }
  0x87   : > { %1719 = vmatprep.mubr.msk.f32.mxu1 %vm1960_vm0, %v1959_v1 }
  0x88   : > { %1613 = vmatmul.mubr.f32.gmra.mxu0 %v210_v63 }
  0x89   : > { %1615 = vmatprep.mubr.msk.f32.mxu0 %vm1960_vm0, %v1959_v1 }
  0x8a   : > { %1720 = vmatmul.mubr.f32.gmra.mxu1 %v1292_v0 }
  0x8b   : > { %1722 = vmatprep.mubr.msk.f32.mxu1 %vm1960_vm0, %v1959_v1 }
  0x8c   : > { %1616 = vmatmul.mubr.f32.gmra.mxu0 %v211_v2 }
  0x8d   : > { %1757 = vmatprep.mubr.msk.f32.mxu0 %vm1960_vm0, %v1959_v1 }
  0x8e   : > { %1723 = vmatmul.mubr.f32.gmra.mxu1 %v1293_v3 }
  0x8f   : > { %1864 = vmatprep.mubr.msk.f32.mxu1 %vm1960_vm0, %v1959_v1 }
  0x90   : > { %1758 = vmatmul.mubr.f32.vlgmr.msra.gmra.mxu0 %v1294_v4 }
  0x91   : > { %1760 = vmatprep.mubr.msk.f32.mxu0 %vm1960_vm0, %v1959_v1 }
  0x92   : > { %1865 = vmatmul.mubr.f32.vlgmr.msra.gmra.mxu1 %v1319_v5 }
  0x93   : > { %1867 = vmatprep.mubr.msk.f32.mxu1 %vm1960_vm0, %v1959_v1 }
  0x94   : > { %1761 = vmatmul.mubr.f32.gmra.mxu0 %v1295_v6 }
  0x95   : > { %1763 = vmatprep.mubr.msk.f32.mxu0 %vm1960_vm0, %v1959_v1 }
  0x96   : > { %1868 = vmatmul.mubr.f32.gmra.mxu1 %v1320_v7 }
  0x97   : > { %1870 = vmatprep.mubr.msk.f32.mxu1 %vm1960_vm0, %v1959_v1 }
  0x98   : > { %1764 = vmatmul.mubr.f32.gmra.mxu0 %v1296_v8 }
  0x99   : > { %1766 = vmatprep.mubr.msk.f32.mxu0 %vm1960_vm0, %v1959_v1 }
  0x9a   : > { %1871 = vmatmul.mubr.f32.gmra.mxu1 %v1321_v9 }
  0x9b   : > { %1873 = vmatprep.mubr.msk.f32.mxu1 %vm1960_vm0, %v1959_v1 }
  0x9c   : > { %1767 = vmatmul.mubr.f32.gmra.mxu0 %v1297_v10 }
  0x9d   : > { %1769 = vmatprep.mubr.msk.f32.mxu0 %vm1960_vm0, %v1959_v1 }
  0x9e   : > { %1874 = vmatmul.mubr.f32.gmra.mxu1 %v1322_v11 }
  0x9f   : > { %1876 = vmatprep.mubr.msk.f32.mxu1 %vm1960_vm0, %v1959_v1 }
  0xa0   : > { %1770 = vmatmul.mubr.f32.gmra.mxu0 %v1298_v12 }
  0xa1   : > { %1772 = vmatprep.mubr.msk.f32.mxu0 %vm1960_vm0, %v1959_v1 }
  0xa2   : > { %1877 = vmatmul.mubr.f32.gmra.mxu1 %v1323_v13 }
  0xa3   : > { %1879 = vmatprep.mubr.msk.f32.mxu1 %vm1960_vm0, %v1959_v1 }
  0xa4   : > { %1773 = vmatmul.mubr.f32.gmra.mxu0 %v1299_v14 }
  0xa5   : > { %1775 = vmatprep.mubr.msk.f32.mxu0 %vm1960_vm0, %v1959_v1 }
  0xa6   : > { %1880 = vmatmul.mubr.f32.gmra.mxu1 %v1324_v15 }
  0xa7   : > { %1882 = vmatprep.mubr.msk.f32.mxu1 %vm1960_vm0, %v1959_v1 }
  0xa8   : > { %1776 = vmatmul.mubr.f32.gmra.mxu0 %v1300_v16 }
  0xa9   : > { %1778 = vmatprep.mubr.msk.f32.mxu0 %vm1960_vm0, %v1959_v1 }
  0xaa   : > { %1883 = vmatmul.mubr.f32.gmra.mxu1 %v1325_v17 }
  0xab   : > { %1885 = vmatprep.mubr.msk.f32.mxu1 %vm1960_vm0, %v1959_v1 }
  0xac   : > { %1779 = vmatmul.mubr.f32.gmra.mxu0 %v1301_v18 }
  0xad   : > { %1781 = vmatprep.mubr.msk.f32.mxu0 %vm1960_vm0, %v1959_v1 }
  0xae   : > { %1886 = vmatmul.mubr.f32.gmra.mxu1 %v1326_v19 }
  0xaf   : > { %1888 = vmatprep.mubr.msk.f32.mxu1 %vm1960_vm0, %v1959_v1 }
  0xb0   : > { %1782 = vmatmul.mubr.f32.gmra.mxu0 %v1302_v20 }
  0xb1   : > { %1784 = vmatprep.mubr.msk.f32.mxu0 %vm1960_vm0, %v1959_v1 }
  0xb2   : > { %1889 = vmatmul.mubr.f32.gmra.mxu1 %v1327_v21 }
  0xb3   : > { %1891 = vmatprep.mubr.msk.f32.mxu1 %vm1960_vm0, %v1959_v1 }
  0xb4   : > { %1785 = vmatmul.mubr.f32.gmra.mxu0 %v1303_v22 }
  0xb5   : > { %1787 = vmatprep.mubr.msk.f32.mxu0 %vm1960_vm0, %v1959_v1 }
  0xb6   : > { %1892 = vmatmul.mubr.f32.gmra.mxu1 %v1328_v23 }
  0xb7   : > { %1894 = vmatprep.mubr.msk.f32.mxu1 %vm1960_vm0, %v1959_v1 }
  0xb8   : > { %1788 = vmatmul.mubr.f32.gmra.mxu0 %v1304_v24 }
  0xb9   : > { %1790 = vmatprep.mubr.msk.f32.mxu0 %vm1960_vm0, %v1959_v1 }
  0xba   : > { %1895 = vmatmul.mubr.f32.gmra.mxu1 %v1329_v25 }
  0xbb   : > { %1897 = vmatprep.mubr.msk.f32.mxu1 %vm1960_vm0, %v1959_v1 }
  0xbc   : > { %1791 = vmatmul.mubr.f32.gmra.mxu0 %v1305_v26 }
  0xbd   : > { %1793 = vmatprep.mubr.msk.f32.mxu0 %vm1960_vm0, %v1959_v1 }
  0xbe   : > { %1898 = vmatmul.mubr.f32.gmra.mxu1 %v1330_v27 }
  0xbf   : > { %1900 = vmatprep.mubr.msk.f32.mxu1 %vm1960_vm0, %v1959_v1 }
  0xc0   : > { %1794 = vmatmul.mubr.f32.gmra.mxu0 %v1306_v28 }
  0xc1   : > { %1796 = vmatprep.mubr.msk.f32.mxu0 %vm1960_vm0, %v1959_v1 }
  0xc2   : > { %1901 = vmatmul.mubr.f32.gmra.mxu1 %v1331_v29 }
  0xc3   : > { %1903 = vmatprep.mubr.msk.f32.mxu1 %vm1960_vm0, %v1959_v1 }
  0xc4   : > { %1797 = vmatmul.mubr.f32.gmra.mxu0 %v1307_v30 }
  0xc5   : > { %1799 = vmatprep.mubr.msk.f32.mxu0 %vm1960_vm0, %v1959_v1 }
  0xc6   : > { %1904 = vmatmul.mubr.f32.gmra.mxu1 %v1332_v31 }
  0xc7   : > { %1906 = vmatprep.mubr.msk.f32.mxu1 %vm1960_vm0, %v1959_v1 }
  0xc8   : > { %1800 = vmatmul.mubr.f32.gmra.mxu0 %v1308_v32 }
  0xc9   : > { %1802 = vmatprep.mubr.msk.f32.mxu0 %vm1960_vm0, %v1959_v1 }
  0xca   : > { %1907 = vmatmul.mubr.f32.gmra.mxu1 %v1333_v33 }
  0xcb   : > { %1909 = vmatprep.mubr.msk.f32.mxu1 %vm1960_vm0, %v1959_v1 }
  0xcc   : > { %1803 = vmatmul.mubr.f32.gmra.mxu0 %v1309_v34 }
  0xcd   : > { %1805 = vmatprep.mubr.msk.f32.mxu0 %vm1960_vm0, %v1959_v1 }
  0xce   : > { %1910 = vmatmul.mubr.f32.gmra.mxu1 %v1334_v35 }
  0xcf   : > { %1912 = vmatprep.mubr.msk.f32.mxu1 %vm1960_vm0, %v1959_v1 }
  0xd0   : > { %1806 = vmatmul.mubr.f32.gmra.mxu0 %v1310_v36 }
  0xd1   : > { %1808 = vmatprep.mubr.msk.f32.mxu0 %vm1960_vm0, %v1959_v1 }
  0xd2   : > { %1913 = vmatmul.mubr.f32.gmra.mxu1 %v1335_v37 }
  0xd3   : > { %1915 = vmatprep.mubr.msk.f32.mxu1 %vm1960_vm0, %v1959_v1 }
  0xd4   : > { %1809 = vmatmul.mubr.f32.gmra.mxu0 %v1311_v38 }
  0xd5   : > { %1811 = vmatprep.mubr.msk.f32.mxu0 %vm1960_vm0, %v1959_v1 }
  0xd6   : > { %1916 = vmatmul.mubr.f32.gmra.mxu1 %v1336_v39 }
  0xd7   : > { %1918 = vmatprep.mubr.msk.f32.mxu1 %vm1960_vm0, %v1959_v1 }
  0xd8   : > { %1812 = vmatmul.mubr.f32.gmra.mxu0 %v1312_v40 }
  0xd9   : > { %1814 = vmatprep.mubr.msk.f32.mxu0 %vm1960_vm0, %v1959_v1 }
  0xda   : > { %1919 = vmatmul.mubr.f32.gmra.mxu1 %v1337_v41 }
  0xdb   : > { %1921 = vmatprep.mubr.msk.f32.mxu1 %vm1960_vm0, %v1959_v1 }
  0xdc   : > { %1815 = vmatmul.mubr.f32.gmra.mxu0 %v1313_v42 }
  0xdd   : > { %1817 = vmatprep.mubr.msk.f32.mxu0 %vm1960_vm0, %v1959_v1 }
  0xde   : > { %1922 = vmatmul.mubr.f32.gmra.mxu1 %v1338_v43 }
  0xdf   : > { %1924 = vmatprep.mubr.msk.f32.mxu1 %vm1960_vm0, %v1959_v1 }
  0xe0   : > { %1818 = vmatmul.mubr.f32.gmra.mxu0 %v1314_v44 }
  0xe1   : > { %1820 = vmatprep.mubr.msk.f32.mxu0 %vm1960_vm0, %v1959_v1 }
  0xe2   : > { %1925 = vmatmul.mubr.f32.gmra.mxu1 %v1339_v45 }
  0xe3   : > { %1927 = vmatprep.mubr.msk.f32.mxu1 %vm1960_vm0, %v1959_v1 }
  0xe4   : > { %1821 = vmatmul.mubr.f32.gmra.mxu0 %v1315_v46 }
  0xe5   : > { %1823 = vmatprep.mubr.msk.f32.mxu0 %vm1960_vm0, %v1959_v1 }
  0xe6   : > { %1928 = vmatmul.mubr.f32.gmra.mxu1 %v1340_v47 }
  0xe7   : > { %1930 = vmatprep.mubr.msk.f32.mxu1 %vm1960_vm0, %v1959_v1 }
  0xe8   : > { %1824 = vmatmul.mubr.f32.gmra.mxu0 %v1316_v48 }
  0xe9   : > { %1826 = vmatprep.mubr.msk.f32.mxu0 %vm1960_vm0, %v1959_v1 }
  0xea   : > { %1931 = vmatmul.mubr.f32.gmra.mxu1 %v1341_v49 }
  0xeb   : > { %1933 = vmatprep.mubr.msk.f32.mxu1 %vm1960_vm0, %v1959_v1 }
  0xec   : > { %v2503_v52 = vpop.f32.mrf.mxu0  ;;  %1827 = vmatmul.mubr.f32.gmra.mxu0 %v1317_v50 }
  0xed   : > { %1829 = vmatprep.mubr.msk.f32.mxu0 %vm1960_vm0, %v1959_v1 }
  0xee   : > { %v2508_v54 = vpop.f32.mrf.mxu1  ;;  %1934 = vmatmul.mubr.f32.gmra.mxu1 %v1342_v51  ;;  %v1545_v55 = vpop.f32.mrf.mxu0 }
  0xef   : > { %v618_v56 = vmax.f32 %v2503_v52, %v2508_v54  ;;  %1936 = vmatprep.mubr.msk.f32.mxu1 %vm1960_vm0, %v1959_v1 }
  0xf0   : > { %v1652_v58 = vpop.f32.mrf.mxu1  ;;  %v2515_v59 = vpop.f32.mrf.mxu0  ;;  %1830 = vmatmul.mubr.f32.gmra.mxu0 %v1318_v53 }
  0xf2   : > { %v2517_v60 = vpop.f32.mrf.mxu1  ;;  %1937 = vmatmul.mubr.f32.gmra.mxu1 %v1343_v57  ;;  %v1548_v61 = vpop.f32.mrf.mxu0 }
  0xf3   : > { %v619_v62 = vmax.f32 %v2515_v59, %v2517_v60 }
  0xf4   : > { %v1655_v63 = vpop.f32.mrf.mxu1  ;;  %v2521_v0 = vpop.f32.mrf.mxu0 }
  0xf6   : > { %v2523_v2 = vpop.f32.mrf.mxu1  ;;  %v1551_v3 = vpop.f32.mrf.mxu0 }
  0xf7   : > { %v620_v1 = vmax.f32 %v2521_v0, %v2523_v2 }
  0xf8   : > { %v1658_v4 = vpop.f32.mrf.mxu1  ;;  %v2527_v5 = vpop.f32.mrf.mxu0 }
  0xfa   : > { %v2529_v6 = vpop.f32.mrf.mxu1  ;;  %v1554_v7 = vpop.f32.mrf.mxu0 }
  0xfc   : > { %v1661_v9 = vpop.f32.mrf.mxu1  ;;  %v2533_v10 = vpop.f32.mrf.mxu0 }
  0xfe   : > { %v2535_v11 = vpop.f32.mrf.mxu1  ;;  %v1557_v12 = vpop.f32.mrf.mxu0 }
 0x100   : > { %v1664_v14 = vpop.f32.mrf.mxu1  ;;  %v2539_v15 = vpop.f32.mrf.mxu0 }
 0x102   : > { %v2541_v16 = vpop.f32.mrf.mxu1  ;;  %v1560_v17 = vpop.f32.mrf.mxu0 }
 0x104   : > { %v1667_v19 = vpop.f32.mrf.mxu1  ;;  %v2545_v20 = vpop.f32.mrf.mxu0 }
 0x106   : > { %v2547_v21 = vpop.f32.mrf.mxu1  ;;  %v1563_v22 = vpop.f32.mrf.mxu0 }
 0x108   : > { %v1670_v24 = vpop.f32.mrf.mxu1  ;;  %v2551_v25 = vpop.f32.mrf.mxu0 }
 0x10a   : > { %v2553_v26 = vpop.f32.mrf.mxu1  ;;  %v1566_v27 = vpop.f32.mrf.mxu0 }
 0x10c   : > { %v1673_v29 = vpop.f32.mrf.mxu1  ;;  %v2557_v30 = vpop.f32.mrf.mxu0 }
 0x10e   : > { %v2559_v31 = vpop.f32.mrf.mxu1  ;;  %v1569_v32 = vpop.f32.mrf.mxu0 }
 0x110   : > { %v1676_v34 = vpop.f32.mrf.mxu1  ;;  %v2563_v35 = vpop.f32.mrf.mxu0 }
 0x112   : > { %v2565_v36 = vpop.f32.mrf.mxu1  ;;  %v1572_v37 = vpop.f32.mrf.mxu0 }
 0x114   : > { %v1679_v39 = vpop.f32.mrf.mxu1  ;;  %v2569_v40 = vpop.f32.mrf.mxu0 }
 0x116   : > { %v2571_v41 = vpop.f32.mrf.mxu1  ;;  %v1575_v42 = vpop.f32.mrf.mxu0 }
 0x118   : > { %v1682_v44 = vpop.f32.mrf.mxu1  ;;  %v2575_v45 = vpop.f32.mrf.mxu0 }
 0x11a   : > { %v2577_v46 = vpop.f32.mrf.mxu1  ;;  %v1578_v47 = vpop.f32.mrf.mxu0 }
 0x11c   : > { %v1685_v49 = vpop.f32.mrf.mxu1  ;;  %v2581_v50 = vpop.f32.mrf.mxu0 }
 0x11e   : > { %v2583_v51 = vpop.f32.mrf.mxu1  ;;  %v1581_v53 = vpop.f32.mrf.mxu0 }
 0x120   : > { %v1688_v57 = vpop.f32.mrf.mxu1  ;;  %v2587_v58 = vpop.f32.mrf.mxu0 }
 0x122   : > { %v2589_v61 = vpop.f32.mrf.mxu1  ;;  %v1584_v63 = vpop.f32.mrf.mxu0 }
 0x124   : > { %v1691_v4 = vpop.f32.mrf.mxu1  ;;  %v2593_v7 = vpop.f32.mrf.mxu0 }
 0x126   : > { %v2595_v9 = vpop.f32.mrf.mxu1  ;;  %v1587_v12 = vpop.f32.mrf.mxu0 }
 0x128   : > { %v1694_v17 = vpop.f32.mrf.mxu1  ;;  %v2599_v19 = vpop.f32.mrf.mxu0 }
 0x12a   : > { %v2601_v22 = vpop.f32.mrf.mxu1  ;;  %v1590_v24 = vpop.f32.mrf.mxu0 }
 0x12c   : > { %v1697_v29 = vpop.f32.mrf.mxu1  ;;  %v2605_v32 = vpop.f32.mrf.mxu0 }
 0x12e   : > { %v2607_v34 = vpop.f32.mrf.mxu1  ;;  %v1593_v37 = vpop.f32.mrf.mxu0 }
 0x130   : > { %v1700_v42 = vpop.f32.mrf.mxu1  ;;  %v2611_v44 = vpop.f32.mrf.mxu0 }
 0x132   : > { %v2613_v47 = vpop.f32.mrf.mxu1  ;;  %v1596_v49 = vpop.f32.mrf.mxu0 }
 0x134   : > { %v1703_v57 = vpop.f32.mrf.mxu1  ;;  %v2617_v63 = vpop.f32.mrf.mxu0 }
 0x136   : > { %v2619_v4 = vpop.f32.mrf.mxu1  ;;  %v1599_v12 = vpop.f32.mrf.mxu0 }
 0x138   : > { %v1706_v24 = vpop.f32.mrf.mxu1  ;;  %v2623_v29 = vpop.f32.mrf.mxu0 }
 0x13a   : > { %v2625_v37 = vpop.f32.mrf.mxu1  ;;  %v1602_v42 = vpop.f32.mrf.mxu0 }
 0x13c   : > { %v1709_v39 = vpop.f32.mrf.mxu1  ;;  %v2629_v53 = vpop.f32.mrf.mxu0 }
 0x13e   : > { %v2631_v57 = vpop.f32.mrf.mxu1  ;;  %v1605_v27 = vpop.f32.mrf.mxu0 }
 0x140   : > { %v1712_v14 = vpop.f32.mrf.mxu1  ;;  %v2635_v17 = vpop.f32.mrf.mxu0 }
 0x142   : > { %v2637_v24 = vpop.f32.mrf.mxu1  ;;  %v1608_v3 = vpop.f32.mrf.mxu0 }
 0x144   : > { %v1715_v55 = vpop.f32.mrf.mxu1  ;;  %v2641_v49 = vpop.f32.mrf.mxu0 }
 0x146   : > { %v2643_v39 = vpop.f32.mrf.mxu1  ;;  %v1611_v48 = vpop.f32.mrf.mxu0 }
 0x148   : > { %v1718_v12 = vpop.f32.mrf.mxu1  ;;  %v2647_v14 = vpop.f32.mrf.mxu0 }
 0x14a   : > { %v2649_v43 = vpop.f32.mrf.mxu1  ;;  %v1614_v38 = vpop.f32.mrf.mxu0 }
 0x14c   : > { %v1721_v42 = vpop.f32.mrf.mxu1  ;;  %v2653_v55 = vpop.f32.mrf.mxu0 }
 0x14d   : > { %v2666_v42 = vld [vmem:[%s2800_s2] ss:$0 sm:$0xff] }
 0x14e   : > { %v2655_v33 = vpop.f32.mrf.mxu1  ;;  %v1617_v28 = vpop.f32.mrf.mxu0 }
 0x150   : > { %v1724_v23 = vpop.f32.mrf.mxu1  ;;  %v735_v27 = vpop.f32.mrf.mxu0 }
 0x151   : > { %v859_v12 = vmax.f32 %v618_v56, %v735_v27 }
 0x152   : > { %v976_v38 = vpop.f32.mrf.mxu1  ;;  %v1759_v3 = vpop.f32.mrf.mxu0 }
 0x153   : > { %v1100_v18 = vmax.f32 %v859_v12, %v976_v38 }
 0x154   : > { %v1866_v13 = vpop.f32.mrf.mxu1  ;;  %v740_v28 = vpop.f32.mrf.mxu0 }
 0x155   : > { %v1132_v8 = vadd.f32 %v2666_v42, %v1100_v18  ;;  %v860_v23 = vmax.f32 %v619_v62, %v740_v28 }
 0x156   : > { %v981_v52 = vpop.f32.mrf.mxu1  ;;  %v1762_v54 = vpop.f32.mrf.mxu0 }
 0x157   : > { %v1157_v56 = vmax.f32 %v1132_v8, 0.0  ;;  %v1101_v27 = vmax.f32 %v860_v23, %v981_v52  ;;  %v2802_v23 = vmax.f32 %v2527_v5, %v2529_v6 }
 0x158   : > { %v1869_v3 = vpop.f32.mrf.mxu1  ;;  %v745_v13 = vpop.f32.mrf.mxu0 }
 0x159   : > { %1182 = vst [vmem:[%s2675_s13] sm:$0xff] %v1157_v56  ;;  %v1133_v18 = vadd.f32 %v2666_v42, %v1101_v27  ;;  %v861_v59 = vmax.f32 %v620_v1, %v745_v13  ;;  %v2803_v13 = vmax.f32 %v2533_v10, %v2535_v11 }
 0x15a   : > { %v986_v60 = vpop.f32.mrf.mxu1  ;;  %v1765_v62 = vpop.f32.mrf.mxu0 }
 0x15b   : > { %v1158_v12 = vmax.f32 %v1133_v18, 0.0  ;;  %v1102_v38 = vmax.f32 %v861_v59, %v986_v60 }
 0x15c   : > { %v1872_v28 = vpop.f32.mrf.mxu1  ;;  %v750_v48 = vpop.f32.mrf.mxu0 }
 0x15d   : > { %1183 = vst [vmem:[%s2675_s13 + $0x8] sm:$0xff] %v1158_v12  ;;  %v1134_v8 = vadd.f32 %v2666_v42, %v1102_v38  ;;  %v862_v52 = vmax.f32 %v2802_v23, %v750_v48  ;;  %v2804_v38 = vmax.f32 %v2539_v15, %v2541_v16 }
 0x15e   : > { %v991_v54 = vpop.f32.mrf.mxu1  ;;  %v1768_v56 = vpop.f32.mrf.mxu0 }
 0x15f   : > { %v1159_v27 = vmax.f32 %v1134_v8, 0.0  ;;  %v1103_v0 = vmax.f32 %v862_v52, %v991_v54 }
 0x160   : > { %v1875_v2 = vpop.f32.mrf.mxu1  ;;  %v755_v1 = vpop.f32.mrf.mxu0 }
 0x161   : > { %1184 = vst [vmem:[%s2675_s13 + $0x10] sm:$0xff] %v1159_v27  ;;  %v1135_v3 = vadd.f32 %v2666_v42, %v1103_v0  ;;  %v863_v18 = vmax.f32 %v2803_v13, %v755_v1  ;;  %v2805_v27 = vmax.f32 %v2545_v20, %v2547_v21 }
 0x162   : > { %v996_v59 = vpop.f32.mrf.mxu1  ;;  %v1771_v60 = vpop.f32.mrf.mxu0 }
 0x163   : > { %v1160_v62 = vmax.f32 %v1135_v3, 0.0  ;;  %v1104_v5 = vmax.f32 %v863_v18, %v996_v59  ;;  %v2806_v59 = vmax.f32 %v2551_v25, %v2553_v26 }
 0x164   : > { %v1878_v6 = vpop.f32.mrf.mxu1  ;;  %v760_v48 = vpop.f32.mrf.mxu0 }
 0x165   : > { %1185 = vst [vmem:[%s2675_s13 + $0x18] sm:$0xff] %v1160_v62  ;;  %v1136_v12 = vadd.f32 %v2666_v42, %v1104_v5  ;;  %v864_v28 = vmax.f32 %v2804_v38, %v760_v48  ;;  %v2807_v38 = vmax.f32 %v2557_v30, %v2559_v31 }
 0x166   : > { %v1001_v8 = vpop.f32.mrf.mxu1  ;;  %v1774_v23 = vpop.f32.mrf.mxu0 }
 0x167   : > { %v1161_v52 = vmax.f32 %v1136_v12, 0.0  ;;  %v1105_v10 = vmax.f32 %v864_v28, %v1001_v8 }
 0x168   : > { %v1881_v11 = vpop.f32.mrf.mxu1  ;;  %v765_v54 = vpop.f32.mrf.mxu0 }
 0x169   : > { %1186 = vst [vmem:[%s2675_s13 + $0x20] sm:$0xff] %v1161_v52  ;;  %v1137_v56 = vadd.f32 %v2666_v42, %v1105_v10  ;;  %v865_v0 = vmax.f32 %v2805_v27, %v765_v54  ;;  %v2808_v54 = vmax.f32 %v2563_v35, %v2565_v36 }
 0x16a   : > { %v1006_v2 = vpop.f32.mrf.mxu1  ;;  %v1777_v1 = vpop.f32.mrf.mxu0 }
 0x16b   : > { %v1162_v3 = vmax.f32 %v1137_v56, 0.0  ;;  %v1106_v15 = vmax.f32 %v865_v0, %v1006_v2 }
 0x16c   : > { %v1884_v16 = vpop.f32.mrf.mxu1  ;;  %v770_v13 = vpop.f32.mrf.mxu0 }
 0x16d   : > { %1187 = vst [vmem:[%s2675_s13 + $0x28] sm:$0xff] %v1162_v3  ;;  %v1138_v18 = vadd.f32 %v2666_v42, %v1106_v15  ;;  %v866_v60 = vmax.f32 %v2806_v59, %v770_v13  ;;  %v2809_v15 = vmax.f32 %v2569_v40, %v2571_v41 }
 0x16e   : > { %v1011_v62 = vpop.f32.mrf.mxu1  ;;  %v1780_v5 = vpop.f32.mrf.mxu0 }
 0x16f   : > { %v1163_v6 = vmax.f32 %v1138_v18, 0.0  ;;  %v1107_v20 = vmax.f32 %v866_v60, %v1011_v62  ;;  %v2810_v5 = vmax.f32 %v2575_v45, %v2577_v46 }
 0x170   : > { %v1887_v21 = vpop.f32.mrf.mxu1  ;;  %v775_v48 = vpop.f32.mrf.mxu0 }
 0x171   : > { %1188 = vst [vmem:[%s2675_s13 + $0x30] sm:$0xff] %v1163_v6  ;;  %v1139_v12 = vadd.f32 %v2666_v42, %v1107_v20  ;;  %v867_v28 = vmax.f32 %v2807_v38, %v775_v48 }
 0x172   : > { %v1016_v8 = vpop.f32.mrf.mxu1  ;;  %v1783_v23 = vpop.f32.mrf.mxu0 }
 0x173   : > { %v1164_v52 = vmax.f32 %v1139_v12, 0.0  ;;  %v1108_v25 = vmax.f32 %v867_v28, %v1016_v8  ;;  %v2811_v28 = vmax.f32 %v2581_v50, %v2583_v51 }
 0x174   : > { %v1890_v26 = vpop.f32.mrf.mxu1  ;;  %v780_v10 = vpop.f32.mrf.mxu0 }
 0x175   : > { %1189 = vst [vmem:[%s2675_s13 + $0x38] sm:$0xff] %v1164_v52  ;;  %v1140_v11 = vadd.f32 %v2666_v42, %v1108_v25  ;;  %v868_v56 = vmax.f32 %v2808_v54, %v780_v10 }
 0x176   : > { %v1021_v27 = vpop.f32.mrf.mxu1  ;;  %v1786_v0 = vpop.f32.mrf.mxu0 }
 0x177   : > { %v1165_v2 = vmax.f32 %v1140_v11, 0.0  ;;  %v1109_v30 = vmax.f32 %v868_v56, %v1021_v27  ;;  %v2812_v11 = vmax.f32 %v2587_v58, %v2589_v61 }
 0x178   : > { %v1893_v31 = vpop.f32.mrf.mxu1  ;;  %v785_v1 = vpop.f32.mrf.mxu0 }
 0x179   : > { %1190 = vst [vmem:[%s2675_s13 + $0x40] sm:$0xff] %v1165_v2  ;;  %v1141_v3 = vadd.f32 %v2666_v42, %v1109_v30  ;;  %v869_v16 = vmax.f32 %v2809_v15, %v785_v1  ;;  %v2813_v31 = vmax.f32 %v2593_v7, %v2595_v9 }
 0x17a   : > { %v1026_v13 = vpop.f32.mrf.mxu1  ;;  %v1789_v18 = vpop.f32.mrf.mxu0 }
 0x17b   : > { %v1166_v59 = vmax.f32 %v1141_v3, 0.0  ;;  %v1110_v35 = vmax.f32 %v869_v16, %v1026_v13 }
 0x17c   : > { %v1896_v36 = vpop.f32.mrf.mxu1  ;;  %v790_v60 = vpop.f32.mrf.mxu0 }
 0x17d   : > { %1191 = vst [vmem:[%s2675_s13 + $0x48] sm:$0xff] %v1166_v59  ;;  %v1142_v62 = vadd.f32 %v2666_v42, %v1110_v35  ;;  %v870_v6 = vmax.f32 %v2810_v5, %v790_v60  ;;  %v2814_v59 = vmax.f32 %v2599_v19, %v2601_v22 }
 0x17e   : > { %v1031_v20 = vpop.f32.mrf.mxu1  ;;  %v1792_v21 = vpop.f32.mrf.mxu0 }
 0x17f   : > { %v1167_v48 = vmax.f32 %v1142_v62, 0.0  ;;  %v1111_v40 = vmax.f32 %v870_v6, %v1031_v20  ;;  %v2815_v20 = vmax.f32 %v2605_v32, %v2607_v34 }
 0x180   : > { %v1899_v41 = vpop.f32.mrf.mxu1  ;;  %v795_v12 = vpop.f32.mrf.mxu0 }
 0x181   : > { %1192 = vst [vmem:[%s2675_s13 + $0x50] sm:$0xff] %v1167_v48  ;;  %v1143_v38 = vadd.f32 %v2666_v42, %v1111_v40  ;;  %v871_v8 = vmax.f32 %v2811_v28, %v795_v12  ;;  %v2816_v28 = vmax.f32 %v2611_v44, %v2613_v47 }
 0x182   : > { %v1036_v23 = vpop.f32.mrf.mxu1  ;;  %v1795_v52 = vpop.f32.mrf.mxu0 }
 0x183   : > { %v1168_v25 = vmax.f32 %v1143_v38, 0.0  ;;  %v1112_v45 = vmax.f32 %v871_v8, %v1036_v23 }
 0x184   : > { %v1902_v46 = vpop.f32.mrf.mxu1  ;;  %v800_v26 = vpop.f32.mrf.mxu0 }
 0x185   : > { %1193 = vst [vmem:[%s2675_s13 + $0x58] sm:$0xff] %v1168_v25  ;;  %v1144_v10 = vadd.f32 %v2666_v42, %v1112_v45  ;;  %v872_v54 = vmax.f32 %v2812_v11, %v800_v26  ;;  %v2817_v26 = vmax.f32 %v2617_v63, %v2619_v4 }
 0x186   : > { %v1041_v56 = vpop.f32.mrf.mxu1  ;;  %v1798_v27 = vpop.f32.mrf.mxu0 }
 0x187   : > { %v1169_v0 = vmax.f32 %v1144_v10, 0.0  ;;  %v1113_v50 = vmax.f32 %v872_v54, %v1041_v56 }
 0x188   : > { %v1905_v51 = vpop.f32.mrf.mxu1  ;;  %v805_v2 = vpop.f32.mrf.mxu0 }
 0x189   : > { %1194 = vst [vmem:[%s2675_s13 + $0x60] sm:$0xff] %v1169_v0  ;;  %v1145_v30 = vadd.f32 %v2666_v42, %v1113_v50  ;;  %v873_v1 = vmax.f32 %v2813_v31, %v805_v2  ;;  %v2818_v50 = vmax.f32 %v2623_v29, %v2625_v37 }
 0x18a   : > { %v1046_v3 = vpop.f32.mrf.mxu1  ;;  %v1801_v15 = vpop.f32.mrf.mxu0 }
 0x18b   : > { %v1170_v16 = vmax.f32 %v1145_v30, 0.0  ;;  %v1114_v58 = vmax.f32 %v873_v1, %v1046_v3  ;;  %v2819_v15 = vmax.f32 %v2629_v53, %v2631_v57 }
 0x18c   : > { %v1908_v61 = vpop.f32.mrf.mxu1  ;;  %v810_v13 = vpop.f32.mrf.mxu0 }
 0x18d   : > { %1195 = vst [vmem:[%s2675_s13 + $0x68] sm:$0xff] %v1170_v16  ;;  %v1146_v18 = vadd.f32 %v2666_v42, %v1114_v58  ;;  %v874_v35 = vmax.f32 %v2814_v59, %v810_v13 }
 0x18e   : > { %v1051_v36 = vpop.f32.mrf.mxu1  ;;  %v1804_v60 = vpop.f32.mrf.mxu0 }
 0x18f   : > { %v1171_v62 = vmax.f32 %v1146_v18, 0.0  ;;  %v1115_v7 = vmax.f32 %v874_v35, %v1051_v36  ;;  %v2820_v35 = vmax.f32 %v2635_v17, %v2637_v24 }
 0x190   : > { %v1911_v9 = vpop.f32.mrf.mxu1  ;;  %v815_v5 = vpop.f32.mrf.mxu0 }
 0x191   : > { %1196 = vst [vmem:[%s2675_s13 + $0x70] sm:$0xff] %v1171_v62  ;;  %v1147_v6 = vadd.f32 %v2666_v42, %v1115_v7  ;;  %v875_v21 = vmax.f32 %v2815_v20, %v815_v5 }
 0x192   : > { %v1056_v48 = vpop.f32.mrf.mxu1  ;;  %v1807_v40 = vpop.f32.mrf.mxu0 }
 0x193   : > { %v1172_v41 = vmax.f32 %v1147_v6, 0.0  ;;  %v1116_v19 = vmax.f32 %v875_v21, %v1056_v48  ;;  %v2821_v6 = vmax.f32 %v2641_v49, %v2643_v39 }
 0x194   : > { %v1914_v22 = vpop.f32.mrf.mxu1  ;;  %v820_v12 = vpop.f32.mrf.mxu0 }
 0x195   : > { %1197 = vst [vmem:[%s2675_s13 + $0x78] sm:$0xff] %v1172_v41  ;;  %v1148_v38 = vadd.f32 %v2666_v42, %v1116_v19  ;;  %v876_v8 = vmax.f32 %v2816_v28, %v820_v12  ;;  %v2822_v22 = vmax.f32 %v2647_v14, %v2649_v43 }
 0x196   : > { %v1061_v23 = vpop.f32.mrf.mxu1  ;;  %v1810_v52 = vpop.f32.mrf.mxu0 }
 0x197   : > { %v1173_v25 = vmax.f32 %v1148_v38, 0.0  ;;  %v1117_v32 = vmax.f32 %v876_v8, %v1061_v23 }
 0x198   : > { %v1917_v34 = vpop.f32.mrf.mxu1  ;;  %v825_v45 = vpop.f32.mrf.mxu0 }
 0x199   : > { %1198 = vst [vmem:[%s2675_s13 + $0x80] sm:$0xff] %v1173_v25  ;;  %v1149_v46 = vadd.f32 %v2666_v42, %v1117_v32  ;;  %v877_v10 = vmax.f32 %v2817_v26, %v825_v45  ;;  %v2823_v25 = vmax.f32 %v2653_v55, %v2655_v33 }
 0x19a   : > { %v1066_v11 = vpop.f32.mrf.mxu1  ;;  %v1813_v54 = vpop.f32.mrf.mxu0 }
 0x19b   : > { %v1174_v56 = vmax.f32 %v1149_v46, 0.0  ;;  %v1118_v44 = vmax.f32 %v877_v10, %v1066_v11 }
 0x19c   : > { %v1920_v47 = vpop.f32.mrf.mxu1  ;;  %v830_v27 = vpop.f32.mrf.mxu0 }
 0x19d   : > { %1199 = vst [vmem:[%s2675_s13 + $0x88] sm:$0xff] %v1174_v56  ;;  %v1150_v0 = vadd.f32 %v2666_v42, %v1118_v44  ;;  %v878_v51 = vmax.f32 %v2818_v50, %v830_v27 }
 0x19e   : > { %v1071_v2 = vpop.f32.mrf.mxu1  ;;  %v1816_v30 = vpop.f32.mrf.mxu0 }
 0x19f   : > { %v1175_v31 = vmax.f32 %v1150_v0, 0.0  ;;  %v1119_v63 = vmax.f32 %v878_v51, %v1071_v2 }
 0x1a0   : > { %v1923_v4 = vpop.f32.mrf.mxu1  ;;  %v835_v1 = vpop.f32.mrf.mxu0 }
 0x1a1   : > { %1200 = vst [vmem:[%s2675_s13 + $0x90] sm:$0xff] %v1175_v31  ;;  %v1151_v3 = vadd.f32 %v2666_v42, %v1119_v63  ;;  %v879_v16 = vmax.f32 %v2819_v15, %v835_v1 }
 0x1a2   : > { %v1076_v58 = vpop.f32.mrf.mxu1  ;;  %v1819_v61 = vpop.f32.mrf.mxu0 }
 0x1a3   : > { %v1176_v13 = vmax.f32 %v1151_v3, 0.0  ;;  %v1120_v29 = vmax.f32 %v879_v16, %v1076_v58 }
 0x1a4   : > { %v1926_v37 = vpop.f32.mrf.mxu1  ;;  %v840_v18 = vpop.f32.mrf.mxu0 }
 0x1a5   : > { %1201 = vst [vmem:[%s2675_s13 + $0x98] sm:$0xff] %v1176_v13  ;;  %v1152_v59 = vadd.f32 %v2666_v42, %v1120_v29  ;;  %v880_v36 = vmax.f32 %v2820_v35, %v840_v18 }
 0x1a6   : > { %v1081_v60 = vpop.f32.mrf.mxu1  ;;  %v1822_v62 = vpop.f32.mrf.mxu0 }
 0x1a7   : > { %v1177_v7 = vmax.f32 %v1152_v59, 0.0  ;;  %v1121_v53 = vmax.f32 %v880_v36, %v1081_v60 }
 0x1a8   : > { %v1929_v57 = vpop.f32.mrf.mxu1  ;;  %v845_v9 = vpop.f32.mrf.mxu0 }
 0x1a9   : > { %1202 = vst [vmem:[%s2675_s13 + $0xa0] sm:$0xff] %v1177_v7  ;;  %v1153_v5 = vadd.f32 %v2666_v42, %v1121_v53  ;;  %v881_v20 = vmax.f32 %v2821_v6, %v845_v9 }
 0x1aa   : > { %v1086_v21 = vpop.f32.mrf.mxu1  ;;  %v1825_v48 = vpop.f32.mrf.mxu0 }
 0x1ab   : > { %v1178_v40 = vmax.f32 %v1153_v5, 0.0  ;;  %v1122_v17 = vmax.f32 %v881_v20, %v1086_v21 }
 0x1ac   : > { %v1932_v24 = vpop.f32.mrf.mxu1  ;;  %v850_v41 = vpop.f32.mrf.mxu0 }
 0x1ad   : > { %1203 = vst [vmem:[%s2675_s13 + $0xa8] sm:$0xff] %v1178_v40  ;;  %v1154_v19 = vadd.f32 %v2666_v42, %v1122_v17  ;;  %v882_v12 = vmax.f32 %v2822_v22, %v850_v41 }
 0x1ae   : > { %v1091_v38 = vpop.f32.mrf.mxu1  ;;  %v1828_v28 = vpop.f32.mrf.mxu0 }
 0x1af   : > { %v1179_v49 = vmax.f32 %v1154_v19, 0.0  ;;  %v1123_v39 = vmax.f32 %v882_v12, %v1091_v38 }
 0x1b0   : > { %v1935_v8 = vpop.f32.mrf.mxu1  ;;  %v855_v23 = vpop.f32.mrf.mxu0 }
 0x1b1   : > { %1204 = vst [vmem:[%s2675_s13 + $0xb0] sm:$0xff] %v1179_v49  ;;  %v1155_v52 = vadd.f32 %v2666_v42, %v1123_v39  ;;  %v883_v32 = vmax.f32 %v2823_v25, %v855_v23 }
 0x1b2   : > { %v1096_v34 = vpop.f32.mrf.mxu1  ;;  %v1831_v45 = vpop.f32.mrf.mxu0 }
 0x1b3   : > { %v1180_v46 = vmax.f32 %v1155_v52, 0.0  ;;  %v1124_v43 = vmax.f32 %v883_v32, %v1096_v34 }
 0x1b4   : > { %v1938_v14 = vpop.f32.mrf.mxu1 }
 0x1b5   : > { %1205 = vst [vmem:[%s2675_s13 + $0xb8] sm:$0xff] %v1180_v46  ;;  %v1156_v26 = vadd.f32 %v2666_v42, %v1124_v43 }
 0x1b7   : > { %v1181_v10 = vmax.f32 %v1156_v26, 0.0 }
 0x1b9   : > { %1206 = vst [vmem:[%s2675_s13 + $0xc0] sm:$0xf] %v1181_v10 }
 0x1ba PF: > { %s13_s12 = sadd.s32 1, %s1957_s12  }
 0x1bb   : > { %p10_p4 = scmp.ge.s32.totalorder %s13_s12, 4  }
 0x1bd   :  { %12 = sbr.rel (!%p10_p4) target bundleno = 1 (0x1), region = 65 }

// kernel: lenet5_cifar_forward.4
= control target key start
LH: loop header
LB: loop body
LE: loop exit
PB: predicated region body
PF: predicated region fallthrough
CT: control target
= control target key end

     0   :  { %s914_s12 = smov 0   ;;  %s1264_s0 = inlined_call_operand.vmem [shape: f32[2,4,25,256], index: 0, kind: input, shape index: {}]   ;;  %s1265_s1 = inlined_call_operand.vmem [shape: f32[256,128], index: 1, kind: input, shape index: {}]   ;;  %s1266_s2 = inlined_call_operand.vmem [shape: f32[1,128], index: 2, kind: input, shape index: {}]   ;;  %s1267_s3 = inlined_call_operand.vmem [shape: f32[2,25,128], index: 3, kind: output, shape index: {}]  }
   0x1 LB: > { %s664_s13 = sadd.s32 4294967295, %s892_s12   ;;  %p668_p0 = scmp.ge.s32.totalorder %s892_s12, 1  ;;  %s892_s12 = sphi %s914_s12, %s13_s12  }
   0x2   : > { %p137_p1 = scmp.lt.s32.totalorder %s892_s12, 3 }
   0x4   : > { %p138_p2 = pnand %p668_p0, %p137_p1 }
   0x5   : > { %p161_p3 = scmp.lt.s32.totalorder (!%p138_p2), %s664_s13, 1 }
   0x6   : > { %141 = sbr.rel (%p138_p2) target bundleno = 303 (0x12f), region = 32 }
   0xb   : > { %v925_v0 = vld [vmem:[%s1265_s1 + $0xf8] sm:$0xff]  ;;  %v935_v2 = vld [vmem:[%s1265_s1 + $0xf0] sm:$0xff]  ;;  %v949_v4 = vld [vmem:[%s1265_s1 + $0xe8] sm:$0xff]  ;;  %s1269_s13 = smov (!%p161_p3, %s664_s13), 1 }
   0xc   : > { %v930_v1 = vld [vmem:[%s1265_s1 + $0x78] sm:$0xff]  ;;  %702 = vmatprep.subr.mxu0 %v925_v0  ;;  %746 = vmatprep.subr.mxu1 %v925_v0  ;;  %v942_v3 = vld [vmem:[%s1265_s1 + $0x70] sm:$0xff]  ;;  %v956_v5 = vld [vmem:[%s1265_s1 + $0x68] sm:$0xff]  ;;  %s700_s16 = sshll.u32 %s1269_s13, 8  ;;  %s701_s7 = sshll.u32 %s1269_s13, 5 }
   0xd   : > { %703 = vmatpush3.msra.mxu0 %v930_v1  ;;  %747 = vmatpush3.msra.mxu1 %v930_v1  ;;  %v963_v6 = vld [vmem:[%s1265_s1 + $0xe0] sm:$0xff]  ;;  %v977_v8 = vld [vmem:[%s1265_s1 + $0xd8] sm:$0xff]  ;;  %v991_v10 = vld [vmem:[%s1265_s1 + $0xd0] sm:$0xff]  ;;  %s1129_s25 = scalar_lea.vmem %s1264_s0, %s700_s16  ;;  %s170_s10 = scalar_lea.vmem %s1267_s3, %s701_s7 }
   0xe   : > { %704 = vmatprep.subr.mxu0 %v935_v2  ;;  %748 = vmatprep.subr.mxu1 %v935_v2  ;;  %v970_v7 = vld [vmem:[%s1265_s1 + $0x60] sm:$0xff]  ;;  %v984_v9 = vld [vmem:[%s1265_s1 + $0x58] sm:$0xff]  ;;  %v998_v11 = vld [vmem:[%s1265_s1 + $0x50] sm:$0xff] }
   0xf   : > { %705 = vmatpush3.msra.mxu0 %v942_v3  ;;  %749 = vmatpush3.msra.mxu1 %v942_v3  ;;  %v1005_v12 = vld [vmem:[%s1265_s1 + $0xc8] sm:$0xff]  ;;  %v1019_v14 = vld [vmem:[%s1265_s1 + $0xc0] sm:$0xff]  ;;  %v1033_v16 = vld [vmem:[%s1265_s1 + $0xb8] sm:$0xff] }
  0x10   : > { %706 = vmatprep.subr.mxu0 %v949_v4  ;;  %750 = vmatprep.subr.mxu1 %v949_v4  ;;  %v1012_v13 = vld [vmem:[%s1265_s1 + $0x48] sm:$0xff]  ;;  %v1026_v15 = vld [vmem:[%s1265_s1 + $0x40] sm:$0xff]  ;;  %v1040_v17 = vld [vmem:[%s1265_s1 + $0x38] sm:$0xff] }
  0x11   : > { %707 = vmatpush3.msra.mxu0 %v956_v5  ;;  %751 = vmatpush3.msra.mxu1 %v956_v5  ;;  %v1049_v18 = vld [vmem:[%s1265_s1 + $0xb0] sm:$0xff]  ;;  %v1063_v20 = vld [vmem:[%s1265_s1 + $0xa8] sm:$0xff]  ;;  %v1081_v22 = vld [vmem:[%s1265_s1 + $0xa0] sm:$0xff] }
  0x12   : > { %708 = vmatprep.subr.mxu0 %v963_v6  ;;  %752 = vmatprep.subr.mxu1 %v963_v6  ;;  %v1056_v19 = vld [vmem:[%s1265_s1 + $0x30] sm:$0xff]  ;;  %v1070_v21 = vld [vmem:[%s1265_s1 + $0x28] sm:$0xff]  ;;  %v1088_v23 = vld [vmem:[%s1265_s1 + $0x20] sm:$0xff] }
  0x13   : > { %709 = vmatpush3.msra.mxu0 %v970_v7  ;;  %753 = vmatpush3.msra.mxu1 %v970_v7  ;;  %v1095_v24 = vld [vmem:[%s1265_s1 + $0x98] sm:$0xff]  ;;  %v1110_v26 = vld [vmem:[%s1265_s1 + $0x90] sm:$0xff]  ;;  %v1124_v28 = vld [vmem:[%s1265_s1 + $0x88] sm:$0xff] }
  0x14   : > { %710 = vmatprep.subr.mxu0 %v977_v8  ;;  %754 = vmatprep.subr.mxu1 %v977_v8  ;;  %v1102_v25 = vld [vmem:[%s1265_s1 + $0x18] sm:$0xff]  ;;  %v1117_v27 = vld [vmem:[%s1265_s1 + $0x10] sm:$0xff]  ;;  %v1136_v29 = vld [vmem:[%s1265_s1 + $0x8] sm:$0xff] }
  0x15   : > { %711 = vmatpush3.msra.mxu0 %v984_v9  ;;  %755 = vmatpush3.msra.mxu1 %v984_v9  ;;  %v1143_v30 = vld [vmem:[%s1265_s1 + $0x80] sm:$0xff]  ;;  %v204_v32 = vld [vmem:[%s1129_s25 + $0x8] sm:$0xff]  ;;  %v206_v36 = vld [vmem:[%s1129_s25 + $0x18] sm:$0xff] }
  0x16   : > { %712 = vmatprep.subr.mxu0 %v991_v10  ;;  %756 = vmatprep.subr.mxu1 %v991_v10  ;;  %v1150_v31 = vld [vmem:[%s1265_s1] sm:$0xff]  ;;  %v674_v33 = vld [vmem:[%s1129_s25 + $0x48] sm:$0xff]  ;;  %v676_v37 = vld [vmem:[%s1129_s25 + $0x58] sm:$0xff] }
  0x17   : > { %713 = vmatpush3.msra.mxu0 %v998_v11  ;;  %757 = vmatpush3.msra.mxu1 %v998_v11  ;;  %v203_v34 = vld [vmem:[%s1129_s25] sm:$0xff]  ;;  %v205_v38 = vld [vmem:[%s1129_s25 + $0x10] sm:$0xff]  ;;  %v208_v40 = vld [vmem:[%s1129_s25 + $0x28] sm:$0xff] }
  0x18   : > { %714 = vmatprep.subr.mxu0 %v1005_v12  ;;  %758 = vmatprep.subr.mxu1 %v1005_v12  ;;  %v673_v35 = vld [vmem:[%s1129_s25 + $0x40] sm:$0xff]  ;;  %v675_v39 = vld [vmem:[%s1129_s25 + $0x50] sm:$0xff]  ;;  %v678_v41 = vld [vmem:[%s1129_s25 + $0x68] sm:$0xff] }
  0x19   : > { %715 = vmatpush3.msra.mxu0 %v1012_v13  ;;  %759 = vmatpush3.msra.mxu1 %v1012_v13  ;;  %v207_v42 = vld [vmem:[%s1129_s25 + $0x20] sm:$0xff]  ;;  %v210_v44 = vld [vmem:[%s1129_s25 + $0x38] sm:$0x1]  ;;  %v209_v46 = vld [vmem:[%s1129_s25 + $0x30] sm:$0x1] }
  0x1a   : > { %716 = vmatprep.subr.mxu0 %v1019_v14  ;;  %760 = vmatprep.subr.mxu1 %v1019_v14  ;;  %v677_v43 = vld [vmem:[%s1129_s25 + $0x60] sm:$0xff]  ;;  %v680_v45 = vld [vmem:[%s1129_s25 + $0x78] sm:$0x1]  ;;  %v679_v47 = vld [vmem:[%s1129_s25 + $0x70] sm:$0x1] }
  0x1b   : > { %717 = vmatpush3.msra.mxu0 %v1026_v15  ;;  %761 = vmatpush3.msra.mxu1 %v1026_v15  ;;  %v682_v48 = vld [vmem:[%s1129_s25 + $0x88] sm:$0xff]  ;;  %v681_v50 = vld [vmem:[%s1129_s25 + $0x80] sm:$0xff]  ;;  %v684_v52 = vld [vmem:[%s1129_s25 + $0x98] sm:$0xff] }
  0x1c   : > { %718 = vmatprep.subr.mxu0 %v1033_v16  ;;  %762 = vmatprep.subr.mxu1 %v1033_v16  ;;  %v690_v49 = vld [vmem:[%s1129_s25 + $0xc8] sm:$0xff]  ;;  %v689_v51 = vld [vmem:[%s1129_s25 + $0xc0] sm:$0xff]  ;;  %v692_v53 = vld [vmem:[%s1129_s25 + $0xd8] sm:$0xff] }
  0x1d   : > { %719 = vmatpush3.msra.mxu0 %v1040_v17  ;;  %763 = vmatpush3.msra.mxu1 %v1040_v17  ;;  %v683_v54 = vld [vmem:[%s1129_s25 + $0x90] sm:$0xff]  ;;  %v686_v56 = vld [vmem:[%s1129_s25 + $0xa8] sm:$0xff]  ;;  %v685_v58 = vld [vmem:[%s1129_s25 + $0xa0] sm:$0xff] }
  0x1e   : > { %720 = vmatprep.subr.mxu0 %v1049_v18  ;;  %764 = vmatprep.subr.mxu1 %v1049_v18  ;;  %v691_v55 = vld [vmem:[%s1129_s25 + $0xd0] sm:$0xff]  ;;  %v694_v57 = vld [vmem:[%s1129_s25 + $0xe8] sm:$0xff]  ;;  %v693_v59 = vld [vmem:[%s1129_s25 + $0xe0] sm:$0xff] }
  0x1f   : > { %721 = vmatpush3.msra.mxu0 %v1056_v19  ;;  %765 = vmatpush3.msra.mxu1 %v1056_v19  ;;  %v688_v60 = vld [vmem:[%s1129_s25 + $0xb8] sm:$0x1]  ;;  %v687_v62 = vld [vmem:[%s1129_s25 + $0xb0] sm:$0x1] }
  0x20   : > { %722 = vmatprep.subr.mxu0 %v1063_v20  ;;  %766 = vmatprep.subr.mxu1 %v1063_v20  ;;  %v696_v61 = vld [vmem:[%s1129_s25 + $0xf8] sm:$0x1]  ;;  %v695_v63 = vld [vmem:[%s1129_s25 + $0xf0] sm:$0x1] }
  0x21   : > { %723 = vmatpush3.msra.mxu0 %v1070_v21  ;;  %767 = vmatpush3.msra.mxu1 %v1070_v21 }
  0x22   : > { %724 = vmatprep.subr.mxu0 %v1081_v22  ;;  %768 = vmatprep.subr.mxu1 %v1081_v22 }
  0x23   : > { %725 = vmatpush3.msra.mxu0 %v1088_v23  ;;  %769 = vmatpush3.msra.mxu1 %v1088_v23 }
  0x24   : > { %726 = vmatprep.subr.mxu0 %v1095_v24  ;;  %770 = vmatprep.subr.mxu1 %v1095_v24 }
  0x25   : > { %727 = vmatpush3.msra.mxu0 %v1102_v25  ;;  %771 = vmatpush3.msra.mxu1 %v1102_v25 }
  0x26   : > { %728 = vmatprep.subr.mxu0 %v1110_v26  ;;  %772 = vmatprep.subr.mxu1 %v1110_v26 }
  0x27   : > { %729 = vmatpush3.msra.mxu0 %v1117_v27  ;;  %773 = vmatpush3.msra.mxu1 %v1117_v27 }
  0x28   : > { %730 = vmatprep.subr.mxu0 %v1124_v28  ;;  %774 = vmatprep.subr.mxu1 %v1124_v28 }
  0x29   : > { %731 = vmatpush3.msra.mxu0 %v1136_v29  ;;  %775 = vmatpush3.msra.mxu1 %v1136_v29 }
  0x2a   : > { %732 = vmatprep.subr.mxu0 %v1143_v30  ;;  %776 = vmatprep.subr.mxu1 %v1143_v30 }
  0x2b   : > { %733 = vmatpush3.msra.mxu0 %v1150_v31  ;;  %275 = vmatprep.mubr.f32.mxu0 %v204_v32  ;;  %v697_v32 = vld [vmem:[%s1266_s2] ss:$0 sm:$0xff] }
  0x2c   : > { %777 = vmatpush3.msra.mxu1 %v1150_v31  ;;  %369 = vmatprep.mubr.f32.mxu1 %v674_v33 }
  0x2d   : > { %276 = vmatmul.mubr.f32.vlgmr.msra.gmra.mxu0 %v203_v34  ;;  %370 = vmatmul.mubr.f32.vlgmr.msra.gmra.mxu1 %v673_v35 }
  0x2e   : > { %790 = vmatprep.subr.mxu0 %v925_v0  ;;  %834 = vmatprep.subr.mxu1 %v925_v0 }
  0x2f   : > { %791 = vmatpush3.msra.mxu0 %v930_v1  ;;  %835 = vmatpush3.msra.mxu1 %v930_v1 }
  0x30   : > { %792 = vmatprep.subr.mxu0 %v935_v2  ;;  %836 = vmatprep.subr.mxu1 %v935_v2 }
  0x31   : > { %793 = vmatpush3.msra.mxu0 %v942_v3  ;;  %837 = vmatpush3.msra.mxu1 %v942_v3 }
  0x32   : > { %794 = vmatprep.subr.mxu0 %v949_v4  ;;  %838 = vmatprep.subr.mxu1 %v949_v4 }
  0x33   : > { %795 = vmatpush3.msra.mxu0 %v956_v5  ;;  %839 = vmatpush3.msra.mxu1 %v956_v5 }
  0x34   : > { %796 = vmatprep.subr.mxu0 %v963_v6  ;;  %840 = vmatprep.subr.mxu1 %v963_v6 }
  0x35   : > { %797 = vmatpush3.msra.mxu0 %v970_v7  ;;  %841 = vmatpush3.msra.mxu1 %v970_v7 }
  0x36   : > { %798 = vmatprep.subr.mxu0 %v977_v8  ;;  %842 = vmatprep.subr.mxu1 %v977_v8 }
  0x37   : > { %799 = vmatpush3.msra.mxu0 %v984_v9  ;;  %843 = vmatpush3.msra.mxu1 %v984_v9 }
  0x38   : > { %800 = vmatprep.subr.mxu0 %v991_v10  ;;  %844 = vmatprep.subr.mxu1 %v991_v10 }
  0x39   : > { %801 = vmatpush3.msra.mxu0 %v998_v11  ;;  %845 = vmatpush3.msra.mxu1 %v998_v11 }
  0x3a   : > { %802 = vmatprep.subr.mxu0 %v1005_v12  ;;  %846 = vmatprep.subr.mxu1 %v1005_v12 }
  0x3b   : > { %803 = vmatpush3.msra.mxu0 %v1012_v13  ;;  %847 = vmatpush3.msra.mxu1 %v1012_v13 }
  0x3c   : > { %804 = vmatprep.subr.mxu0 %v1019_v14  ;;  %848 = vmatprep.subr.mxu1 %v1019_v14 }
  0x3d   : > { %805 = vmatpush3.msra.mxu0 %v1026_v15  ;;  %849 = vmatpush3.msra.mxu1 %v1026_v15 }
  0x3e   : > { %806 = vmatprep.subr.mxu0 %v1033_v16  ;;  %850 = vmatprep.subr.mxu1 %v1033_v16 }
  0x3f   : > { %280 = vmatprep.mubr.f32.mxu0 %v206_v36  ;;  %374 = vmatprep.mubr.f32.mxu1 %v676_v37 }
  0x40   : > { %807 = vmatpush3.msra.mxu0 %v1040_v17  ;;  %851 = vmatpush3.msra.mxu1 %v1040_v17 }
  0x41   : > { %281 = vmatmul.mubr.f32.gmra.mxu0 %v205_v38  ;;  %375 = vmatmul.mubr.f32.gmra.mxu1 %v675_v39 }
  0x42   : > { %808 = vmatprep.subr.mxu0 %v1049_v18  ;;  %852 = vmatprep.subr.mxu1 %v1049_v18 }
  0x43   : > { %809 = vmatpush3.msra.mxu0 %v1056_v19  ;;  %853 = vmatpush3.msra.mxu1 %v1056_v19 }
  0x44   : > { %810 = vmatprep.subr.mxu0 %v1063_v20  ;;  %854 = vmatprep.subr.mxu1 %v1063_v20 }
  0x45   : > { %285 = vmatprep.mubr.f32.mxu0 %v208_v40  ;;  %379 = vmatprep.mubr.f32.mxu1 %v678_v41 }
  0x46   : > { %811 = vmatpush3.msra.mxu0 %v1070_v21  ;;  %855 = vmatpush3.msra.mxu1 %v1070_v21 }
  0x47   : > { %286 = vmatmul.mubr.f32.gmra.mxu0 %v207_v42  ;;  %380 = vmatmul.mubr.f32.gmra.mxu1 %v677_v43 }
  0x48   : > { %812 = vmatprep.subr.mxu0 %v1081_v22  ;;  %856 = vmatprep.subr.mxu1 %v1081_v22 }
  0x49   : > { %813 = vmatpush3.msra.mxu0 %v1088_v23  ;;  %857 = vmatpush3.msra.mxu1 %v1088_v23 }
  0x4a   : > { %814 = vmatprep.subr.mxu0 %v1095_v24  ;;  %858 = vmatprep.subr.mxu1 %v1095_v24 }
  0x4b   : > { %290 = vmatprep.mubr.f32.mxu0 %v210_v44  ;;  %384 = vmatprep.mubr.f32.mxu1 %v680_v45 }
  0x4c   : > { %815 = vmatpush3.msra.mxu0 %v1102_v25  ;;  %859 = vmatpush3.msra.mxu1 %v1102_v25 }
  0x4d   : > { %291 = vmatmul.mubr.f32.gmra.mxu0 %v209_v46  ;;  %385 = vmatmul.mubr.f32.gmra.mxu1 %v679_v47 }
  0x4e   : > { %816 = vmatprep.subr.mxu0 %v1110_v26  ;;  %860 = vmatprep.subr.mxu1 %v1110_v26 }
  0x4f   : > { %817 = vmatpush3.msra.mxu0 %v1117_v27  ;;  %861 = vmatpush3.msra.mxu1 %v1117_v27 }
  0x50   : > { %818 = vmatprep.subr.mxu0 %v1124_v28  ;;  %862 = vmatprep.subr.mxu1 %v1124_v28 }
  0x51   : > { %819 = vmatpush3.msra.mxu0 %v1136_v29  ;;  %863 = vmatpush3.msra.mxu1 %v1136_v29 }
  0x52   : > { %820 = vmatprep.subr.mxu0 %v1143_v30  ;;  %864 = vmatprep.subr.mxu1 %v1143_v30 }
  0x53   : > { %821 = vmatpush3.msra.mxu0 %v1150_v31  ;;  %467 = vmatprep.mubr.f32.mxu0 %v682_v48 }
  0x54   : > { %865 = vmatpush3.msra.mxu1 %v1150_v31  ;;  %565 = vmatprep.mubr.f32.mxu1 %v690_v49 }
  0x55   : > { %468 = vmatmul.mubr.f32.vlgmr.msra.gmra.mxu0 %v681_v50  ;;  %566 = vmatmul.mubr.f32.vlgmr.msra.gmra.mxu1 %v689_v51 }
  0x56   : > { %472 = vmatprep.mubr.f32.mxu0 %v684_v52  ;;  %570 = vmatprep.mubr.f32.mxu1 %v692_v53 }
  0x59   : > { %473 = vmatmul.mubr.f32.gmra.mxu0 %v683_v54  ;;  %571 = vmatmul.mubr.f32.gmra.mxu1 %v691_v55 }
  0x5a   : > { %477 = vmatprep.mubr.f32.mxu0 %v686_v56  ;;  %575 = vmatprep.mubr.f32.mxu1 %v694_v57 }
  0x5d   : > { %478 = vmatmul.mubr.f32.gmra.mxu0 %v685_v58  ;;  %576 = vmatmul.mubr.f32.gmra.mxu1 %v693_v59 }
  0x5e   : > { %482 = vmatprep.mubr.f32.mxu0 %v688_v60  ;;  %580 = vmatprep.mubr.f32.mxu1 %v696_v61 }
  0x61   : > { %483 = vmatmul.mubr.f32.gmra.mxu0 %v687_v62  ;;  %581 = vmatmul.mubr.f32.gmra.mxu1 %v695_v63 }
  0xed   : > { %v734_v0 = vpop.f32.mrf.mxu0  ;;  %v778_v1 = vpop.f32.mrf.mxu1 }
  0xef   : > { %v735_v2 = vpop.f32.mrf.mxu0  ;;  %v779_v3 = vpop.f32.mrf.mxu1 }
  0xf0   : > { %v736_v16 = vadd.f32 %v735_v2, %v734_v0  ;;  %v780_v17 = vadd.f32 %v779_v3, %v778_v1 }
  0xf2   : > { %v390_v22 = vmax.f32 %v736_v16, %v780_v17 }
 0x101   : > { %v737_v4 = vpop.f32.mrf.mxu0  ;;  %v781_v5 = vpop.f32.mrf.mxu1 }
 0x103   : > { %v738_v6 = vpop.f32.mrf.mxu0  ;;  %v782_v7 = vpop.f32.mrf.mxu1 }
 0x104   : > { %v739_v23 = vadd.f32 %v738_v6, %v737_v4  ;;  %v783_v24 = vadd.f32 %v782_v7, %v781_v5 }
 0x106   : > { %v391_v35 = vmax.f32 %v739_v23, %v783_v24 }
 0x107   : > { %v740_v8 = vpop.f32.mrf.mxu0  ;;  %v784_v9 = vpop.f32.mrf.mxu1 }
 0x109   : > { %v741_v10 = vpop.f32.mrf.mxu0  ;;  %v785_v11 = vpop.f32.mrf.mxu1 }
 0x10a   : > { %v742_v30 = vadd.f32 %v741_v10, %v740_v8  ;;  %v786_v31 = vadd.f32 %v785_v11, %v784_v9 }
 0x10c   : > { %v392_v43 = vmax.f32 %v742_v30, %v786_v31 }
 0x10d   : > { %v743_v12 = vpop.f32.mrf.mxu0  ;;  %v787_v13 = vpop.f32.mrf.mxu1 }
 0x10f   : > { %v744_v14 = vpop.f32.mrf.mxu0  ;;  %v788_v15 = vpop.f32.mrf.mxu1 }
 0x110   : > { %v745_v44 = vadd.f32 %v744_v14, %v743_v12  ;;  %v789_v47 = vadd.f32 %v788_v15, %v787_v13 }
 0x112   : > { %v393_v58 = vmax.f32 %v745_v44, %v789_v47 }
 0x115   : > { %v822_v18 = vpop.f32.mrf.mxu0  ;;  %v866_v19 = vpop.f32.mrf.mxu1 }
 0x117   : > { %v823_v20 = vpop.f32.mrf.mxu0  ;;  %v867_v21 = vpop.f32.mrf.mxu1 }
 0x118   : > { %v824_v25 = vadd.f32 %v823_v20, %v822_v18  ;;  %v868_v29 = vadd.f32 %v867_v21, %v866_v19 }
 0x119   : > { %v825_v26 = vpop.f32.mrf.mxu0  ;;  %v869_v27 = vpop.f32.mrf.mxu1 }
 0x11a   : > { %v488_v28 = vmax.f32 %v390_v22, %v824_v25 }
 0x11b   : > { %v826_v33 = vpop.f32.mrf.mxu0  ;;  %v870_v34 = vpop.f32.mrf.mxu1 }
 0x11c   : > { %v586_v36 = vmax.f32 %v488_v28, %v868_v29  ;;  %v827_v37 = vadd.f32 %v826_v33, %v825_v26  ;;  %v871_v42 = vadd.f32 %v870_v34, %v869_v27 }
 0x11d   : > { %v828_v38 = vpop.f32.mrf.mxu0  ;;  %v872_v39 = vpop.f32.mrf.mxu1 }
 0x11e   : > { %v597_v40 = vadd.f32 %v697_v32, %v586_v36  ;;  %v489_v41 = vmax.f32 %v391_v35, %v827_v37 }
 0x11f   : > { %v829_v45 = vpop.f32.mrf.mxu0  ;;  %v873_v46 = vpop.f32.mrf.mxu1 }
 0x120   : > { %v601_v48 = vmax.f32 %v597_v40, 0.0  ;;  %v587_v49 = vmax.f32 %v489_v41, %v871_v42  ;;  %v830_v50 = vadd.f32 %v829_v45, %v828_v38  ;;  %v874_v55 = vadd.f32 %v873_v46, %v872_v39 }
 0x121   : > { %v831_v51 = vpop.f32.mrf.mxu0  ;;  %v875_v52 = vpop.f32.mrf.mxu1 }
 0x122   : > { %605 = vst [vmem:[%s170_s10] sm:$0xff] %v601_v48  ;;  %v598_v53 = vadd.f32 %v697_v32, %v587_v49  ;;  %v490_v54 = vmax.f32 %v392_v43, %v830_v50 }
 0x123   : > { %v832_v56 = vpop.f32.mrf.mxu0  ;;  %v876_v57 = vpop.f32.mrf.mxu1 }
 0x124   : > { %v602_v59 = vmax.f32 %v598_v53, 0.0  ;;  %v588_v60 = vmax.f32 %v490_v54, %v874_v55  ;;  %v833_v61 = vadd.f32 %v832_v56, %v831_v51  ;;  %v877_v0 = vadd.f32 %v876_v57, %v875_v52 }
 0x126   : > { %606 = vst [vmem:[%s170_s10 + $0x8] sm:$0xff] %v602_v59  ;;  %v599_v62 = vadd.f32 %v697_v32, %v588_v60  ;;  %v491_v63 = vmax.f32 %v393_v58, %v833_v61 }
 0x128   : > { %v603_v1 = vmax.f32 %v599_v62, 0.0  ;;  %v589_v2 = vmax.f32 %v491_v63, %v877_v0 }
 0x12a   : > { %607 = vst [vmem:[%s170_s10 + $0x10] sm:$0xff] %v603_v1  ;;  %v600_v3 = vadd.f32 %v697_v32, %v589_v2 }
 0x12c   : > { %v604_v4 = vmax.f32 %v600_v3, 0.0 }
 0x12e   : > { %608 = vst [vmem:[%s170_s10 + $0x18] sm:$0x1] %v604_v4 }
 0x12f PF: > { %s13_s12 = sadd.s32 1, %s892_s12  }
 0x130   : > { %p10_p4 = scmp.ge.s32.totalorder %s13_s12, 4  }
 0x132   :  { %12 = sbr.rel (!%p10_p4) target bundleno = 1 (0x1), region = 65 }

// kernel: lenet5_cifar_forward.5
= control target key start
LH: loop header
LB: loop body
LE: loop exit
PB: predicated region body
PF: predicated region fallthrough
CT: control target
= control target key end

     0   :  { %v2308_v27 = vmov 1983009808   ;;  %v452_v29 = vlaneseq  ;;  %s3749_s0 = inlined_call_operand.vmem [shape: f32[2,3200], index: 0, kind: input, shape index: {}]   ;;  %s3750_s1 = inlined_call_operand.vmem [shape: f32[3200,128], index: 1, kind: input, shape index: {}]   ;;  %s3751_s2 = inlined_call_operand.vmem [shape: f32[1,128], index: 2, kind: input, shape index: {}]   ;;  %s3752_s3 = inlined_call_operand.vmem [shape: f32[128,128], index: 3, kind: input, shape index: {}]   ;;  %s3753_s4 = inlined_call_operand.vmem [shape: f32[1,128], index: 4, kind: input, shape index: {}]   ;;  %s3754_s5 = inlined_call_operand.vmem [shape: f32[128,10], index: 5, kind: input, shape index: {}]   ;;  %s3755_s6 = inlined_call_operand.vmem [shape: f32[1,10], index: 6, kind: input, shape index: {}]   ;;  %s3756_s7 = inlined_call_operand.hbm [shape: f32[2,10], index: 7, kind: output, shape index: {}]  }
   0x1   :  { %v65_v0 = vld [vmem:[%s3750_s1 + $0xf8] sm:$0xff]  ;;  %v64_v2 = vld [vmem:[%s3750_s1 + $0xf0] sm:$0xff]  ;;  %v63_v6 = vld [vmem:[%s3750_s1 + $0xe8] sm:$0xff]  ;;  %v450_v28 = vunpack.c.l.s4 %v2308_v27 }
   0x2   :  { %v49_v1 = vld [vmem:[%s3750_s1 + $0x78] sm:$0xff]  ;;  %1700 = vmatprep.subr.mxu0 %v65_v0  ;;  %v48_v4 = vld [vmem:[%s3750_s1 + $0x70] sm:$0xff]  ;;  %v47_v8 = vld [vmem:[%s3750_s1 + $0x68] sm:$0xff]  ;;  %v453_v39 = vshrl.u32 %v452_v29, 7 }
   0x3   :  { %v97_v3 = vld [vmem:[%s3750_s1 + $0x1f8] sm:$0xff]  ;;  %1701 = vmatpush3.msra.mxu0 %v49_v1  ;;  %v96_v7 = vld [vmem:[%s3750_s1 + $0x1f0] sm:$0xff]  ;;  %v95_v10 = vld [vmem:[%s3750_s1 + $0x1e8] sm:$0xff]  ;;  %v451_v38 = vunpack.c.0.s8 %v450_v28 }
   0x4   :  { %v81_v5 = vld [vmem:[%s3750_s1 + $0x178] sm:$0xff]  ;;  %1735 = vmatprep.subr.mxu1 %v97_v3  ;;  %1702 = vmatprep.subr.mxu0 %v64_v2  ;;  %v80_v9 = vld [vmem:[%s3750_s1 + $0x170] sm:$0xff]  ;;  %v62_v11 = vld [vmem:[%s3750_s1 + $0xe0] sm:$0xff] }
   0x5   :  { %1736 = vmatpush3.msra.mxu1 %v81_v5  ;;  %1703 = vmatpush3.msra.mxu0 %v48_v4  ;;  %v79_v12 = vld [vmem:[%s3750_s1 + $0x168] sm:$0xff]  ;;  %v46_v13 = vld [vmem:[%s3750_s1 + $0x60] sm:$0xff]  ;;  %v61_v15 = vld [vmem:[%s3750_s1 + $0xd8] sm:$0xff]  ;;  %v2481_v48 = vsub.s32 %v451_v38, %v453_v39 }
   0x6   :  { %1737 = vmatprep.subr.mxu1 %v96_v7  ;;  %1704 = vmatprep.subr.mxu0 %v63_v6  ;;  %v94_v14 = vld [vmem:[%s3750_s1 + $0x1e0] sm:$0xff]  ;;  %v45_v17 = vld [vmem:[%s3750_s1 + $0x58] sm:$0xff]  ;;  %v60_v19 = vld [vmem:[%s3750_s1 + $0xd0] sm:$0xff] }
   0x7   :  { %1738 = vmatpush3.msra.mxu1 %v80_v9  ;;  %1705 = vmatpush3.msra.mxu0 %v47_v8  ;;  %v78_v16 = vld [vmem:[%s3750_s1 + $0x160] sm:$0xff]  ;;  %v93_v18 = vld [vmem:[%s3750_s1 + $0x1d8] sm:$0xff]  ;;  %v44_v21 = vld [vmem:[%s3750_s1 + $0x50] sm:$0xff] }
   0x8   :  { %1739 = vmatprep.subr.mxu1 %v95_v10  ;;  %1706 = vmatprep.subr.mxu0 %v62_v11  ;;  %v77_v20 = vld [vmem:[%s3750_s1 + $0x158] sm:$0xff]  ;;  %v92_v22 = vld [vmem:[%s3750_s1 + $0x1d0] sm:$0xff]  ;;  %v59_v23 = vld [vmem:[%s3750_s1 + $0xc8] sm:$0xff] }
   0x9   :  { %1740 = vmatpush3.msra.mxu1 %v79_v12  ;;  %1707 = vmatpush3.msra.mxu0 %v46_v13  ;;  %v76_v24 = vld [vmem:[%s3750_s1 + $0x150] sm:$0xff]  ;;  %v43_v25 = vld [vmem:[%s3750_s1 + $0x48] sm:$0xff]  ;;  %v58_v30 = vld [vmem:[%s3750_s1 + $0xc0] sm:$0xff] }
   0xa   :  { %1741 = vmatprep.subr.mxu1 %v94_v14  ;;  %1708 = vmatprep.subr.mxu0 %v61_v15  ;;  %v91_v26 = vld [vmem:[%s3750_s1 + $0x1c8] sm:$0xff]  ;;  %v42_v32 = vld [vmem:[%s3750_s1 + $0x40] sm:$0xff]  ;;  %v57_v34 = vld [vmem:[%s3750_s1 + $0xb8] sm:$0xff] }
   0xb   :  { %1742 = vmatpush3.msra.mxu1 %v78_v16  ;;  %1709 = vmatpush3.msra.mxu0 %v45_v17  ;;  %v75_v31 = vld [vmem:[%s3750_s1 + $0x148] sm:$0xff]  ;;  %v90_v33 = vld [vmem:[%s3750_s1 + $0x1c0] sm:$0xff]  ;;  %v41_v36 = vld [vmem:[%s3750_s1 + $0x38] sm:$0xff] }
   0xc   :  { %1743 = vmatprep.subr.mxu1 %v93_v18  ;;  %1710 = vmatprep.subr.mxu0 %v60_v19  ;;  %v74_v35 = vld [vmem:[%s3750_s1 + $0x140] sm:$0xff]  ;;  %v89_v37 = vld [vmem:[%s3750_s1 + $0x1b8] sm:$0xff]  ;;  %v56_v40 = vld [vmem:[%s3750_s1 + $0xb0] sm:$0xff] }
   0xd   :  { %1744 = vmatpush3.msra.mxu1 %v77_v20  ;;  %1711 = vmatpush3.msra.mxu0 %v44_v21  ;;  %v73_v41 = vld [vmem:[%s3750_s1 + $0x138] sm:$0xff]  ;;  %v40_v42 = vld [vmem:[%s3750_s1 + $0x30] sm:$0xff]  ;;  %v55_v44 = vld [vmem:[%s3750_s1 + $0xa8] sm:$0xff] }
   0xe   :  { %1745 = vmatprep.subr.mxu1 %v92_v22  ;;  %1712 = vmatprep.subr.mxu0 %v59_v23  ;;  %v88_v43 = vld [vmem:[%s3750_s1 + $0x1b0] sm:$0xff]  ;;  %v39_v46 = vld [vmem:[%s3750_s1 + $0x28] sm:$0xff]  ;;  %v54_v49 = vld [vmem:[%s3750_s1 + $0xa0] sm:$0xff] }
   0xf   :  { %1746 = vmatpush3.msra.mxu1 %v76_v24  ;;  %1713 = vmatpush3.msra.mxu0 %v43_v25  ;;  %v72_v45 = vld [vmem:[%s3750_s1 + $0x130] sm:$0xff]  ;;  %v87_v47 = vld [vmem:[%s3750_s1 + $0x1a8] sm:$0xff]  ;;  %v27_v51 = vld [vmem:[%s3749_s0] sm:$0xff] }
  0x10   :  { %1747 = vmatprep.subr.mxu1 %v91_v26  ;;  %1714 = vmatprep.subr.mxu0 %v58_v30  ;;  %v71_v50 = vld [vmem:[%s3750_s1 + $0x128] sm:$0xff]  ;;  %v38_v52 = vld [vmem:[%s3750_s1 + $0x20] sm:$0xff]  ;;  %v53_v54 = vld [vmem:[%s3750_s1 + $0x98] sm:$0xff]  ;;  %v455_v58 = vrot.slane %v27_v51, %v2481_v48  ;;  %v448_v59 = vcombine.high %v27_v51, %v27_v51 }
  0x11   :  { %1748 = vmatpush3.msra.mxu1 %v75_v31  ;;  %1715 = vmatpush3.msra.mxu0 %v42_v32  ;;  %v86_v53 = vld [vmem:[%s3750_s1 + $0x1a0] sm:$0xff]  ;;  %v37_v56 = vld [vmem:[%s3750_s1 + $0x18] sm:$0xff]  ;;  %v52_v60 = vld [vmem:[%s3750_s1 + $0x90] sm:$0xff] }
  0x12   :  { %1749 = vmatprep.subr.mxu1 %v90_v33  ;;  %1716 = vmatprep.subr.mxu0 %v57_v34  ;;  %v70_v55 = vld [vmem:[%s3750_s1 + $0x120] sm:$0xff]  ;;  %v85_v57 = vld [vmem:[%s3750_s1 + $0x198] sm:$0xff]  ;;  %v36_v62 = vld [vmem:[%s3750_s1 + $0x10] sm:$0xff]  ;;  %v463_v4 = vcombine.high %v455_v58, %v455_v58  ;;  %v462_v5 = vrot.slane %v448_v59, %v2481_v48 }
  0x13   :  { %1750 = vmatpush3.msra.mxu1 %v74_v35  ;;  %1717 = vmatpush3.msra.mxu0 %v41_v36  ;;  %v69_v61 = vld [vmem:[%s3750_s1 + $0x118] sm:$0xff]  ;;  %v84_v63 = vld [vmem:[%s3750_s1 + $0x190] sm:$0xff]  ;;  %v51_v0 = vld [vmem:[%s3750_s1 + $0x88] sm:$0xff] }
  0x14   :  { %1751 = vmatprep.subr.mxu1 %v89_v37  ;;  %1718 = vmatprep.subr.mxu0 %v56_v40  ;;  %v68_v1 = vld [vmem:[%s3750_s1 + $0x110] sm:$0xff]  ;;  %v35_v2 = vld [vmem:[%s3750_s1 + $0x8] sm:$0xff]  ;;  %v50_v6 = vld [vmem:[%s3750_s1 + $0x80] sm:$0xff]  ;;  %v464_v12 = vcombine.high %v462_v5, %v462_v5 }
  0x15   :  { %1752 = vmatpush3.msra.mxu1 %v73_v41  ;;  %1719 = vmatpush3.msra.mxu0 %v40_v42  ;;  %v83_v3 = vld [vmem:[%s3750_s1 + $0x188] sm:$0xff]  ;;  %v34_v7 = vld [vmem:[%s3750_s1] sm:$0xff]  ;;  %v129_v10 = vld [vmem:[%s3750_s1 + $0x2f8] sm:$0xff] }
  0x16   :  { %1753 = vmatprep.subr.mxu1 %v88_v43  ;;  %1720 = vmatprep.subr.mxu0 %v55_v44  ;;  %v67_v8 = vld [vmem:[%s3750_s1 + $0x108] sm:$0xff]  ;;  %v82_v9 = vld [vmem:[%s3750_s1 + $0x180] sm:$0xff]  ;;  %v113_v13 = vld [vmem:[%s3750_s1 + $0x278] sm:$0xff] }
  0x17   :  { %1754 = vmatpush3.msra.mxu1 %v72_v45  ;;  %1721 = vmatpush3.msra.mxu0 %v39_v46  ;;  %v66_v11 = vld [vmem:[%s3750_s1 + $0x100] sm:$0xff]  ;;  %v128_v14 = vld [vmem:[%s3750_s1 + $0x2f0] sm:$0xff]  ;;  %v161_v15 = vld [vmem:[%s3750_s1 + $0x3f8] sm:$0xff] }
  0x18   :  { %1755 = vmatprep.subr.mxu1 %v87_v47  ;;  %1722 = vmatprep.subr.mxu0 %v54_v49  ;;  %v112_v16 = vld [vmem:[%s3750_s1 + $0x270] sm:$0xff]  ;;  %v145_v17 = vld [vmem:[%s3750_s1 + $0x378] sm:$0xff]  ;;  %v127_v18 = vld [vmem:[%s3750_s1 + $0x2e8] sm:$0xff] }
  0x19   :  { %1756 = vmatpush3.msra.mxu1 %v71_v50  ;;  %1723 = vmatpush3.msra.mxu0 %v38_v52  ;;  %v160_v19 = vld [vmem:[%s3750_s1 + $0x3f0] sm:$0xff]  ;;  %v111_v20 = vld [vmem:[%s3750_s1 + $0x268] sm:$0xff]  ;;  %v126_v22 = vld [vmem:[%s3750_s1 + $0x2e0] sm:$0xff] }
  0x1a   :  { %1757 = vmatprep.subr.mxu1 %v86_v53  ;;  %1724 = vmatprep.subr.mxu0 %v53_v54  ;;  %v144_v21 = vld [vmem:[%s3750_s1 + $0x370] sm:$0xff]  ;;  %v159_v23 = vld [vmem:[%s3750_s1 + $0x3e8] sm:$0xff]  ;;  %v110_v24 = vld [vmem:[%s3750_s1 + $0x260] sm:$0xff] }
  0x1b   :  { %1758 = vmatpush3.msra.mxu1 %v70_v55  ;;  %1725 = vmatpush3.msra.mxu0 %v37_v56  ;;  %v143_v25 = vld [vmem:[%s3750_s1 + $0x368] sm:$0xff]  ;;  %v125_v26 = vld [vmem:[%s3750_s1 + $0x2d8] sm:$0xff]  ;;  %v158_v27 = vld [vmem:[%s3750_s1 + $0x3e0] sm:$0xff] }
  0x1c   :  { %1759 = vmatprep.subr.mxu1 %v85_v57  ;;  %1726 = vmatprep.subr.mxu0 %v52_v60  ;;  %v109_v28 = vld [vmem:[%s3750_s1 + $0x258] sm:$0xff]  ;;  %v142_v29 = vld [vmem:[%s3750_s1 + $0x360] sm:$0xff]  ;;  %v124_v30 = vld [vmem:[%s3750_s1 + $0x2d0] sm:$0xff] }
  0x1d   :  { %1760 = vmatpush3.msra.mxu1 %v69_v61  ;;  %1727 = vmatpush3.msra.mxu0 %v36_v62  ;;  %v157_v31 = vld [vmem:[%s3750_s1 + $0x3d8] sm:$0xff]  ;;  %v108_v32 = vld [vmem:[%s3750_s1 + $0x250] sm:$0xff]  ;;  %v123_v34 = vld [vmem:[%s3750_s1 + $0x2c8] sm:$0xff] }
  0x1e   :  { %1761 = vmatprep.subr.mxu1 %v84_v63  ;;  %1728 = vmatprep.subr.mxu0 %v51_v0  ;;  %v141_v33 = vld [vmem:[%s3750_s1 + $0x358] sm:$0xff]  ;;  %v156_v35 = vld [vmem:[%s3750_s1 + $0x3d0] sm:$0xff]  ;;  %v107_v36 = vld [vmem:[%s3750_s1 + $0x248] sm:$0xff] }
  0x1f   :  { %1762 = vmatpush3.msra.mxu1 %v68_v1  ;;  %1729 = vmatpush3.msra.mxu0 %v35_v2  ;;  %v140_v37 = vld [vmem:[%s3750_s1 + $0x350] sm:$0xff]  ;;  %v122_v38 = vld [vmem:[%s3750_s1 + $0x2c0] sm:$0xff]  ;;  %v155_v39 = vld [vmem:[%s3750_s1 + $0x3c8] sm:$0xff] }
  0x20   :  { %1763 = vmatprep.subr.mxu1 %v83_v3  ;;  %1730 = vmatprep.subr.mxu0 %v50_v6  ;;  %v106_v40 = vld [vmem:[%s3750_s1 + $0x240] sm:$0xff]  ;;  %v139_v41 = vld [vmem:[%s3750_s1 + $0x348] sm:$0xff]  ;;  %v121_v42 = vld [vmem:[%s3750_s1 + $0x2b8] sm:$0xff] }
  0x21   :  { %646 = vmatprep.mubr.f32.mxu0 %v463_v4  ;;  %1731 = vmatpush3.msra.mxu0 %v34_v7  ;;  %v154_v43 = vld [vmem:[%s3750_s1 + $0x3c0] sm:$0xff]  ;;  %v105_v44 = vld [vmem:[%s3750_s1 + $0x238] sm:$0xff]  ;;  %v120_v46 = vld [vmem:[%s3750_s1 + $0x2b0] sm:$0xff] }
  0x22   :  { %1764 = vmatpush3.msra.mxu1 %v67_v8  ;;  %647 = vmatmul.mubr.f32.vlgmr.msra.gmra.mxu0 %v455_v58  ;;  %v138_v45 = vld [vmem:[%s3750_s1 + $0x340] sm:$0xff]  ;;  %v153_v47 = vld [vmem:[%s3750_s1 + $0x3b8] sm:$0xff]  ;;  %v104_v49 = vld [vmem:[%s3750_s1 + $0x230] sm:$0xff] }
  0x23   :  { %1765 = vmatprep.subr.mxu1 %v82_v9  ;;  %1770 = vmatprep.subr.mxu0 %v129_v10  ;;  %v137_v50 = vld [vmem:[%s3750_s1 + $0x338] sm:$0xff]  ;;  %v119_v51 = vld [vmem:[%s3750_s1 + $0x2a8] sm:$0xff]  ;;  %v152_v52 = vld [vmem:[%s3750_s1 + $0x3b0] sm:$0xff] }
  0x24   :  { %1766 = vmatpush3.msra.mxu1 %v66_v11  ;;  %716 = vmatprep.mubr.f32.mxu1 %v464_v12  ;;  %v103_v53 = vld [vmem:[%s3750_s1 + $0x228] sm:$0xff]  ;;  %v136_v54 = vld [vmem:[%s3750_s1 + $0x330] sm:$0xff]  ;;  %v118_v55 = vld [vmem:[%s3750_s1 + $0x2a0] sm:$0xff] }
  0x25   :  { %1771 = vmatpush3.msra.mxu0 %v113_v13  ;;  %717 = vmatmul.mubr.f32.vlgmr.msra.gmra.mxu1 %v462_v5  ;;  %v151_v56 = vld [vmem:[%s3750_s1 + $0x3a8] sm:$0xff]  ;;  %v102_v57 = vld [vmem:[%s3750_s1 + $0x220] sm:$0xff]  ;;  %v117_v60 = vld [vmem:[%s3750_s1 + $0x298] sm:$0xff] }
  0x26   :  { %1772 = vmatprep.subr.mxu0 %v128_v14  ;;  %1805 = vmatprep.subr.mxu1 %v161_v15  ;;  %v28_v58 = vld [vmem:[%s3749_s0 + $0x8] sm:$0xff]  ;;  %v150_v61 = vld [vmem:[%s3750_s1 + $0x3a0] sm:$0xff]  ;;  %v101_v62 = vld [vmem:[%s3750_s1 + $0x218] sm:$0xff] }
  0x27   :  { %1773 = vmatpush3.msra.mxu0 %v112_v16  ;;  %1806 = vmatpush3.msra.mxu1 %v145_v17  ;;  %v135_v59 = vld [vmem:[%s3750_s1 + $0x328] sm:$0xff]  ;;  %v134_v63 = vld [vmem:[%s3750_s1 + $0x320] sm:$0xff]  ;;  %v116_v0 = vld [vmem:[%s3750_s1 + $0x290] sm:$0xff]  ;;  %v465_v1 = vcombine.high %v28_v58, %v28_v58  ;;  %v472_v4 = vrot.slane %v28_v58, %v2481_v48 }
  0x28   :  { %1774 = vmatprep.subr.mxu0 %v127_v18  ;;  %1807 = vmatprep.subr.mxu1 %v160_v19  ;;  %v149_v2 = vld [vmem:[%s3750_s1 + $0x398] sm:$0xff]  ;;  %v100_v3 = vld [vmem:[%s3750_s1 + $0x210] sm:$0xff]  ;;  %v115_v6 = vld [vmem:[%s3750_s1 + $0x288] sm:$0xff] }
  0x29   :  { %1775 = vmatpush3.msra.mxu0 %v111_v20  ;;  %1808 = vmatpush3.msra.mxu1 %v144_v21  ;;  %v133_v5 = vld [vmem:[%s3750_s1 + $0x318] sm:$0xff]  ;;  %v148_v7 = vld [vmem:[%s3750_s1 + $0x390] sm:$0xff]  ;;  %v99_v8 = vld [vmem:[%s3750_s1 + $0x208] sm:$0xff]  ;;  %v479_v11 = vrot.slane %v465_v1, %v2481_v48  ;;  %v480_v14 = vcombine.high %v472_v4, %v472_v4 }
  0x2a   :  { %1776 = vmatprep.subr.mxu0 %v126_v22  ;;  %1809 = vmatprep.subr.mxu1 %v159_v23  ;;  %v132_v9 = vld [vmem:[%s3750_s1 + $0x310] sm:$0xff]  ;;  %v114_v10 = vld [vmem:[%s3750_s1 + $0x280] sm:$0xff]  ;;  %v147_v12 = vld [vmem:[%s3750_s1 + $0x388] sm:$0xff] }
  0x2b   :  { %1777 = vmatpush3.msra.mxu0 %v110_v24  ;;  %1810 = vmatpush3.msra.mxu1 %v143_v25  ;;  %v98_v13 = vld [vmem:[%s3750_s1 + $0x200] sm:$0xff]  ;;  %v131_v15 = vld [vmem:[%s3750_s1 + $0x308] sm:$0xff]  ;;  %v193_v17 = vld [vmem:[%s3750_s1 + $0x4f8] sm:$0xff]  ;;  %v481_v19 = vcombine.high %v479_v11, %v479_v11 }
  0x2c   :  { %1778 = vmatprep.subr.mxu0 %v125_v26  ;;  %1811 = vmatprep.subr.mxu1 %v158_v27  ;;  %v146_v16 = vld [vmem:[%s3750_s1 + $0x380] sm:$0xff]  ;;  %v177_v20 = vld [vmem:[%s3750_s1 + $0x478] sm:$0xff]  ;;  %v192_v21 = vld [vmem:[%s3750_s1 + $0x4f0] sm:$0xff] }
  0x2d   :  { %1779 = vmatpush3.msra.mxu0 %v109_v28  ;;  %1812 = vmatpush3.msra.mxu1 %v142_v29  ;;  %v130_v18 = vld [vmem:[%s3750_s1 + $0x300] sm:$0xff]  ;;  %v225_v22 = vld [vmem:[%s3750_s1 + $0x5f8] sm:$0xff]  ;;  %v176_v23 = vld [vmem:[%s3750_s1 + $0x470] sm:$0xff] }
  0x2e   :  { %1780 = vmatprep.subr.mxu0 %v124_v30  ;;  %1813 = vmatprep.subr.mxu1 %v157_v31  ;;  %v209_v24 = vld [vmem:[%s3750_s1 + $0x578] sm:$0xff]  ;;  %v191_v25 = vld [vmem:[%s3750_s1 + $0x4e8] sm:$0xff]  ;;  %v224_v26 = vld [vmem:[%s3750_s1 + $0x5f0] sm:$0xff] }
  0x2f   :  { %1781 = vmatpush3.msra.mxu0 %v108_v32  ;;  %1814 = vmatpush3.msra.mxu1 %v141_v33  ;;  %v175_v27 = vld [vmem:[%s3750_s1 + $0x468] sm:$0xff]  ;;  %v208_v28 = vld [vmem:[%s3750_s1 + $0x570] sm:$0xff]  ;;  %v190_v29 = vld [vmem:[%s3750_s1 + $0x4e0] sm:$0xff] }
  0x30   :  { %1782 = vmatprep.subr.mxu0 %v123_v34  ;;  %1815 = vmatprep.subr.mxu1 %v156_v35  ;;  %v223_v30 = vld [vmem:[%s3750_s1 + $0x5e8] sm:$0xff]  ;;  %v174_v31 = vld [vmem:[%s3750_s1 + $0x460] sm:$0xff]  ;;  %v189_v33 = vld [vmem:[%s3750_s1 + $0x4d8] sm:$0xff] }
  0x31   :  { %1783 = vmatpush3.msra.mxu0 %v107_v36  ;;  %1816 = vmatpush3.msra.mxu1 %v140_v37  ;;  %v207_v32 = vld [vmem:[%s3750_s1 + $0x568] sm:$0xff]  ;;  %v222_v34 = vld [vmem:[%s3750_s1 + $0x5e0] sm:$0xff]  ;;  %v173_v35 = vld [vmem:[%s3750_s1 + $0x458] sm:$0xff] }
  0x32   :  { %1784 = vmatprep.subr.mxu0 %v122_v38  ;;  %1817 = vmatprep.subr.mxu1 %v155_v39  ;;  %v206_v36 = vld [vmem:[%s3750_s1 + $0x560] sm:$0xff]  ;;  %v188_v37 = vld [vmem:[%s3750_s1 + $0x4d0] sm:$0xff]  ;;  %v221_v38 = vld [vmem:[%s3750_s1 + $0x5d8] sm:$0xff] }
  0x33   :  { %1785 = vmatpush3.msra.mxu0 %v106_v40  ;;  %1818 = vmatpush3.msra.mxu1 %v139_v41  ;;  %v172_v39 = vld [vmem:[%s3750_s1 + $0x450] sm:$0xff]  ;;  %v205_v40 = vld [vmem:[%s3750_s1 + $0x558] sm:$0xff]  ;;  %v187_v41 = vld [vmem:[%s3750_s1 + $0x4c8] sm:$0xff] }
  0x34   :  { %1786 = vmatprep.subr.mxu0 %v121_v42  ;;  %1819 = vmatprep.subr.mxu1 %v154_v43  ;;  %v220_v42 = vld [vmem:[%s3750_s1 + $0x5d0] sm:$0xff]  ;;  %v171_v43 = vld [vmem:[%s3750_s1 + $0x448] sm:$0xff] }
  0x35   :  { %1787 = vmatpush3.msra.mxu0 %v105_v44  ;;  %1820 = vmatpush3.msra.mxu1 %v138_v45  ;;  %v204_v44 = vld [vmem:[%s3750_s1 + $0x550] sm:$0xff]  ;;  %v186_v45 = vld [vmem:[%s3750_s1 + $0x4c0] sm:$0xff]  ;;  %v183_v58 = vld [vmem:[%s3750_s1 + $0x4a8] sm:$0xff] }
  0x36   :  { %1788 = vmatprep.subr.mxu0 %v120_v46  ;;  %1821 = vmatprep.subr.mxu1 %v153_v47  ;;  %v219_v46 = vld [vmem:[%s3750_s1 + $0x5c8] sm:$0xff]  ;;  %v170_v47 = vld [vmem:[%s3750_s1 + $0x440] sm:$0xff]  ;;  %v29_v1 = vld [vmem:[%s3749_s0 + $0x10] sm:$0xff] }
  0x37   :  { %1789 = vmatpush3.msra.mxu0 %v104_v49  ;;  %1822 = vmatpush3.msra.mxu1 %v137_v50  ;;  %v203_v49 = vld [vmem:[%s3750_s1 + $0x548] sm:$0xff]  ;;  %v185_v50 = vld [vmem:[%s3750_s1 + $0x4b8] sm:$0xff] }
  0x38   :  { %1790 = vmatprep.subr.mxu0 %v119_v51  ;;  %1823 = vmatprep.subr.mxu1 %v152_v52  ;;  %v218_v51 = vld [vmem:[%s3750_s1 + $0x5c0] sm:$0xff]  ;;  %v169_v52 = vld [vmem:[%s3750_s1 + $0x438] sm:$0xff] }
  0x39   :  { %1791 = vmatpush3.msra.mxu0 %v103_v53  ;;  %1824 = vmatpush3.msra.mxu1 %v136_v54  ;;  %v202_v53 = vld [vmem:[%s3750_s1 + $0x540] sm:$0xff]  ;;  %v184_v54 = vld [vmem:[%s3750_s1 + $0x4b0] sm:$0xff] }
  0x3a   :  { %1792 = vmatprep.subr.mxu0 %v118_v55  ;;  %1825 = vmatprep.subr.mxu1 %v151_v56  ;;  %v217_v55 = vld [vmem:[%s3750_s1 + $0x5b8] sm:$0xff]  ;;  %v168_v56 = vld [vmem:[%s3750_s1 + $0x430] sm:$0xff] }
  0x3b   :  { %1793 = vmatpush3.msra.mxu0 %v102_v57  ;;  %1826 = vmatpush3.msra.mxu1 %v135_v59  ;;  %v201_v57 = vld [vmem:[%s3750_s1 + $0x538] sm:$0xff]  ;;  %v216_v59 = vld [vmem:[%s3750_s1 + $0x5b0] sm:$0xff] }
  0x3c   :  { %1794 = vmatprep.subr.mxu0 %v117_v60  ;;  %1827 = vmatprep.subr.mxu1 %v150_v61  ;;  %v167_v60 = vld [vmem:[%s3750_s1 + $0x428] sm:$0xff]  ;;  %v200_v61 = vld [vmem:[%s3750_s1 + $0x530] sm:$0xff] }
  0x3d   :  { %1795 = vmatpush3.msra.mxu0 %v101_v62  ;;  %1828 = vmatpush3.msra.mxu1 %v134_v63  ;;  %v182_v62 = vld [vmem:[%s3750_s1 + $0x4a0] sm:$0xff]  ;;  %v215_v63 = vld [vmem:[%s3750_s1 + $0x5a8] sm:$0xff] }
  0x3e   :  { %1796 = vmatprep.subr.mxu0 %v116_v0  ;;  %1829 = vmatprep.subr.mxu1 %v149_v2  ;;  %v166_v0 = vld [vmem:[%s3750_s1 + $0x420] sm:$0xff]  ;;  %v199_v2 = vld [vmem:[%s3750_s1 + $0x528] sm:$0xff] }
  0x3f   :  { %1797 = vmatpush3.msra.mxu0 %v100_v3  ;;  %1830 = vmatpush3.msra.mxu1 %v133_v5  ;;  %v181_v3 = vld [vmem:[%s3750_s1 + $0x498] sm:$0xff] }
  0x40   :  { %1798 = vmatprep.subr.mxu0 %v115_v6  ;;  %1831 = vmatprep.subr.mxu1 %v148_v7  ;;  %v165_v5 = vld [vmem:[%s3750_s1 + $0x418] sm:$0xff]  ;;  %v198_v6 = vld [vmem:[%s3750_s1 + $0x520] sm:$0xff]  ;;  %v180_v7 = vld [vmem:[%s3750_s1 + $0x490] sm:$0xff] }
  0x41   :  { %1799 = vmatpush3.msra.mxu0 %v99_v8  ;;  %1832 = vmatpush3.msra.mxu1 %v132_v9  ;;  %v482_v8 = vcombine.high %v29_v1, %v29_v1  ;;  %v213_v9 = vld [vmem:[%s3750_s1 + $0x598] sm:$0xff] }
  0x42   :  { %1800 = vmatprep.subr.mxu0 %v114_v10  ;;  %1833 = vmatprep.subr.mxu1 %v147_v12  ;;  %v164_v10 = vld [vmem:[%s3750_s1 + $0x410] sm:$0xff]  ;;  %v197_v12 = vld [vmem:[%s3750_s1 + $0x518] sm:$0xff] }
  0x43   :  { %1801 = vmatpush3.msra.mxu0 %v98_v13  ;;  %786 = vmatprep.mubr.f32.mxu0 %v480_v14  ;;  %v179_v13 = vld [vmem:[%s3750_s1 + $0x488] sm:$0xff]  ;;  %v212_v14 = vld [vmem:[%s3750_s1 + $0x590] sm:$0xff] }
  0x44   :  { %1834 = vmatpush3.msra.mxu1 %v131_v15  ;;  %787 = vmatmul.mubr.f32.vlgmr.msra.gmra.mxu0 %v472_v4  ;;  %v214_v4 = vld [vmem:[%s3750_s1 + $0x5a0] sm:$0xff]  ;;  %v163_v15 = vld [vmem:[%s3750_s1 + $0x408] sm:$0xff] }
  0x45   :  { %1835 = vmatprep.subr.mxu1 %v146_v16  ;;  %1840 = vmatprep.subr.mxu0 %v193_v17  ;;  %v196_v16 = vld [vmem:[%s3750_s1 + $0x510] sm:$0xff]  ;;  %v178_v17 = vld [vmem:[%s3750_s1 + $0x480] sm:$0xff] }
  0x46   :  { %1836 = vmatpush3.msra.mxu1 %v130_v18  ;;  %856 = vmatprep.mubr.f32.mxu1 %v481_v19  ;;  %v496_v18 = vrot.slane %v482_v8, %v2481_v48  ;;  %v211_v19 = vld [vmem:[%s3750_s1 + $0x588] sm:$0xff]  ;;  %v30_v8 = vld [vmem:[%s3749_s0 + $0x18] sm:$0xff] }
  0x47   :  { %1841 = vmatpush3.msra.mxu0 %v177_v20  ;;  %857 = vmatmul.mubr.f32.vlgmr.msra.gmra.mxu1 %v479_v11  ;;  %v489_v11 = vrot.slane %v29_v1, %v2481_v48  ;;  %v162_v20 = vld [vmem:[%s3750_s1 + $0x400] sm:$0xff]  ;;  %v247_v1 = vld [vmem:[%s3750_s1 + $0x6a8] sm:$0xff] }
  0x48   :  { %1842 = vmatprep.subr.mxu0 %v192_v21  ;;  %1875 = vmatprep.subr.mxu1 %v225_v22  ;;  %v195_v22 = vld [vmem:[%s3750_s1 + $0x508] sm:$0xff] }
  0x49   :  { %1843 = vmatpush3.msra.mxu0 %v176_v23  ;;  %1876 = vmatpush3.msra.mxu1 %v209_v24  ;;  %v497_v21 = vcombine.high %v489_v11, %v489_v11  ;;  %v210_v23 = vld [vmem:[%s3750_s1 + $0x580] sm:$0xff]  ;;  %v257_v24 = vld [vmem:[%s3750_s1 + $0x6f8] sm:$0xff] }
  0x4a   :  { %1844 = vmatprep.subr.mxu0 %v191_v25  ;;  %1877 = vmatprep.subr.mxu1 %v224_v26  ;;  %v194_v25 = vld [vmem:[%s3750_s1 + $0x500] sm:$0xff]  ;;  %v498_v26 = vcombine.high %v496_v18, %v496_v18 }
  0x4b   :  { %1845 = vmatpush3.msra.mxu0 %v175_v27  ;;  %1878 = vmatpush3.msra.mxu1 %v208_v28  ;;  %v241_v27 = vld [vmem:[%s3750_s1 + $0x678] sm:$0xff]  ;;  %v256_v28 = vld [vmem:[%s3750_s1 + $0x6f0] sm:$0xff] }
  0x4c   :  { %1846 = vmatprep.subr.mxu0 %v190_v29  ;;  %1879 = vmatprep.subr.mxu1 %v223_v30  ;;  %v289_v29 = vld [vmem:[%s3750_s1 + $0x7f8] sm:$0xff]  ;;  %v240_v30 = vld [vmem:[%s3750_s1 + $0x670] sm:$0xff] }
  0x4d   :  { %1847 = vmatpush3.msra.mxu0 %v174_v31  ;;  %1880 = vmatpush3.msra.mxu1 %v207_v32  ;;  %v273_v31 = vld [vmem:[%s3750_s1 + $0x778] sm:$0xff]  ;;  %v255_v32 = vld [vmem:[%s3750_s1 + $0x6e8] sm:$0xff] }
  0x4e   :  { %1848 = vmatprep.subr.mxu0 %v189_v33  ;;  %1881 = vmatprep.subr.mxu1 %v222_v34  ;;  %v288_v33 = vld [vmem:[%s3750_s1 + $0x7f0] sm:$0xff]  ;;  %v239_v34 = vld [vmem:[%s3750_s1 + $0x668] sm:$0xff] }
  0x4f   :  { %1849 = vmatpush3.msra.mxu0 %v173_v35  ;;  %1882 = vmatpush3.msra.mxu1 %v206_v36  ;;  %v272_v35 = vld [vmem:[%s3750_s1 + $0x770] sm:$0xff]  ;;  %v254_v36 = vld [vmem:[%s3750_s1 + $0x6e0] sm:$0xff] }
  0x50   :  { %1850 = vmatprep.subr.mxu0 %v188_v37  ;;  %1883 = vmatprep.subr.mxu1 %v221_v38  ;;  %v287_v37 = vld [vmem:[%s3750_s1 + $0x7e8] sm:$0xff]  ;;  %v238_v38 = vld [vmem:[%s3750_s1 + $0x660] sm:$0xff] }
  0x51   :  { %1851 = vmatpush3.msra.mxu0 %v172_v39  ;;  %1884 = vmatpush3.msra.mxu1 %v205_v40  ;;  %v271_v39 = vld [vmem:[%s3750_s1 + $0x768] sm:$0xff]  ;;  %v253_v40 = vld [vmem:[%s3750_s1 + $0x6d8] sm:$0xff] }
  0x52   :  { %1852 = vmatprep.subr.mxu0 %v187_v41  ;;  %1885 = vmatprep.subr.mxu1 %v220_v42  ;;  %v286_v41 = vld [vmem:[%s3750_s1 + $0x7e0] sm:$0xff]  ;;  %v237_v42 = vld [vmem:[%s3750_s1 + $0x658] sm:$0xff] }
  0x53   :  { %1853 = vmatpush3.msra.mxu0 %v171_v43  ;;  %1886 = vmatpush3.msra.mxu1 %v204_v44  ;;  %v270_v43 = vld [vmem:[%s3750_s1 + $0x760] sm:$0xff]  ;;  %v252_v44 = vld [vmem:[%s3750_s1 + $0x6d0] sm:$0xff] }
  0x54   :  { %1854 = vmatprep.subr.mxu0 %v186_v45  ;;  %1887 = vmatprep.subr.mxu1 %v219_v46  ;;  %v285_v45 = vld [vmem:[%s3750_s1 + $0x7d8] sm:$0xff]  ;;  %v236_v46 = vld [vmem:[%s3750_s1 + $0x650] sm:$0xff] }
  0x55   :  { %1855 = vmatpush3.msra.mxu0 %v170_v47  ;;  %1888 = vmatpush3.msra.mxu1 %v203_v49  ;;  %v269_v47 = vld [vmem:[%s3750_s1 + $0x758] sm:$0xff]  ;;  %v251_v49 = vld [vmem:[%s3750_s1 + $0x6c8] sm:$0xff] }
  0x56   :  { %1856 = vmatprep.subr.mxu0 %v185_v50  ;;  %1889 = vmatprep.subr.mxu1 %v218_v51  ;;  %v284_v50 = vld [vmem:[%s3750_s1 + $0x7d0] sm:$0xff]  ;;  %v235_v51 = vld [vmem:[%s3750_s1 + $0x648] sm:$0xff] }
  0x57   :  { %1857 = vmatpush3.msra.mxu0 %v169_v52  ;;  %1890 = vmatpush3.msra.mxu1 %v202_v53  ;;  %v268_v52 = vld [vmem:[%s3750_s1 + $0x750] sm:$0xff]  ;;  %v250_v53 = vld [vmem:[%s3750_s1 + $0x6c0] sm:$0xff] }
  0x58   :  { %1858 = vmatprep.subr.mxu0 %v184_v54  ;;  %1891 = vmatprep.subr.mxu1 %v217_v55  ;;  %v283_v54 = vld [vmem:[%s3750_s1 + $0x7c8] sm:$0xff]  ;;  %v234_v55 = vld [vmem:[%s3750_s1 + $0x640] sm:$0xff] }
  0x59   :  { %1859 = vmatpush3.msra.mxu0 %v168_v56  ;;  %1892 = vmatpush3.msra.mxu1 %v201_v57  ;;  %v267_v56 = vld [vmem:[%s3750_s1 + $0x748] sm:$0xff]  ;;  %v249_v57 = vld [vmem:[%s3750_s1 + $0x6b8] sm:$0xff] }
  0x5a   :  { %1860 = vmatprep.subr.mxu0 %v183_v58  ;;  %1893 = vmatprep.subr.mxu1 %v216_v59  ;;  %v282_v58 = vld [vmem:[%s3750_s1 + $0x7c0] sm:$0xff]  ;;  %v233_v59 = vld [vmem:[%s3750_s1 + $0x638] sm:$0xff] }
  0x5b   :  { %1861 = vmatpush3.msra.mxu0 %v167_v60  ;;  %1894 = vmatpush3.msra.mxu1 %v200_v61  ;;  %v266_v60 = vld [vmem:[%s3750_s1 + $0x740] sm:$0xff]  ;;  %v248_v61 = vld [vmem:[%s3750_s1 + $0x6b0] sm:$0xff] }
  0x5c   :  { %1862 = vmatprep.subr.mxu0 %v182_v62  ;;  %1895 = vmatprep.subr.mxu1 %v215_v63  ;;  %v281_v62 = vld [vmem:[%s3750_s1 + $0x7b8] sm:$0xff]  ;;  %v232_v63 = vld [vmem:[%s3750_s1 + $0x630] sm:$0xff] }
  0x5d   :  { %1863 = vmatpush3.msra.mxu0 %v166_v0  ;;  %1896 = vmatpush3.msra.mxu1 %v199_v2  ;;  %v265_v0 = vld [vmem:[%s3750_s1 + $0x738] sm:$0xff]  ;;  %v280_v2 = vld [vmem:[%s3750_s1 + $0x7b0] sm:$0xff] }
  0x5e   :  { %1864 = vmatprep.subr.mxu0 %v181_v3  ;;  %1897 = vmatprep.subr.mxu1 %v214_v4  ;;  %v231_v3 = vld [vmem:[%s3750_s1 + $0x628] sm:$0xff]  ;;  %v264_v4 = vld [vmem:[%s3750_s1 + $0x730] sm:$0xff] }
  0x5f   :  { %1865 = vmatpush3.msra.mxu0 %v165_v5  ;;  %1898 = vmatpush3.msra.mxu1 %v198_v6  ;;  %v246_v5 = vld [vmem:[%s3750_s1 + $0x6a0] sm:$0xff]  ;;  %v279_v6 = vld [vmem:[%s3750_s1 + $0x7a8] sm:$0xff] }
  0x60   :  { %1866 = vmatprep.subr.mxu0 %v180_v7  ;;  %1899 = vmatprep.subr.mxu1 %v213_v9  ;;  %v230_v7 = vld [vmem:[%s3750_s1 + $0x620] sm:$0xff]  ;;  %v263_v9 = vld [vmem:[%s3750_s1 + $0x728] sm:$0xff] }
  0x61   :  { %1867 = vmatpush3.msra.mxu0 %v164_v10  ;;  %1900 = vmatpush3.msra.mxu1 %v197_v12  ;;  %v245_v10 = vld [vmem:[%s3750_s1 + $0x698] sm:$0xff] }
  0x62   :  { %1868 = vmatprep.subr.mxu0 %v179_v13  ;;  %1901 = vmatprep.subr.mxu1 %v212_v14  ;;  %v229_v12 = vld [vmem:[%s3750_s1 + $0x618] sm:$0xff]  ;;  %v262_v13 = vld [vmem:[%s3750_s1 + $0x720] sm:$0xff]  ;;  %v244_v14 = vld [vmem:[%s3750_s1 + $0x690] sm:$0xff] }
  0x63   :  { %1869 = vmatpush3.msra.mxu0 %v163_v15  ;;  %1902 = vmatpush3.msra.mxu1 %v196_v16  ;;  %v499_v15 = vcombine.high %v30_v8, %v30_v8  ;;  %v277_v16 = vld [vmem:[%s3750_s1 + $0x798] sm:$0xff] }
  0x64   :  { %1870 = vmatprep.subr.mxu0 %v178_v17  ;;  %1903 = vmatprep.subr.mxu1 %v211_v19  ;;  %v228_v17 = vld [vmem:[%s3750_s1 + $0x610] sm:$0xff]  ;;  %v261_v19 = vld [vmem:[%s3750_s1 + $0x718] sm:$0xff] }
  0x65   :  { %1871 = vmatpush3.msra.mxu0 %v162_v20  ;;  %926 = vmatprep.mubr.f32.mxu0 %v497_v21  ;;  %v243_v20 = vld [vmem:[%s3750_s1 + $0x688] sm:$0xff]  ;;  %v276_v21 = vld [vmem:[%s3750_s1 + $0x790] sm:$0xff] }
  0x66   :  { %1904 = vmatpush3.msra.mxu1 %v195_v22  ;;  %927 = vmatmul.mubr.f32.vlgmr.msra.gmra.mxu0 %v489_v11  ;;  %v278_v11 = vld [vmem:[%s3750_s1 + $0x7a0] sm:$0xff]  ;;  %v227_v22 = vld [vmem:[%s3750_s1 + $0x608] sm:$0xff] }
  0x67   :  { %1905 = vmatprep.subr.mxu1 %v210_v23  ;;  %1910 = vmatprep.subr.mxu0 %v257_v24  ;;  %v260_v23 = vld [vmem:[%s3750_s1 + $0x710] sm:$0xff]  ;;  %v242_v24 = vld [vmem:[%s3750_s1 + $0x680] sm:$0xff] }
  0x68   :  { %1906 = vmatpush3.msra.mxu1 %v194_v25  ;;  %996 = vmatprep.mubr.f32.mxu1 %v498_v26  ;;  %v513_v25 = vrot.slane %v499_v15, %v2481_v48  ;;  %v275_v26 = vld [vmem:[%s3750_s1 + $0x788] sm:$0xff] }
  0x69   :  { %1911 = vmatpush3.msra.mxu0 %v241_v27  ;;  %997 = vmatmul.mubr.f32.vlgmr.msra.gmra.mxu1 %v496_v18  ;;  %v506_v18 = vrot.slane %v30_v8, %v2481_v48  ;;  %v226_v27 = vld [vmem:[%s3750_s1 + $0x600] sm:$0xff] }
  0x6a   :  { %1912 = vmatprep.subr.mxu0 %v256_v28  ;;  %1945 = vmatprep.subr.mxu1 %v289_v29  ;;  %v259_v29 = vld [vmem:[%s3750_s1 + $0x708] sm:$0xff] }
  0x6b   :  { %1913 = vmatpush3.msra.mxu0 %v240_v30  ;;  %1946 = vmatpush3.msra.mxu1 %v273_v31  ;;  %v514_v28 = vcombine.high %v506_v18, %v506_v18  ;;  %v274_v30 = vld [vmem:[%s3750_s1 + $0x780] sm:$0xff]  ;;  %v321_v31 = vld [vmem:[%s3750_s1 + $0x8f8] sm:$0xff] }
  0x6c   :  { %1914 = vmatprep.subr.mxu0 %v255_v32  ;;  %1947 = vmatprep.subr.mxu1 %v288_v33  ;;  %v258_v32 = vld [vmem:[%s3750_s1 + $0x700] sm:$0xff]  ;;  %v515_v33 = vcombine.high %v513_v25, %v513_v25 }
  0x6d   :  { %1915 = vmatpush3.msra.mxu0 %v239_v34  ;;  %1948 = vmatpush3.msra.mxu1 %v272_v35  ;;  %v305_v34 = vld [vmem:[%s3750_s1 + $0x878] sm:$0xff]  ;;  %v320_v35 = vld [vmem:[%s3750_s1 + $0x8f0] sm:$0xff] }
  0x6e   :  { %1916 = vmatprep.subr.mxu0 %v254_v36  ;;  %1949 = vmatprep.subr.mxu1 %v287_v37  ;;  %v353_v36 = vld [vmem:[%s3750_s1 + $0x9f8] sm:$0xff]  ;;  %v304_v37 = vld [vmem:[%s3750_s1 + $0x870] sm:$0xff] }
  0x6f   :  { %1917 = vmatpush3.msra.mxu0 %v238_v38  ;;  %1950 = vmatpush3.msra.mxu1 %v271_v39 }
  0x70   :  { %1918 = vmatprep.subr.mxu0 %v253_v40  ;;  %1951 = vmatprep.subr.mxu1 %v286_v41 }
  0x71   :  { %1919 = vmatpush3.msra.mxu0 %v237_v42  ;;  %1952 = vmatpush3.msra.mxu1 %v270_v43 }
  0x72   :  { %1920 = vmatprep.subr.mxu0 %v252_v44  ;;  %1953 = vmatprep.subr.mxu1 %v285_v45 }
  0x73   :  { %1921 = vmatpush3.msra.mxu0 %v236_v46  ;;  %1954 = vmatpush3.msra.mxu1 %v269_v47 }
  0x74   :  { %1922 = vmatprep.subr.mxu0 %v251_v49  ;;  %1955 = vmatprep.subr.mxu1 %v284_v50 }
  0x75   :  { %1923 = vmatpush3.msra.mxu0 %v235_v51  ;;  %1956 = vmatpush3.msra.mxu1 %v268_v52 }
  0x76   :  { %1924 = vmatprep.subr.mxu0 %v250_v53  ;;  %1957 = vmatprep.subr.mxu1 %v283_v54 }
  0x77   :  { %1925 = vmatpush3.msra.mxu0 %v234_v55  ;;  %1958 = vmatpush3.msra.mxu1 %v267_v56 }
  0x78   :  { %1926 = vmatprep.subr.mxu0 %v249_v57  ;;  %1959 = vmatprep.subr.mxu1 %v282_v58 }
  0x79   :  { %1927 = vmatpush3.msra.mxu0 %v233_v59  ;;  %1960 = vmatpush3.msra.mxu1 %v266_v60 }
  0x7a   :  { %1928 = vmatprep.subr.mxu0 %v248_v61  ;;  %1961 = vmatprep.subr.mxu1 %v281_v62 }
  0x7b   :  { %1929 = vmatpush3.msra.mxu0 %v232_v63  ;;  %1962 = vmatpush3.msra.mxu1 %v265_v0 }
  0x7c   :  { %1930 = vmatprep.subr.mxu0 %v247_v1  ;;  %1963 = vmatprep.subr.mxu1 %v280_v2 }
  0x7d   :  { %1931 = vmatpush3.msra.mxu0 %v231_v3  ;;  %1964 = vmatpush3.msra.mxu1 %v264_v4 }
  0x7e   :  { %1932 = vmatprep.subr.mxu0 %v246_v5  ;;  %1965 = vmatprep.subr.mxu1 %v279_v6 }
  0x7f   :  { %1933 = vmatpush3.msra.mxu0 %v230_v7  ;;  %1966 = vmatpush3.msra.mxu1 %v263_v9 }
  0x80   :  { %1934 = vmatprep.subr.mxu0 %v245_v10  ;;  %1967 = vmatprep.subr.mxu1 %v278_v11 }
  0x81   :  { %1935 = vmatpush3.msra.mxu0 %v229_v12  ;;  %1968 = vmatpush3.msra.mxu1 %v262_v13 }
  0x82   :  { %1936 = vmatprep.subr.mxu0 %v244_v14  ;;  %1969 = vmatprep.subr.mxu1 %v277_v16 }
  0x83   :  { %1937 = vmatpush3.msra.mxu0 %v228_v17  ;;  %1970 = vmatpush3.msra.mxu1 %v261_v19 }
  0x84   :  { %1938 = vmatprep.subr.mxu0 %v243_v20  ;;  %1971 = vmatprep.subr.mxu1 %v276_v21 }
  0x85   :  { %1939 = vmatpush3.msra.mxu0 %v227_v22  ;;  %1972 = vmatpush3.msra.mxu1 %v260_v23 }
  0x86   :  { %1940 = vmatprep.subr.mxu0 %v242_v24  ;;  %1973 = vmatprep.subr.mxu1 %v275_v26 }
  0x87   :  { %1941 = vmatpush3.msra.mxu0 %v226_v27  ;;  %1066 = vmatprep.mubr.f32.mxu0 %v514_v28 }
  0x88   :  { %1974 = vmatpush3.msra.mxu1 %v259_v29  ;;  %1067 = vmatmul.mubr.f32.vlgmr.msra.gmra.mxu0 %v506_v18 }
  0x89   :  { %1975 = vmatprep.subr.mxu1 %v274_v30  ;;  %1980 = vmatprep.subr.mxu0 %v321_v31 }
  0x8a   :  { %1976 = vmatpush3.msra.mxu1 %v258_v32 }
  0x8b   :  { %12 = vsyncpa [#allocation3], 0  ;;  %1136 = vmatprep.mubr.f32.mxu1 %v515_v33  ;;  %1981 = vmatpush3.msra.mxu0 %v305_v34  ;;  %v337_v38 = vld [vmem:[%s3750_s1 + $0x978] sm:$0xff]  ;;  %v319_v39 = vld [vmem:[%s3750_s1 + $0x8e8] sm:$0xff]  ;;  %vm2310_vm0 = vmmov 0   ;;  %s2311_s25 = smov [#allocation2]  }
  0x8c   :  { %1137 = vmatmul.mubr.f32.vlgmr.msra.gmra.mxu1 %v513_v25  ;;  %1982 = vmatprep.subr.mxu0 %v320_v35  ;;  %v352_v40 = vld [vmem:[%s3750_s1 + $0x9f0] sm:$0xff]  ;;  %v303_v41 = vld [vmem:[%s3750_s1 + $0x868] sm:$0xff]  ;;  %v318_v43 = vld [vmem:[%s3750_s1 + $0x8e0] sm:$0xff]  ;;  %s1688_s26 = sshll.u32 %s2311_s25, 4  ;;  %vm1680_vm1 = vcmask 74752   ;;  %s1689_s26 = int_to_ptr.vmem [resolvable:$true] %s1688_s26 }
  0x8d   :  { %2015 = vmatprep.subr.mxu1 %v353_v36  ;;  %1983 = vmatpush3.msra.mxu0 %v304_v37  ;;  %v336_v42 = vld [vmem:[%s3750_s1 + $0x970] sm:$0xff]  ;;  %v351_v44 = vld [vmem:[%s3750_s1 + $0x9e8] sm:$0xff]  ;;  %v302_v45 = vld [vmem:[%s3750_s1 + $0x860] sm:$0xff]  ;;  %p2291_p1 = scmp.lt.s32.totalorder %s1689_s26, %s1689_s26 }
  0x8e   :  { %2016 = vmatpush3.msra.mxu1 %v337_v38  ;;  %1984 = vmatprep.subr.mxu0 %v319_v39  ;;  %v335_v46 = vld [vmem:[%s3750_s1 + $0x968] sm:$0xff]  ;;  %v317_v47 = vld [vmem:[%s3750_s1 + $0x8d8] sm:$0xff]  ;;  %v350_v49 = vld [vmem:[%s3750_s1 + $0x9e0] sm:$0xff] }
  0x8f   :  { %2017 = vmatprep.subr.mxu1 %v352_v40  ;;  %1985 = vmatpush3.msra.mxu0 %v303_v41  ;;  %v301_v50 = vld [vmem:[%s3750_s1 + $0x858] sm:$0xff]  ;;  %v334_v51 = vld [vmem:[%s3750_s1 + $0x960] sm:$0xff]  ;;  %v316_v52 = vld [vmem:[%s3750_s1 + $0x8d0] sm:$0xff] }
  0x90   :  { %2018 = vmatpush3.msra.mxu1 %v336_v42  ;;  %1986 = vmatprep.subr.mxu0 %v318_v43  ;;  %v349_v53 = vld [vmem:[%s3750_s1 + $0x9d8] sm:$0xff]  ;;  %v300_v54 = vld [vmem:[%s3750_s1 + $0x850] sm:$0xff]  ;;  %v315_v56 = vld [vmem:[%s3750_s1 + $0x8c8] sm:$0xff] }
  0x91   :  { %2019 = vmatprep.subr.mxu1 %v351_v44  ;;  %1987 = vmatpush3.msra.mxu0 %v302_v45  ;;  %v333_v55 = vld [vmem:[%s3750_s1 + $0x958] sm:$0xff]  ;;  %v348_v57 = vld [vmem:[%s3750_s1 + $0x9d0] sm:$0xff]  ;;  %v299_v58 = vld [vmem:[%s3750_s1 + $0x848] sm:$0xff] }
  0x92   :  { %2020 = vmatpush3.msra.mxu1 %v335_v46  ;;  %1988 = vmatprep.subr.mxu0 %v317_v47  ;;  %v332_v59 = vld [vmem:[%s3750_s1 + $0x950] sm:$0xff]  ;;  %v314_v60 = vld [vmem:[%s3750_s1 + $0x8c0] sm:$0xff]  ;;  %v347_v61 = vld [vmem:[%s3750_s1 + $0x9c8] sm:$0xff] }
  0x93   :  { %2021 = vmatprep.subr.mxu1 %v350_v49  ;;  %1989 = vmatpush3.msra.mxu0 %v301_v50  ;;  %v298_v62 = vld [vmem:[%s3750_s1 + $0x840] sm:$0xff]  ;;  %v331_v63 = vld [vmem:[%s3750_s1 + $0x948] sm:$0xff]  ;;  %v313_v0 = vld [vmem:[%s3750_s1 + $0x8b8] sm:$0xff] }
  0x94   :  { %2022 = vmatpush3.msra.mxu1 %v334_v51  ;;  %1990 = vmatprep.subr.mxu0 %v316_v52  ;;  %v346_v1 = vld [vmem:[%s3750_s1 + $0x9c0] sm:$0xff]  ;;  %v297_v2 = vld [vmem:[%s3750_s1 + $0x838] sm:$0xff]  ;;  %v312_v4 = vld [vmem:[%s3750_s1 + $0x8b0] sm:$0xff] }
  0x95   :  { %2023 = vmatprep.subr.mxu1 %v349_v53  ;;  %1991 = vmatpush3.msra.mxu0 %v300_v54  ;;  %v330_v3 = vld [vmem:[%s3750_s1 + $0x940] sm:$0xff]  ;;  %v345_v5 = vld [vmem:[%s3750_s1 + $0x9b8] sm:$0xff]  ;;  %v296_v6 = vld [vmem:[%s3750_s1 + $0x830] sm:$0xff] }
  0x96   :  { %2024 = vmatpush3.msra.mxu1 %v333_v55  ;;  %1992 = vmatprep.subr.mxu0 %v315_v56  ;;  %v329_v7 = vld [vmem:[%s3750_s1 + $0x938] sm:$0xff]  ;;  %v311_v8 = vld [vmem:[%s3750_s1 + $0x8a8] sm:$0xff]  ;;  %v344_v9 = vld [vmem:[%s3750_s1 + $0x9b0] sm:$0xff] }
  0x97   :  { %2025 = vmatprep.subr.mxu1 %v348_v57  ;;  %1993 = vmatpush3.msra.mxu0 %v299_v58  ;;  %v295_v10 = vld [vmem:[%s3750_s1 + $0x828] sm:$0xff]  ;;  %v328_v11 = vld [vmem:[%s3750_s1 + $0x930] sm:$0xff]  ;;  %v310_v12 = vld [vmem:[%s3750_s1 + $0x8a0] sm:$0xff] }
  0x98   :  { %2026 = vmatpush3.msra.mxu1 %v332_v59  ;;  %1994 = vmatprep.subr.mxu0 %v314_v60  ;;  %v343_v13 = vld [vmem:[%s3750_s1 + $0x9a8] sm:$0xff]  ;;  %v294_v14 = vld [vmem:[%s3750_s1 + $0x820] sm:$0xff]  ;;  %v309_v17 = vld [vmem:[%s3750_s1 + $0x898] sm:$0xff] }
  0x99   :  { %2027 = vmatprep.subr.mxu1 %v347_v61  ;;  %1995 = vmatpush3.msra.mxu0 %v298_v62  ;;  %v31_v15 = vld [vmem:[%s3749_s0 + $0x20] sm:$0xff]  ;;  %v327_v16 = vld [vmem:[%s3750_s1 + $0x928] sm:$0xff]  ;;  %v293_v19 = vld [vmem:[%s3750_s1 + $0x818] sm:$0xff] }
  0x9a   :  { %2028 = vmatpush3.msra.mxu1 %v331_v63  ;;  %1996 = vmatprep.subr.mxu0 %v313_v0  ;;  %v342_v18 = vld [vmem:[%s3750_s1 + $0x9a0] sm:$0xff]  ;;  %v308_v21 = vld [vmem:[%s3750_s1 + $0x890] sm:$0xff]  ;;  %v516_v22 = vcombine.high %v31_v15, %v31_v15  ;;  %v341_v23 = vld [vmem:[%s3750_s1 + $0x998] sm:$0xff]  ;;  %v523_v25 = vrot.slane %v31_v15, %v2481_v48 }
  0x9b   :  { %2029 = vmatprep.subr.mxu1 %v346_v1  ;;  %1997 = vmatpush3.msra.mxu0 %v297_v2  ;;  %v326_v20 = vld [vmem:[%s3750_s1 + $0x920] sm:$0xff]  ;;  %v292_v24 = vld [vmem:[%s3750_s1 + $0x810] sm:$0xff]  ;;  %v325_v26 = vld [vmem:[%s3750_s1 + $0x918] sm:$0xff] }
  0x9c   :  { %2030 = vmatpush3.msra.mxu1 %v330_v3  ;;  %1998 = vmatprep.subr.mxu0 %v312_v4  ;;  %v307_v27 = vld [vmem:[%s3750_s1 + $0x888] sm:$0xff]  ;;  %v340_v28 = vld [vmem:[%s3750_s1 + $0x990] sm:$0xff]  ;;  %v306_v31 = vld [vmem:[%s3750_s1 + $0x880] sm:$0xff]  ;;  %v530_v32 = vrot.slane %v516_v22, %v2481_v48  ;;  %v531_v35 = vcombine.high %v523_v25, %v523_v25 }
  0x9d   :  { %2031 = vmatprep.subr.mxu1 %v345_v5  ;;  %1999 = vmatpush3.msra.mxu0 %v296_v6  ;;  %v291_v29 = vld [vmem:[%s3750_s1 + $0x808] sm:$0xff]  ;;  %v324_v30 = vld [vmem:[%s3750_s1 + $0x910] sm:$0xff]  ;;  %v290_v34 = vld [vmem:[%s3750_s1 + $0x800] sm:$0xff] }
  0x9e   :  { %2032 = vmatpush3.msra.mxu1 %v329_v7  ;;  %2000 = vmatprep.subr.mxu0 %v311_v8  ;;  %v339_v33 = vld [vmem:[%s3750_s1 + $0x988] sm:$0xff]  ;;  %v338_v37 = vld [vmem:[%s3750_s1 + $0x980] sm:$0xff]  ;;  %v385_v38 = vld [vmem:[%s3750_s1 + $0xaf8] sm:$0xff]  ;;  %v532_v40 = vcombine.high %v530_v32, %v530_v32 }
  0x9f   :  { %2033 = vmatprep.subr.mxu1 %v344_v9  ;;  %2001 = vmatpush3.msra.mxu0 %v295_v10  ;;  %v323_v36 = vld [vmem:[%s3750_s1 + $0x908] sm:$0xff]  ;;  %v322_v39 = vld [vmem:[%s3750_s1 + $0x900] sm:$0xff]  ;;  %v369_v41 = vld [vmem:[%s3750_s1 + $0xa78] sm:$0xff] }
  0xa0   :  { %2034 = vmatpush3.msra.mxu1 %v328_v11  ;;  %2002 = vmatprep.subr.mxu0 %v310_v12  ;;  %v384_v42 = vld [vmem:[%s3750_s1 + $0xaf0] sm:$0xff]  ;;  %v417_v43 = vld [vmem:[%s3750_s1 + $0xbf8] sm:$0xff]  ;;  %v383_v46 = vld [vmem:[%s3750_s1 + $0xae8] sm:$0xff] }
  0xa1   :  { %2035 = vmatprep.subr.mxu1 %v343_v13  ;;  %2003 = vmatpush3.msra.mxu0 %v294_v14  ;;  %v368_v44 = vld [vmem:[%s3750_s1 + $0xa70] sm:$0xff]  ;;  %v401_v45 = vld [vmem:[%s3750_s1 + $0xb78] sm:$0xff]  ;;  %v367_v49 = vld [vmem:[%s3750_s1 + $0xa68] sm:$0xff] }
  0xa2   :  { %2036 = vmatpush3.msra.mxu1 %v327_v16  ;;  %2004 = vmatprep.subr.mxu0 %v309_v17  ;;  %v416_v47 = vld [vmem:[%s3750_s1 + $0xbf0] sm:$0xff]  ;;  %v382_v51 = vld [vmem:[%s3750_s1 + $0xae0] sm:$0xff]  ;;  %v415_v52 = vld [vmem:[%s3750_s1 + $0xbe8] sm:$0xff] }
  0xa3   :  { %2037 = vmatprep.subr.mxu1 %v342_v18  ;;  %2005 = vmatpush3.msra.mxu0 %v293_v19  ;;  %v400_v50 = vld [vmem:[%s3750_s1 + $0xb70] sm:$0xff]  ;;  %v366_v53 = vld [vmem:[%s3750_s1 + $0xa60] sm:$0xff]  ;;  %v399_v54 = vld [vmem:[%s3750_s1 + $0xb68] sm:$0xff] }
  0xa4   :  { %2038 = vmatpush3.msra.mxu1 %v326_v20  ;;  %2006 = vmatprep.subr.mxu0 %v308_v21  ;;  %v381_v55 = vld [vmem:[%s3750_s1 + $0xad8] sm:$0xff]  ;;  %v414_v56 = vld [vmem:[%s3750_s1 + $0xbe0] sm:$0xff]  ;;  %v380_v59 = vld [vmem:[%s3750_s1 + $0xad0] sm:$0xff] }
  0xa5   :  { %2039 = vmatprep.subr.mxu1 %v341_v23  ;;  %2007 = vmatpush3.msra.mxu0 %v292_v24  ;;  %v365_v57 = vld [vmem:[%s3750_s1 + $0xa58] sm:$0xff]  ;;  %v398_v58 = vld [vmem:[%s3750_s1 + $0xb60] sm:$0xff]  ;;  %v364_v61 = vld [vmem:[%s3750_s1 + $0xa50] sm:$0xff] }
  0xa6   :  { %2040 = vmatpush3.msra.mxu1 %v325_v26  ;;  %2008 = vmatprep.subr.mxu0 %v307_v27  ;;  %v413_v60 = vld [vmem:[%s3750_s1 + $0xbd8] sm:$0xff]  ;;  %v379_v63 = vld [vmem:[%s3750_s1 + $0xac8] sm:$0xff]  ;;  %v412_v0 = vld [vmem:[%s3750_s1 + $0xbd0] sm:$0xff] }
  0xa7   :  { %2041 = vmatprep.subr.mxu1 %v340_v28  ;;  %2009 = vmatpush3.msra.mxu0 %v291_v29  ;;  %v397_v62 = vld [vmem:[%s3750_s1 + $0xb58] sm:$0xff]  ;;  %v363_v1 = vld [vmem:[%s3750_s1 + $0xa48] sm:$0xff]  ;;  %v396_v2 = vld [vmem:[%s3750_s1 + $0xb50] sm:$0xff] }
  0xa8   :  { %2042 = vmatpush3.msra.mxu1 %v324_v30  ;;  %2010 = vmatprep.subr.mxu0 %v306_v31  ;;  %v378_v3 = vld [vmem:[%s3750_s1 + $0xac0] sm:$0xff]  ;;  %v411_v4 = vld [vmem:[%s3750_s1 + $0xbc8] sm:$0xff]  ;;  %v377_v7 = vld [vmem:[%s3750_s1 + $0xab8] sm:$0xff] }
  0xa9   :  { %2043 = vmatprep.subr.mxu1 %v339_v33  ;;  %2011 = vmatpush3.msra.mxu0 %v290_v34  ;;  %v362_v5 = vld [vmem:[%s3750_s1 + $0xa40] sm:$0xff]  ;;  %v395_v6 = vld [vmem:[%s3750_s1 + $0xb48] sm:$0xff]  ;;  %v361_v9 = vld [vmem:[%s3750_s1 + $0xa38] sm:$0xff] }
  0xaa   :  { %1206 = vmatprep.mubr.f32.mxu0 %v531_v35  ;;  %2044 = vmatpush3.msra.mxu1 %v323_v36  ;;  %v410_v8 = vld [vmem:[%s3750_s1 + $0xbc0] sm:$0xff]  ;;  %v376_v11 = vld [vmem:[%s3750_s1 + $0xab0] sm:$0xff]  ;;  %v409_v12 = vld [vmem:[%s3750_s1 + $0xbb8] sm:$0xff] }
  0xab   :  { %1207 = vmatmul.mubr.f32.vlgmr.msra.gmra.mxu0 %v523_v25  ;;  %2045 = vmatprep.subr.mxu1 %v338_v37  ;;  %v394_v10 = vld [vmem:[%s3750_s1 + $0xb40] sm:$0xff]  ;;  %v360_v13 = vld [vmem:[%s3750_s1 + $0xa30] sm:$0xff]  ;;  %v393_v14 = vld [vmem:[%s3750_s1 + $0xb38] sm:$0xff] }
  0xac   :  { %2050 = vmatprep.subr.mxu0 %v385_v38  ;;  %2046 = vmatpush3.msra.mxu1 %v322_v39  ;;  %v375_v15 = vld [vmem:[%s3750_s1 + $0xaa8] sm:$0xff]  ;;  %v408_v16 = vld [vmem:[%s3750_s1 + $0xbb0] sm:$0xff]  ;;  %v374_v19 = vld [vmem:[%s3750_s1 + $0xaa0] sm:$0xff] }
  0xad   :  { %1276 = vmatprep.mubr.f32.mxu1 %v532_v40  ;;  %2051 = vmatpush3.msra.mxu0 %v369_v41  ;;  %v359_v17 = vld [vmem:[%s3750_s1 + $0xa28] sm:$0xff]  ;;  %v392_v18 = vld [vmem:[%s3750_s1 + $0xb30] sm:$0xff]  ;;  %v358_v21 = vld [vmem:[%s3750_s1 + $0xa20] sm:$0xff] }
  0xae   :  { %1277 = vmatmul.mubr.f32.vlgmr.msra.gmra.mxu1 %v530_v32  ;;  %2052 = vmatprep.subr.mxu0 %v384_v42  ;;  %v407_v20 = vld [vmem:[%s3750_s1 + $0xba8] sm:$0xff]  ;;  %v373_v24 = vld [vmem:[%s3750_s1 + $0xa98] sm:$0xff]  ;;  %v406_v25 = vld [vmem:[%s3750_s1 + $0xba0] sm:$0xff] }
  0xaf   :  { %2085 = vmatprep.subr.mxu1 %v417_v43  ;;  %2053 = vmatpush3.msra.mxu0 %v368_v44  ;;  %v32_v22 = vld [vmem:[%s3749_s0 + $0x28] sm:$0xff]  ;;  %v357_v26 = vld [vmem:[%s3750_s1 + $0xa18] sm:$0xff]  ;;  %v390_v27 = vld [vmem:[%s3750_s1 + $0xb20] sm:$0xff] }
  0xb0   :  { %2086 = vmatpush3.msra.mxu1 %v401_v45  ;;  %2054 = vmatprep.subr.mxu0 %v383_v46  ;;  %v391_v23 = vld [vmem:[%s3750_s1 + $0xb28] sm:$0xff]  ;;  %v372_v28 = vld [vmem:[%s3750_s1 + $0xa90] sm:$0xff]  ;;  %v533_v29 = vcombine.high %v32_v22, %v32_v22  ;;  %v405_v30 = vld [vmem:[%s3750_s1 + $0xb98] sm:$0xff]  ;;  %v540_v32 = vrot.slane %v32_v22, %v2481_v48 }
  0xb1   :  { %2087 = vmatprep.subr.mxu1 %v416_v47  ;;  %2055 = vmatpush3.msra.mxu0 %v367_v49  ;;  %v356_v31 = vld [vmem:[%s3750_s1 + $0xa10] sm:$0xff]  ;;  %v389_v33 = vld [vmem:[%s3750_s1 + $0xb18] sm:$0xff]  ;;  %v371_v34 = vld [vmem:[%s3750_s1 + $0xa88] sm:$0xff]  ;;  %v2309_v47 = vmov 0.0  }
  0xb2   :  { %2088 = vmatpush3.msra.mxu1 %v400_v50  ;;  %2056 = vmatprep.subr.mxu0 %v382_v51  ;;  %v404_v35 = vld [vmem:[%s3750_s1 + $0xb90] sm:$0xff]  ;;  %v355_v36 = vld [vmem:[%s3750_s1 + $0xa08] sm:$0xff]  ;;  %v370_v38 = vld [vmem:[%s3750_s1 + $0xa80] sm:$0xff]  ;;  %v547_v39 = vrot.slane %v533_v29, %v2481_v48  ;;  %v548_v42 = vcombine.high %v540_v32, %v540_v32 }
  0xb3   :  { %2089 = vmatprep.subr.mxu1 %v415_v52  ;;  %2057 = vmatpush3.msra.mxu0 %v366_v53  ;;  %v388_v37 = vld [vmem:[%s3750_s1 + $0xb10] sm:$0xff]  ;;  %v403_v40 = vld [vmem:[%s3750_s1 + $0xb88] sm:$0xff]  ;;  %v354_v41 = vld [vmem:[%s3750_s1 + $0xa00] sm:$0xff] }
  0xb4   :  { %2090 = vmatpush3.msra.mxu1 %v399_v54  ;;  %2058 = vmatprep.subr.mxu0 %v381_v55  ;;  %v387_v43 = vld [vmem:[%s3750_s1 + $0xb08] sm:$0xff]  ;;  %v402_v48 = vld [vmem:[%s3750_s1 + $0xb80] sm:$0xff]  ;;  %v549_v45 = vcombine.high %v547_v39, %v547_v39  ;;  %v433_v46 = vld [vmem:[%s3750_s1 + $0xc78] sm:$0xff] }
  0xb5   :  { %2091 = vmatprep.subr.mxu1 %v414_v56  ;;  %2059 = vmatpush3.msra.mxu0 %v365_v57  ;;  %v386_v44 = vld [vmem:[%s3750_s1 + $0xb00] sm:$0xff]  ;;  %v432_v49 = vld [vmem:[%s3750_s1 + $0xc70] sm:$0xff]  ;;  %v431_v50 = vld [vmem:[%s3750_s1 + $0xc68] sm:$0xff] }
  0xb6   :  { %2092 = vmatpush3.msra.mxu1 %v398_v58  ;;  %2060 = vmatprep.subr.mxu0 %v380_v59  ;;  %v430_v51 = vld [vmem:[%s3750_s1 + $0xc60] sm:$0xff]  ;;  %v429_v52 = vld [vmem:[%s3750_s1 + $0xc58] sm:$0xff]  ;;  %v428_v53 = vld [vmem:[%s3750_s1 + $0xc50] sm:$0xff] }
  0xb7   :  { %2093 = vmatprep.subr.mxu1 %v413_v60  ;;  %2061 = vmatpush3.msra.mxu0 %v364_v61  ;;  %v427_v54 = vld [vmem:[%s3750_s1 + $0xc48] sm:$0xff]  ;;  %v426_v55 = vld [vmem:[%s3750_s1 + $0xc40] sm:$0xff]  ;;  %v425_v56 = vld [vmem:[%s3750_s1 + $0xc38] sm:$0xff] }
  0xb8   :  { %2094 = vmatpush3.msra.mxu1 %v397_v62  ;;  %2062 = vmatprep.subr.mxu0 %v379_v63  ;;  %v424_v57 = vld [vmem:[%s3750_s1 + $0xc30] sm:$0xff]  ;;  %v423_v58 = vld [vmem:[%s3750_s1 + $0xc28] sm:$0xff]  ;;  %v422_v59 = vld [vmem:[%s3750_s1 + $0xc20] sm:$0xff] }
  0xb9   :  { %2095 = vmatprep.subr.mxu1 %v412_v0  ;;  %2063 = vmatpush3.msra.mxu0 %v363_v1  ;;  %v421_v60 = vld [vmem:[%s3750_s1 + $0xc18] sm:$0xff]  ;;  %v420_v61 = vld [vmem:[%s3750_s1 + $0xc10] sm:$0xff]  ;;  %v419_v62 = vld [vmem:[%s3750_s1 + $0xc08] sm:$0xff] }
  0xba   :  { %2096 = vmatpush3.msra.mxu1 %v396_v2  ;;  %2064 = vmatprep.subr.mxu0 %v378_v3  ;;  %v418_v63 = vld [vmem:[%s3750_s1 + $0xc00] sm:$0xff]  ;;  %v1697_v0 = vld.sshfl [vmem:[%s3749_s0 + $0x30] sm:$0x3 pattern:$0x76325410]  ;;  %v1508_v1 = vld [vmem:[%s3752_s3 + $0x78] sm:$0xff] }
  0xbb   :  { %2097 = vmatprep.subr.mxu1 %v411_v4  ;;  %2065 = vmatpush3.msra.mxu0 %v362_v5  ;;  %v1507_v2 = vld [vmem:[%s3752_s3 + $0x70] sm:$0xff]  ;;  %v1506_v3 = vld [vmem:[%s3752_s3 + $0x68] sm:$0xff]  ;;  %v1505_v4 = vld [vmem:[%s3752_s3 + $0x60] sm:$0xff] }
  0xbc   :  { %2098 = vmatpush3.msra.mxu1 %v395_v6  ;;  %2066 = vmatprep.subr.mxu0 %v377_v7  ;;  %v1504_v5 = vld [vmem:[%s3752_s3 + $0x58] sm:$0xff]  ;;  %v1503_v6 = vld [vmem:[%s3752_s3 + $0x50] sm:$0xff]  ;;  %v1502_v7 = vld [vmem:[%s3752_s3 + $0x48] sm:$0xff] }
  0xbd   :  { %2099 = vmatprep.subr.mxu1 %v410_v8  ;;  %2067 = vmatpush3.msra.mxu0 %v361_v9  ;;  %v1501_v8 = vld [vmem:[%s3752_s3 + $0x40] sm:$0xff]  ;;  %v1500_v9 = vld [vmem:[%s3752_s3 + $0x38] sm:$0xff]  ;;  %v1597_v22 = vld [vmem:[%s3754_s5 + $0x50] sm:$0xff] }
  0xbe   :  { %2100 = vmatpush3.msra.mxu1 %v394_v10  ;;  %2068 = vmatprep.subr.mxu0 %v376_v11  ;;  %v1499_v10 = vld [vmem:[%s3752_s3 + $0x30] sm:$0xff]  ;;  %v1498_v11 = vld [vmem:[%s3752_s3 + $0x28] sm:$0xff]  ;;  %v1590_v29 = vld [vmem:[%s3754_s5 + $0x18] sm:$0xff] }
  0xbf   :  { %2101 = vmatprep.subr.mxu1 %v409_v12  ;;  %2069 = vmatpush3.msra.mxu0 %v360_v13  ;;  %v1497_v12 = vld [vmem:[%s3752_s3 + $0x20] sm:$0xff]  ;;  %v1496_v13 = vld [vmem:[%s3752_s3 + $0x18] sm:$0xff] }
  0xc0   :  { %2102 = vmatpush3.msra.mxu1 %v393_v14  ;;  %2070 = vmatprep.subr.mxu0 %v375_v15  ;;  %v1495_v14 = vld [vmem:[%s3752_s3 + $0x10] sm:$0xff]  ;;  %v1494_v15 = vld [vmem:[%s3752_s3 + $0x8] sm:$0xff] }
  0xc1   :  { %2103 = vmatprep.subr.mxu1 %v408_v16  ;;  %2071 = vmatpush3.msra.mxu0 %v359_v17  ;;  %v1493_v16 = vld [vmem:[%s3752_s3] sm:$0xff]  ;;  %v1602_v17 = vld [vmem:[%s3754_s5 + $0x78] sm:$0xff] }
  0xc2   :  { %2104 = vmatpush3.msra.mxu1 %v392_v18  ;;  %2072 = vmatprep.subr.mxu0 %v374_v19  ;;  %v1601_v18 = vld [vmem:[%s3754_s5 + $0x70] sm:$0xff]  ;;  %v1600_v19 = vld [vmem:[%s3754_s5 + $0x68] sm:$0xff] }
  0xc3   :  { %2105 = vmatprep.subr.mxu1 %v407_v20  ;;  %2073 = vmatpush3.msra.mxu0 %v358_v21  ;;  %v1599_v20 = vld [vmem:[%s3754_s5 + $0x60] sm:$0xff]  ;;  %v1598_v21 = vld [vmem:[%s3754_s5 + $0x58] sm:$0xff] }
  0xc4   :  { %2106 = vmatpush3.msra.mxu1 %v391_v23  ;;  %2074 = vmatprep.subr.mxu0 %v373_v24  ;;  %v1596_v23 = vld [vmem:[%s3754_s5 + $0x48] sm:$0xff]  ;;  %v1595_v24 = vld [vmem:[%s3754_s5 + $0x40] sm:$0xff] }
  0xc5   :  { %2107 = vmatprep.subr.mxu1 %v406_v25  ;;  %2075 = vmatpush3.msra.mxu0 %v357_v26  ;;  %v1594_v25 = vld [vmem:[%s3754_s5 + $0x38] sm:$0xff]  ;;  %v1593_v26 = vld [vmem:[%s3754_s5 + $0x30] sm:$0xff] }
  0xc6   :  { %2108 = vmatpush3.msra.mxu1 %v390_v27  ;;  %2076 = vmatprep.subr.mxu0 %v372_v28  ;;  %v1592_v27 = vld [vmem:[%s3754_s5 + $0x28] sm:$0xff]  ;;  %v1591_v28 = vld [vmem:[%s3754_s5 + $0x20] sm:$0xff] }
  0xc7   :  { %2109 = vmatprep.subr.mxu1 %v405_v30  ;;  %2077 = vmatpush3.msra.mxu0 %v356_v31 }
  0xc8   :  { %2110 = vmatpush3.msra.mxu1 %v389_v33  ;;  %2078 = vmatprep.subr.mxu0 %v371_v34 }
  0xc9   :  { %2111 = vmatprep.subr.mxu1 %v404_v35  ;;  %2079 = vmatpush3.msra.mxu0 %v355_v36  ;;  %v1696_v35 = vld [vmem:[%s3751_s2] ss:$0 sm:$0xff] }
  0xca   :  { %2112 = vmatpush3.msra.mxu1 %v388_v37  ;;  %2080 = vmatprep.subr.mxu0 %v370_v38 }
  0xcb   :  { %2113 = vmatprep.subr.mxu1 %v403_v40  ;;  %2081 = vmatpush3.msra.mxu0 %v354_v41 }
  0xcc   :  { %1346 = vmatprep.mubr.f32.mxu0 %v548_v42  ;;  %2114 = vmatpush3.msra.mxu1 %v387_v43 }
  0xcd   :  { %1347 = vmatmul.mubr.f32.vlgmr.msra.gmra.mxu0 %v540_v32  ;;  %2115 = vmatprep.subr.mxu1 %v402_v48 }
  0xce   :  { %2171 = vmatprep.subr.mxu0 %v2309_v47  ;;  %2116 = vmatpush3.msra.mxu1 %v386_v44 }
  0xcf   :  { %1416 = vmatprep.mubr.f32.mxu1 %v549_v45  ;;  %2172 = vmatpush3.msra.mxu0 %v433_v46 }
  0xd0   :  { %1417 = vmatmul.mubr.f32.vlgmr.msra.gmra.mxu1 %v547_v39  ;;  %2173 = vmatprep.subr.mxu0 %v2309_v47 }
  0xd1   :  { %2174 = vmatpush3.msra.mxu0 %v432_v49  ;;  %2203 = vmatprep.mubr.msk.f32.mxu0 %vm2310_vm0, %v2309_v47 }
  0xd2   :  { %2175 = vmatprep.subr.mxu0 %v2309_v47  ;;  %2206 = vmatprep.subr.mxu1 %v2309_v47 }
  0xd3   :  { %2176 = vmatpush3.msra.mxu0 %v431_v50  ;;  %2238 = vmatprep.mubr.msk.f32.mxu1 %vm2310_vm0, %v2309_v47 }
  0xd4   :  { %2177 = vmatprep.subr.mxu0 %v2309_v47  ;;  %2207 = vmatpush3.msra.mxu1 %v1508_v1 }
  0xd5   :  { %2178 = vmatpush3.msra.mxu0 %v430_v51  ;;  %2208 = vmatprep.subr.mxu1 %v2309_v47 }
  0xd6   :  { %2179 = vmatprep.subr.mxu0 %v2309_v47  ;;  %2209 = vmatpush3.msra.mxu1 %v1507_v2 }
  0xd7   :  { %2180 = vmatpush3.msra.mxu0 %v429_v52  ;;  %2210 = vmatprep.subr.mxu1 %v2309_v47 }
  0xd8   :  { %2181 = vmatprep.subr.mxu0 %v2309_v47  ;;  %2211 = vmatpush3.msra.mxu1 %v1506_v3 }
  0xd9   :  { %2182 = vmatpush3.msra.mxu0 %v428_v53  ;;  %2212 = vmatprep.subr.mxu1 %v2309_v47 }
  0xda   :  { %2183 = vmatprep.subr.mxu0 %v2309_v47  ;;  %2213 = vmatpush3.msra.mxu1 %v1505_v4 }
  0xdb   :  { %2184 = vmatpush3.msra.mxu0 %v427_v54  ;;  %2214 = vmatprep.subr.mxu1 %v2309_v47 }
  0xdc   :  { %2185 = vmatprep.subr.mxu0 %v2309_v47  ;;  %2215 = vmatpush3.msra.mxu1 %v1504_v5 }
  0xdd   :  { %2186 = vmatpush3.msra.mxu0 %v426_v55  ;;  %2216 = vmatprep.subr.mxu1 %v2309_v47 }
  0xde   :  { %2187 = vmatprep.subr.mxu0 %v2309_v47  ;;  %2217 = vmatpush3.msra.mxu1 %v1503_v6 }
  0xdf   :  { %2188 = vmatpush3.msra.mxu0 %v425_v56  ;;  %2218 = vmatprep.subr.mxu1 %v2309_v47 }
  0xe0   :  { %2189 = vmatprep.subr.mxu0 %v2309_v47  ;;  %2219 = vmatpush3.msra.mxu1 %v1502_v7 }
  0xe1   :  { %2190 = vmatpush3.msra.mxu0 %v424_v57  ;;  %2220 = vmatprep.subr.mxu1 %v2309_v47 }
  0xe2   :  { %2191 = vmatprep.subr.mxu0 %v2309_v47  ;;  %2221 = vmatpush3.msra.mxu1 %v1501_v8  ;;  %v1732_v30 = vpop.f32.mrf.mxu0 }
  0xe3   :  { %2192 = vmatpush3.msra.mxu0 %v423_v58  ;;  %2222 = vmatprep.subr.mxu1 %v2309_v47 }
  0xe4   :  { %2193 = vmatprep.subr.mxu0 %v2309_v47  ;;  %2223 = vmatpush3.msra.mxu1 %v1500_v9  ;;  %v1733_v31 = vpop.f32.mrf.mxu0 }
  0xe5   :  { %2194 = vmatpush3.msra.mxu0 %v422_v59  ;;  %2224 = vmatprep.subr.mxu1 %v2309_v47  ;;  %v1767_v32 = vpop.f32.mrf.mxu1  ;;  %v1734_v34 = vadd.f32 %v1733_v31, %v1732_v30 }
  0xe6   :  { %2195 = vmatprep.subr.mxu0 %v2309_v47  ;;  %2225 = vmatpush3.msra.mxu1 %v1499_v10 }
  0xe7   :  { %2196 = vmatpush3.msra.mxu0 %v421_v60  ;;  %2226 = vmatprep.subr.mxu1 %v2309_v47  ;;  %v1768_v36 = vpop.f32.mrf.mxu1  ;;  %v649_v39 = vadd.f32 %v1734_v34, %v1696_v35 }
  0xe8   :  { %2197 = vmatprep.subr.mxu0 %v2309_v47  ;;  %2227 = vmatpush3.msra.mxu1 %v1498_v11  ;;  %v1769_v40 = vadd.f32 %v1768_v36, %v1767_v32 }
  0xe9   :  { %2198 = vmatpush3.msra.mxu0 %v420_v61  ;;  %2228 = vmatprep.subr.mxu1 %v2309_v47 }
  0xea   :  { %2199 = vmatprep.subr.mxu0 %v2309_v47  ;;  %2229 = vmatpush3.msra.mxu1 %v1497_v12  ;;  %v719_v48 = vadd.f32 %v1769_v40, %v649_v39 }
  0xeb   :  { %2200 = vmatpush3.msra.mxu0 %v419_v62  ;;  %2230 = vmatprep.subr.mxu1 %v2309_v47 }
  0xec   :  { %2201 = vmatprep.subr.mxu0 %v2309_v47  ;;  %2231 = vmatpush3.msra.mxu1 %v1496_v13 }
  0xed   :  { %2202 = vmatpush3.msra.mxu0 %v418_v63  ;;  %2232 = vmatprep.subr.mxu1 %v2309_v47 }
  0xee   :  { %2204 = vmatmul.mubr.f32.vlgmr.msra.gmra.mxu0 %v1697_v0  ;;  %2241 = vmatprep.subr.mxu0 %v2309_v47 }
  0xef   :  { %2273 = vmatprep.mubr.msk.f32.mxu0 %vm2310_vm0, %v2309_v47  ;;  %2233 = vmatpush3.msra.mxu1 %v1495_v14 }
  0xf0   :  { %2234 = vmatprep.subr.mxu1 %v2309_v47  ;;  %2242 = vmatpush3.msra.mxu0 %v1602_v17 }
  0xf1   :  { %2235 = vmatpush3.msra.mxu1 %v1494_v15  ;;  %2243 = vmatprep.subr.mxu0 %v2309_v47 }
  0xf2   :  { %2236 = vmatprep.subr.mxu1 %v2309_v47  ;;  %2244 = vmatpush3.msra.mxu0 %v1601_v18 }
  0xf3   :  { %2237 = vmatpush3.msra.mxu1 %v1493_v16  ;;  %2245 = vmatprep.subr.mxu0 %v2309_v47 }
  0xf4   :  { %2246 = vmatpush3.msra.mxu0 %v1600_v19 }
  0xf5   :  { %2247 = vmatprep.subr.mxu0 %v2309_v47 }
  0xf6   :  { %2248 = vmatpush3.msra.mxu0 %v1599_v20  ;;  %v1589_v20 = vld [vmem:[%s3754_s5 + $0x10] sm:$0xff] }
  0xf7   :  { %2249 = vmatprep.subr.mxu0 %v2309_v47 }
  0xf8   :  { %2250 = vmatpush3.msra.mxu0 %v1598_v21  ;;  %v1588_v21 = vld [vmem:[%s3754_s5 + $0x8] sm:$0xff] }
  0xf9   :  { %2251 = vmatprep.subr.mxu0 %v2309_v47 }
  0xfa   :  { %2252 = vmatpush3.msra.mxu0 %v1597_v22  ;;  %v1587_v22 = vld [vmem:[%s3754_s5] sm:$0xff]  ;;  %s2286_s5 = scalar_lea.vmem %s1689_s26, 32 }
  0xfb   :  { %2253 = vmatprep.subr.mxu0 %v2309_v47  ;;  %p2287_p0 = scmp.ne.s32.totalorder %s1689_s26, %s2286_s5  ;;  %p2292_p2 = scmp.lt.s32.totalorder %s2286_s5, %s2286_s5 }
  0xfc   :  { %2254 = vmatpush3.msra.mxu0 %v1596_v23  ;;  %v1698_v23 = vld [vmem:[%s3753_s4] ss:$0 sm:$0xff] }
  0xfd   :  { %2255 = vmatprep.subr.mxu0 %v2309_v47  ;;  %p2293_p3 = por %p2292_p2, %p2291_p1 }
  0xfe   :  { %2256 = vmatpush3.msra.mxu0 %v1595_v24 }
  0xff   :  { %2257 = vmatprep.subr.mxu0 %v2309_v47  ;;  %p2294_p4 = pnand %p2293_p3, %p2287_p0 }
 0x100   :  { %2258 = vmatpush3.msra.mxu0 %v1594_v25 }
 0x101   :  { %2259 = vmatprep.subr.mxu0 %v2309_v47 }
 0x102   :  { %2260 = vmatpush3.msra.mxu0 %v1593_v26 }
 0x103   :  { %2261 = vmatprep.subr.mxu0 %v2309_v47 }
 0x104   :  { %2262 = vmatpush3.msra.mxu0 %v1592_v27  ;;  %v1802_v33 = vpop.f32.mrf.mxu0 }
 0x105   :  { %2263 = vmatprep.subr.mxu0 %v2309_v47 }
 0x106   :  { %2264 = vmatpush3.msra.mxu0 %v1591_v28  ;;  %v1803_v37 = vpop.f32.mrf.mxu0  ;;  %v1699_v28 = vld [vmem:[%s3755_s6] ss:$0 sm:$0xff] }
 0x107   :  { %2265 = vmatprep.subr.mxu0 %v2309_v47  ;;  %v1837_v38 = vpop.f32.mrf.mxu1  ;;  %v1804_v42 = vadd.f32 %v1803_v37, %v1802_v33 }
 0x108   :  { %2266 = vmatpush3.msra.mxu0 %v1590_v29 }
 0x109   :  { %2267 = vmatprep.subr.mxu0 %v2309_v47  ;;  %v1838_v43 = vpop.f32.mrf.mxu1  ;;  %v789_v46 = vadd.f32 %v1804_v42, %v719_v48 }
 0x10a   :  { %v1839_v49 = vadd.f32 %v1838_v43, %v1837_v38  ;;  %2268 = vmatpush3.msra.mxu0 %v1589_v20 }
 0x10b   :  { %2269 = vmatprep.subr.mxu0 %v2309_v47 }
 0x10c   :  { %v859_v53 = vadd.f32 %v1839_v49, %v789_v46  ;;  %2270 = vmatpush3.msra.mxu0 %v1588_v21 }
 0x10d   :  { %2271 = vmatprep.subr.mxu0 %v2309_v47 }
 0x10e   :  { %2272 = vmatpush3.msra.mxu0 %v1587_v22 }
 0x126   :  { %v1872_v41 = vpop.f32.mrf.mxu0 }
 0x128   :  { %v1873_v44 = vpop.f32.mrf.mxu0 }
 0x129   :  { %v1907_v45 = vpop.f32.mrf.mxu1  ;;  %v1874_v51 = vadd.f32 %v1873_v44, %v1872_v41 }
 0x12b   :  { %v1908_v52 = vpop.f32.mrf.mxu1  ;;  %v929_v56 = vadd.f32 %v1874_v51, %v859_v53 }
 0x12c   :  { %v1909_v57 = vadd.f32 %v1908_v52, %v1907_v45 }
 0x12e   :  { %v999_v61 = vadd.f32 %v1909_v57, %v929_v56 }
 0x148   :  { %v1942_v50 = vpop.f32.mrf.mxu0 }
 0x14a   :  { %v1943_v54 = vpop.f32.mrf.mxu0 }
 0x14b   :  { %v1944_v59 = vadd.f32 %v1943_v54, %v1942_v50 }
 0x14c   :  { %v1977_v55 = vpop.f32.mrf.mxu1 }
 0x14d   :  { %v1069_v0 = vadd.f32 %v1944_v59, %v999_v61 }
 0x14e   :  { %v1978_v60 = vpop.f32.mrf.mxu1 }
 0x14f   :  { %v1979_v1 = vadd.f32 %v1978_v60, %v1977_v55 }
 0x151   :  { %v1139_v5 = vadd.f32 %v1979_v1, %v1069_v0 }
 0x16b   :  { %v2012_v58 = vpop.f32.mrf.mxu0 }
 0x16d   :  { %v2013_v62 = vpop.f32.mrf.mxu0 }
 0x16e   :  { %v2047_v63 = vpop.f32.mrf.mxu1  ;;  %v2014_v3 = vadd.f32 %v2013_v62, %v2012_v58 }
 0x170   :  { %v2048_v4 = vpop.f32.mrf.mxu1  ;;  %v1209_v8 = vadd.f32 %v2014_v3, %v1139_v5 }
 0x171   :  { %v2049_v9 = vadd.f32 %v2048_v4, %v2047_v63 }
 0x173   :  { %v1279_v12 = vadd.f32 %v2049_v9, %v1209_v8 }
 0x18d   :  { %v2082_v2 = vpop.f32.mrf.mxu0 }
 0x18f   :  { %v2083_v6 = vpop.f32.mrf.mxu0 }
 0x190   :  { %v2117_v7 = vpop.f32.mrf.mxu1  ;;  %v2084_v10 = vadd.f32 %v2083_v6, %v2082_v2 }
 0x192   :  { %v2118_v11 = vpop.f32.mrf.mxu1  ;;  %v1349_v13 = vadd.f32 %v2084_v10, %v1279_v12 }
 0x193   :  { %v2119_v14 = vadd.f32 %v2118_v11, %v2117_v7 }
 0x195   :  { %v1419_v15 = vadd.f32 %v2119_v14, %v1349_v13 }
 0x1ae   :  { %v1488_v16 = vpop.f32.mrf.mxu0 }
 0x1af   :  { %v1489_v17 = vadd.f32 %v1488_v16, %v1419_v15 }
 0x1b0   :  { %v2205_v18 = vpop.f32.mrf.mxu0 }
 0x1b1   :  { %v1492_v19 = vmax.f32 %v1489_v17, 0.0 }
 0x1b3   :  { %2239 = vmatmul.mubr.f32.vlgmr.msra.gmra.mxu1 %v1492_v19 }
 0x273   :  { %v1582_v24 = vpop.f32.mrf.mxu1 }
 0x274   :  { %v1583_v25 = vadd.f32 %v1698_v23, %v1582_v24 }
 0x275   :  { %v2240_v26 = vpop.f32.mrf.mxu1 }
 0x276   :  { %v1586_v27 = vmax.f32 %v1583_v25, 0.0 }
 0x278   :  { %2274 = vmatmul.mubr.f32.vlgmr.msra.gmra.mxu0 %v1586_v27 }
 0x338   :  { %v1676_v47 = vpop.f32.mrf.mxu0 }
 0x339   :  { %v1677_v29 = vadd.f32 %v1699_v28, %v1676_v47 }
 0x33a   :  { %v2275_v30 = vpop.f32.mrf.mxu0 }
 0x33b   :  { %1681 = vst.msk [vmem:[#allocation2] sm:$0x3] %vm1680_vm1, %v1677_v29 }
 0x33c   :  { %2297 = shalt.err (!%p2294_p4)
}
 0x33d   :  { %1691 = dma.vmem_to_hbm [thread:$0]  %s1689_s26, 32, %s3756_s7, [#allocation3]  }
 0x33e   :  { %2306 = dma.done.wait [#allocation3], 32  }
 0x33f   :  { %2307 = vsyncadd [#allocation3], 4294967264 }
 0x340   :  { %1695 = vsyncpa [#allocation3], 1 }

</bundles_post_ra>
